<compile_context>
chip_gen: v6e
topology: v6e:2x2x1
jax: 0.10.0
libtpu: 0.0.40
codegen_flags: <defaults>
</compile_context>

<pallas_src>
import functools

import numpy as np
import jax
import jax.numpy as jnp
from jax.experimental import pallas as pl
from jax.experimental.pallas import tpu as pltpu

DTYPE = jnp.float32
LN_EPS = 1e-5


def _pick_vmem_limit():
    # ~half of physical VMEM: 64-96 MiB on v5e/v6e (128 MiB), 32 MiB on v7x (64 MiB).
    try:
        cap = int(pltpu.get_tpu_info().vmem_capacity_bytes)
        return max(32 * 1024 * 1024, min(cap // 2, 96 * 1024 * 1024))
    except Exception:  # interpret mode / older jax: conservative default
        return 32 * 1024 * 1024


VMEM_LIMIT = _pick_vmem_limit()


def _row_tile(m, f32_row_bytes):
    """Fixed large row tiles + cdiv grid (rows independent; Pallas masks the ragged last
    block).  Avoids the divisor trap where m with a factor of 49 collapses the tile."""
    budget = max(VMEM_LIMIT // 4, 4 * 1024 * 1024)
    for tm in (512, 256, 128):
        if tm <= m and tm * f32_row_bytes <= budget:
            return tm
    return m if m < 128 else 128


def _window_tile(n_windows, n_tokens, target_rows=512):
    """Largest divisor of nW with TW*N <= target_rows: >=~256 matmul rows per step
    (good MXU fill on v6e/v7x) while bounding live VMEM and deepening the pipeline."""
    best = 1
    for t in range(1, n_windows + 1):
        if n_windows % t == 0 and t * n_tokens <= target_rows:
            best = t
    return best


def _block_shift(i, H, W, ws):
    if min(H, W) <= ws:   # degenerate single-window case: no shifted mask
        return 0
    return 0 if i % 2 == 0 else ws // 2


def _layernorm_f32(x, gamma, beta, eps):
    mu = jnp.mean(x, axis=-1, keepdims=True)
    var = jnp.mean(jnp.square(x - mu), axis=-1, keepdims=True)
    return (x - mu) * jax.lax.rsqrt(var + eps) * gamma + beta


# ----------------------------- Pallas kernels ------------------------------

def _attn_block_kernel(x_ref, g1_ref, b1_ref, wqkv_ref, bqkv_ref, bias_ref,
                       wproj_ref, bproj_ref, o_ref, *, num_heads, eps, windowed_bias):
    """Fused LN1 + fused QKV + window attention (+pre-combined bias) + proj + residual.

    One grid step = TW windows.
      x_ref    : (TW, N, C) f32      residual-stream tokens in window order
      wqkv_ref : (C, 3C)    bf16     fused qkv weight, attention scale folded into q cols
      bqkv_ref : (1, 3C)    f32
      bias_ref : (TW, nH, N, N) f32  rel-pos bias + shift mask   (windowed_bias=True)
                 (nH, N, N)     f32  rel-pos bias only           (windowed_bias=False)
      wproj_ref: (C, C)     bf16     output projection
    """
    TW, N, C = x_ref.shape
    hd = C // num_heads

    x = x_ref[...].astype(jnp.float32)
    xf = x.reshape(TW * N, C)                 # merge leading dims (N is a multiple of 8)
    xn = _layernorm_f32(xf, g1_ref[...], b1_ref[...], eps)

    # One lane-dense (M, C) @ (C, 3C) matmul for q, k, v of every head.
    qkv = jnp.dot(xn.astype(jnp.bfloat16), wqkv_ref[...],
                  preferred_element_type=jnp.float32) + bqkv_ref[...]
    q = qkv[:, :C]
    k = qkv[:, C:2 * C]
    v = qkv[:, 2 * C:]

    bias = bias_ref[...]

    # TODO(synk): for num_heads >= 12 switch to lax.fori_loop / heads-batched einsum to
    # bound live ranges; small head counts unroll fine.
    o_heads = []
    for h in range(num_heads):
        lo, hi = h * hd, (h + 1) * hd
        qh = q[:, lo:hi].reshape(TW, N, hd).astype(jnp.bfloat16)
        kh = k[:, lo:hi].reshape(TW, N, hd).astype(jnp.bfloat16)
        vh = v[:, lo:hi].reshape(TW, N, hd).astype(jnp.bfloat16)

        s = jnp.einsum("wnd,wmd->wnm", qh, kh,
                       preferred_element_type=jnp.float32)          # (TW, N, N)
        s = s + (bias[:, h] if windowed_bias else bias[h][None])
        s = s - jnp.max(s, axis=-1, keepdims=True)
        p = jnp.exp(s)
        # approx reciprocal on the EUP; swap for an exact divide if strict parity needed
        p = p * pl.reciprocal(jnp.sum(p, axis=-1, keepdims=True), approx=True)

        o_h = jnp.einsum("wnm,wmd->wnd", p.astype(jnp.bfloat16), vh,
                         preferred_element_type=jnp.float32)         # (TW, N, hd)
        o_heads.append(o_h.reshape(TW * N, hd).astype(jnp.bfloat16))

    o_all = jnp.concatenate(o_heads, axis=-1) if num_heads > 1 else o_heads[0]
    # Single full-K output projection (K = C) instead of per-head K = hd accumulation.
    y = jnp.dot(o_all, wproj_ref[...],
                preferred_element_type=jnp.float32) + bproj_ref[...]
    o_ref[...] = (xf + y).reshape(TW, N, C).astype(o_ref.dtype)


def _mlp_block_kernel(x_ref, g_ref, b_ref, w1_ref, b1_ref, w2_ref, b2_ref, o_ref, *, eps):
    """Fused LN2 -> fc1 -> tanh-GELU -> fc2 -> residual on a row tile."""
    x = x_ref[...].astype(jnp.float32)
    xn = _layernorm_f32(x, g_ref[...], b_ref[...], eps)
    h = jnp.dot(xn.astype(jnp.bfloat16), w1_ref[...],
                preferred_element_type=jnp.float32) + b1_ref[...]
    # tanh-approx GELU (single EUP tanh; matches torch.nn.GELU(erf) to ~1e-3)
    h = 0.5 * h * (1.0 + jnp.tanh(0.7978845608028654 * (h + 0.044715 * (h * h * h))))
    y = jnp.dot(h.astype(jnp.bfloat16), w2_ref[...],
                preferred_element_type=jnp.float32) + b2_ref[...]
    o_ref[...] = (x + y).astype(o_ref.dtype)


def _merge_kernel(x_ref, g_ref, b_ref, w_ref, o_ref, *, eps):
    """Fused PatchMerging LayerNorm + reduction Linear(4C -> 2C, no bias)."""
    x = x_ref[...].astype(jnp.float32)
    xn = _layernorm_f32(x, g_ref[...], b_ref[...], eps)
    o_ref[...] = jnp.dot(xn.astype(jnp.bfloat16), w_ref[...],
                         preferred_element_type=jnp.float32).astype(o_ref.dtype)


# ----------------------------- kernel wrappers ------------------------------

def attention_block(xw, p, *, num_heads, n_windows, windowed_bias):
    nwin, N, C = xw.shape
    B = nwin // n_windows
    TW = _window_tile(n_windows, N)
    nWT = n_windows // TW

    if windowed_bias:
        bias_spec = pl.BlockSpec((TW, num_heads, N, N), lambda b, w: (w, 0, 0, 0))
    else:
        bias_spec = pl.BlockSpec((num_heads, N, N), lambda b, w: (0, 0, 0))

    # TODO(synk): on v7x, pipeline_mode=pl.Buffered(1) on the constant-index weight
    # operands below would halve their resident VMEM footprint.
    kern = functools.partial(_attn_block_kernel, num_heads=num_heads, eps=LN_EPS,
                             windowed_bias=windowed_bias)
    return pl.pallas_call(
        kern,
        out_shape=jax.ShapeDtypeStruct((nwin, N, C), xw.dtype),
        grid=(B, nWT),
        in_specs=[
            pl.BlockSpec((TW, N, C), lambda b, w: (b * nWT + w, 0, 0)),
            pl.BlockSpec((1, C), lambda b, w: (0, 0)),
            pl.BlockSpec((1, C), lambda b, w: (0, 0)),
            pl.BlockSpec((C, 3 * C), lambda b, w: (0, 0)),
            pl.BlockSpec((1, 3 * C), lambda b, w: (0, 0)),
            bias_spec,
            pl.BlockSpec((C, C), lambda b, w: (0, 0)),
            pl.BlockSpec((1, C), lambda b, w: (0, 0)),
        ],
        out_specs=pl.BlockSpec((TW, N, C), lambda b, w: (b * nWT + w, 0, 0)),
        compiler_params=pltpu.CompilerParams(
            dimension_semantics=("parallel", "parallel"),
            vmem_limit_bytes=VMEM_LIMIT),
    )(xw, p["norm1_g"], p["norm1_b"], p["wqkv"], p["bqkv"], p["bias"],
      p["wproj"], p["bproj"])


def mlp_block(x, p):
    m, c = x.shape
    hidden = p["fc1_w"].shape[1]
    tm = _row_tile(m, 4 * (hidden + 8 * c))
    # TODO(synk): for very large hidden (e.g. 3072 at C=768 on v7x) add a hidden-dim grid
    # axis with an f32 VMEM accumulator so the f32 hidden intermediate stays small.
    return pl.pallas_call(
        functools.partial(_mlp_block_kernel, eps=LN_EPS),
        out_shape=jax.ShapeDtypeStruct((m, c), x.dtype),
        grid=(pl.cdiv(m, tm),),
        in_specs=[
            pl.BlockSpec((tm, c), lambda i: (i, 0)),
            pl.BlockSpec((1, c), lambda i: (0, 0)),
            pl.BlockSpec((1, c), lambda i: (0, 0)),
            pl.BlockSpec((c, hidden), lambda i: (0, 0)),
            pl.BlockSpec((1, hidden), lambda i: (0, 0)),
            pl.BlockSpec((hidden, c), lambda i: (0, 0)),
            pl.BlockSpec((1, c), lambda i: (0, 0)),
        ],
        out_specs=pl.BlockSpec((tm, c), lambda i: (i, 0)),
        compiler_params=pltpu.CompilerParams(
            dimension_semantics=("parallel",), vmem_limit_bytes=VMEM_LIMIT),
    )(x, p["norm2_g"], p["norm2_b"], p["fc1_w"], p["fc1_b"], p["fc2_w"], p["fc2_b"])


def merge_block(x, p):
    m, c4 = x.shape
    c2 = p["reduction_w"].shape[1]
    tm = _row_tile(m, 4 * (3 * c4 + 2 * c2))
    return pl.pallas_call(
        functools.partial(_merge_kernel, eps=LN_EPS),
        out_shape=jax.ShapeDtypeStruct((m, c2), x.dtype),
        grid=(pl.cdiv(m, tm),),
        in_specs=[
            pl.BlockSpec((tm, c4), lambda i: (i, 0)),
            pl.BlockSpec((1, c4), lambda i: (0, 0)),
            pl.BlockSpec((1, c4), lambda i: (0, 0)),
            pl.BlockSpec((c4, c2), lambda i: (0, 0)),
        ],
        out_specs=pl.BlockSpec((tm, c2), lambda i: (i, 0)),
        compiler_params=pltpu.CompilerParams(
            dimension_semantics=("parallel",), vmem_limit_bytes=VMEM_LIMIT),
    )(x, p["norm_g"], p["norm_b"], p["reduction_w"])


# ------------------------------- JAX glue -----------------------------------

def window_partition(x, ws):
    b, h, w, c = x.shape
    x = x.reshape(b, h // ws, ws, w // ws, ws, c)
    return x.transpose(0, 1, 3, 2, 4, 5).reshape(-1, ws * ws, c)


def window_reverse(windows, ws, b, h, w):
    c = windows.shape[-1]
    x = windows.reshape(b, h // ws, w // ws, ws, ws, c)
    return x.transpose(0, 1, 3, 2, 4, 5).reshape(b, h, w, c)


def relative_position_index(ws):
    coords = np.stack(np.meshgrid(np.arange(ws), np.arange(ws), indexing="ij"))
    flat = coords.reshape(2, -1)
    rel = flat[:, :, None] - flat[:, None, :]
    rel = rel.transpose(1, 2, 0).astype(np.int64)
    rel[:, :, 0] += ws - 1
    rel[:, :, 1] += ws - 1
    rel[:, :, 0] *= 2 * ws - 1
    return rel.sum(-1)  # (N, N)


def shifted_window_mask(h, w, ws, shift):
    img = np.zeros((h, w), np.float32)
    cnt = 0
    for hs in (slice(0, -ws), slice(-ws, -shift), slice(-shift, None)):
        for wsl in (slice(0, -ws), slice(-ws, -shift), slice(-shift, None)):
            img[hs, wsl] = cnt
            cnt += 1
    mw = img.reshape(h // ws, ws, w // ws, ws).transpose(0, 2, 1, 3).reshape(-1, ws * ws)
    mask = mw[:, None, :] - mw[:, :, None]
    return np.where(mask != 0, -100.0, 0.0).astype(np.float32)  # (nW, N, N)


def transformer_block(x, p, H, W, ws, num_heads, shift):
    B, L, C = x.shape
    nW = (H // ws) * (W // ws)
    N = ws * ws

    # cyclic shift + window partition of the residual stream (pure permutation glue)
    xs = x.reshape(B, H, W, C)
    if shift > 0:
        xs = jnp.roll(xs, (-shift, -shift), axis=(1, 2))
    xw = window_partition(xs, ws)                               # (B*nW, N, C)

    # fused LN1 + QKV + attention + proj + residual
    yw = attention_block(xw, p, num_heads=num_heads, n_windows=nW,
                         windowed_bias=(shift > 0))

    # fused LN2 + MLP + residual (per-token op -> run it in window order, no extra permute)
    zf = mlp_block(yw.reshape(B * nW * N, C), p)
    zw = zf.reshape(B * nW, N, C)

    xr = window_reverse(zw, ws, B, H, W)
    if shift > 0:
        xr = jnp.roll(xr, (shift, shift), axis=(1, 2))
    return xr.reshape(B, L, C)


def patch_merge(x, p, H, W):
    B, L, C = x.shape
    xg = x.reshape(B, H, W, C)
    x0 = xg[:, 0::2, 0::2, :]
    x1 = xg[:, 1::2, 0::2, :]
    x2 = xg[:, 0::2, 1::2, :]
    x3 = xg[:, 1::2, 1::2, :]
    xc = jnp.concatenate([x0, x1, x2, x3], axis=-1)
    xc = xc.reshape(B * (H // 2) * (W // 2), 4 * C)
    y = merge_block(xc, p)
    return y.reshape(B, (H // 2) * (W // 2), 2 * C)


def basic_block_down(x, prepared, H, W, ws, num_heads, downsample):
    for i, p in enumerate(prepared["blocks"]):
        shift = _block_shift(i, H, W, ws)
        x = transformer_block(x, p, H, W, ws, num_heads, shift)
    if downsample:
        x = patch_merge(x, prepared["merge"], H, W)
    return x


# ---------------------------- parameter setup -------------------------------

def init_params(key, dim, ws, num_heads, depth):
    # TODO(synk): dropout / drop_path of the reference block are inference no-ops here.
    n_bias = (2 * ws - 1) ** 2
    hidden = 4 * dim
    blocks = []
    for _ in range(depth):
        key, *ks = jax.random.split(key, 6)
        blocks.append(dict(
            norm1_g=jnp.ones((dim,), DTYPE), norm1_b=jnp.zeros((dim,), DTYPE),
            qkv_w=0.02 * jax.random.normal(ks[0], (dim, 3 * dim), DTYPE),
            qkv_b=jnp.zeros((3 * dim,), DTYPE),
            rel_bias_table=0.02 * jax.random.normal(ks[1], (n_bias, num_heads), DTYPE),
            proj_w=0.02 * jax.random.normal(ks[2], (dim, dim), DTYPE),
            proj_b=jnp.zeros((dim,), DTYPE),
            norm2_g=jnp.ones((dim,), DTYPE), norm2_b=jnp.zeros((dim,), DTYPE),
            fc1_w=0.02 * jax.random.normal(ks[3], (dim, hidden), DTYPE),
            fc1_b=jnp.zeros((hidden,), DTYPE),
            fc2_w=0.02 * jax.random.normal(ks[4], (hidden, dim), DTYPE),
            fc2_b=jnp.zeros((dim,), DTYPE),
        ))
    key, k1 = jax.random.split(key)
    merge = dict(
        norm_g=jnp.ones((4 * dim,), DTYPE), norm_b=jnp.zeros((4 * dim,), DTYPE),
        reduction_w=0.02 * jax.random.normal(k1, (4 * dim, 2 * dim), DTYPE),
    )
    return dict(blocks=blocks, merge=merge)


def prepare_params(params, H, W, ws, num_heads):
    """One-time weight rearrangement: fused bf16 QKV/proj weights with the attention
    scale folded into q, pre-gathered relative-position bias (+ shift mask pre-added for
    shifted blocks), bf16 MLP/merge weights, biases reshaped for broadcast."""
    rel_index = relative_position_index(ws)                      # (N, N) numpy
    mask = None
    blocks = []
    for i, p in enumerate(params["blocks"]):
        C = p["qkv_w"].shape[0]
        hd = C // num_heads
        scale = float(hd) ** -0.5
        shift = _block_shift(i, H, W, ws)

        col_scale = jnp.concatenate([jnp.full((C,), scale, DTYPE),
                                     jnp.ones((2 * C,), DTYPE)])
        wqkv = (p["qkv_w"] * col_scale[None, :]).astype(jnp.bfloat16)     # (C, 3C)
        bqkv = (p["qkv_b"] * col_scale).reshape(1, 3 * C).astype(DTYPE)

        relb = jnp.transpose(p["rel_bias_table"][rel_index], (2, 0, 1))   # (nH, N, N)
        if shift > 0:
            if mask is None:
                mask = jnp.asarray(shifted_window_mask(H, W, ws, shift))  # (nW, N, N)
            bias = relb[None, :, :, :] + mask[:, None, :, :]              # (nW, nH, N, N)
        else:
            bias = relb                                                    # (nH, N, N)

        blocks.append(dict(
            norm1_g=p["norm1_g"].reshape(1, C), norm1_b=p["norm1_b"].reshape(1, C),
            wqkv=wqkv, bqkv=bqkv, bias=bias,
            wproj=p["proj_w"].astype(jnp.bfloat16), bproj=p["proj_b"].reshape(1, C),
            norm2_g=p["norm2_g"].reshape(1, C), norm2_b=p["norm2_b"].reshape(1, C),
            fc1_w=p["fc1_w"].astype(jnp.bfloat16), fc1_b=p["fc1_b"].reshape(1, -1),
            fc2_w=p["fc2_w"].astype(jnp.bfloat16), fc2_b=p["fc2_b"].reshape(1, C),
        ))
    out = dict(blocks=blocks)
    if "merge" in params:
        mp = params["merge"]
        c4 = mp["norm_g"].shape[0]
        out["merge"] = dict(
            norm_g=mp["norm_g"].reshape(1, c4), norm_b=mp["norm_b"].reshape(1, c4),
            reduction_w=mp["reduction_w"].astype(jnp.bfloat16))
    return out


if __name__ == "__main__":
    B, dim = 2, 32
    H = W = 8
    window_size = 4
    num_heads = 2
    depth = 2
    downsample = True

    x = jax.random.normal(jax.random.PRNGKey(0), (B, H * W, dim), DTYPE)
    raw_params = init_params(jax.random.PRNGKey(42), dim, window_size, num_heads, depth)
    prepared = prepare_params(raw_params, H, W, window_size, num_heads)

    fwd = jax.jit(functools.partial(
        basic_block_down, H=H, W=W, ws=window_size, num_heads=num_heads,
        downsample=downsample))
    y = fwd(x, prepared)
    y = jax.block_until_ready(y)
    assert y.shape == (B, (H // 2) * (W // 2), 2 * dim), y.shape
    assert bool(jnp.all(jnp.isfinite(y)))
    print("KERNEL_OK")
</pallas_src>

<mosaic_0001>
module attributes {stable_mosaic.version = 11 : i64} {
  func.func @_attn_block_kernel(%arg0: i32, %arg1: i32, %arg2: memref<4x16x32xf32, #tpu.memory_space<vmem>>, %arg3: memref<1x32xf32, #tpu.memory_space<vmem>>, %arg4: memref<1x32xf32, #tpu.memory_space<vmem>>, %arg5: memref<32x96xbf16, #tpu.memory_space<vmem>>, %arg6: memref<1x96xf32, #tpu.memory_space<vmem>>, %arg7: memref<2x16x16xf32, #tpu.memory_space<vmem>>, %arg8: memref<32x32xbf16, #tpu.memory_space<vmem>>, %arg9: memref<1x32xf32, #tpu.memory_space<vmem>>, %arg10: memref<4x16x32xf32, #tpu.memory_space<vmem>>) attributes {dimension_semantics = [#tpu.dimension_semantics<parallel>, #tpu.dimension_semantics<parallel>], iteration_bounds = array<i64: 2, 1>, scalar_prefetch = 0 : i64, scratch_operands = 0 : i64, tpu.core_type = #tpu.core_type<tc>, window_params = [{transform_indices = @transform_0, window_bounds = array<i64: 4, 16, 32>}, {pipeline_mode = #tpu.pipeline_mode<synchronous>, transform_indices = @transform_1, window_bounds = array<i64: 1, 32>}, {pipeline_mode = #tpu.pipeline_mode<synchronous>, transform_indices = @transform_2, window_bounds = array<i64: 1, 32>}, {pipeline_mode = #tpu.pipeline_mode<synchronous>, transform_indices = @transform_3, window_bounds = array<i64: 32, 96>}, {pipeline_mode = #tpu.pipeline_mode<synchronous>, transform_indices = @transform_4, window_bounds = array<i64: 1, 96>}, {pipeline_mode = #tpu.pipeline_mode<synchronous>, transform_indices = @transform_5, window_bounds = array<i64: 2, 16, 16>}, {pipeline_mode = #tpu.pipeline_mode<synchronous>, transform_indices = @transform_6, window_bounds = array<i64: 32, 32>}, {pipeline_mode = #tpu.pipeline_mode<synchronous>, transform_indices = @transform_7, window_bounds = array<i64: 1, 32>}, {transform_indices = @transform_8, window_bounds = array<i64: 4, 16, 32>}]} {
    %c0 = arith.constant 0 : index
    %c0_0 = arith.constant 0 : index
    %c0_1 = arith.constant 0 : index
    %0 = vector.load %arg2[%c0, %c0_0, %c0_1] : memref<4x16x32xf32, #tpu.memory_space<vmem>>, vector<4x16x32xf32>
    %1 = vector.shape_cast %0 : vector<4x16x32xf32> to vector<64x32xf32>
    %c0_2 = arith.constant 0 : index
    %c0_3 = arith.constant 0 : index
    %2 = vector.load %arg3[%c0_2, %c0_3] : memref<1x32xf32, #tpu.memory_space<vmem>>, vector<1x32xf32>
    %c0_4 = arith.constant 0 : index
    %c0_5 = arith.constant 0 : index
    %3 = vector.load %arg4[%c0_4, %c0_5] : memref<1x32xf32, #tpu.memory_space<vmem>>, vector<1x32xf32>
    %cst = arith.constant dense<0.000000e+00> : vector<64xf32>
    %4 = vector.multi_reduction <add>, %1, %cst [1] : vector<64x32xf32> to vector<64xf32>
    %5 = vector.shape_cast %4 : vector<64xf32> to vector<64x1xf32>
    %cst_6 = arith.constant 3.200000e+01 : f32
    %6 = vector.broadcast %cst_6 : f32 to vector<64x1xf32>
    %7 = arith.divf %5, %6 : vector<64x1xf32>
    %8 = vector.broadcast %7 : vector<64x1xf32> to vector<64x32xf32>
    %9 = arith.subf %1, %8 : vector<64x32xf32>
    %10 = arith.mulf %9, %9 : vector<64x32xf32>
    %cst_7 = arith.constant dense<0.000000e+00> : vector<64xf32>
    %11 = vector.multi_reduction <add>, %10, %cst_7 [1] : vector<64x32xf32> to vector<64xf32>
    %12 = vector.shape_cast %11 : vector<64xf32> to vector<64x1xf32>
    %cst_8 = arith.constant 3.200000e+01 : f32
    %13 = vector.broadcast %cst_8 : f32 to vector<64x1xf32>
    %14 = arith.divf %12, %13 : vector<64x1xf32>
    %15 = vector.broadcast %7 : vector<64x1xf32> to vector<64x32xf32>
    %16 = arith.subf %1, %15 : vector<64x32xf32>
    %cst_9 = arith.constant 9.99999974E-6 : f32
    %17 = vector.broadcast %cst_9 : f32 to vector<64x1xf32>
    %18 = arith.addf %14, %17 : vector<64x1xf32>
    %19 = math.rsqrt %18 : vector<64x1xf32>
    %20 = vector.broadcast %19 : vector<64x1xf32> to vector<64x32xf32>
    %21 = arith.mulf %16, %20 : vector<64x32xf32>
    %22 = vector.broadcast %2 : vector<1x32xf32> to vector<64x32xf32>
    %23 = arith.mulf %21, %22 : vector<64x32xf32>
    %24 = vector.broadcast %3 : vector<1x32xf32> to vector<64x32xf32>
    %25 = arith.addf %23, %24 : vector<64x32xf32>
    %26 = arith.truncf %25 : vector<64x32xf32> to vector<64x32xbf16>
    %c0_10 = arith.constant 0 : index
    %c0_11 = arith.constant 0 : index
    %27 = vector.load %arg5[%c0_10, %c0_11] : memref<32x96xbf16, #tpu.memory_space<vmem>>, vector<32x96xbf16>
    %cst_12 = arith.constant dense<0.000000e+00> : vector<64x96xf32>
    %28 = tpu.matmul %26, %27, %cst_12 {dimension_numbers = #tpu.dot_dimension_numbers<[1], [0], [0], [1], [0, 0, 1, 1], [], []>} : vector<64x32xbf16>, vector<32x96xbf16>, vector<64x96xf32> -> vector<64x96xf32>
    %c0_13 = arith.constant 0 : index
    %c0_14 = arith.constant 0 : index
    %29 = vector.load %arg6[%c0_13, %c0_14] : memref<1x96xf32, #tpu.memory_space<vmem>>, vector<1x96xf32>
    %30 = vector.broadcast %29 : vector<1x96xf32> to vector<64x96xf32>
    %31 = arith.addf %28, %30 : vector<64x96xf32>
    %32 = vector.extract_strided_slice %31 {offsets = [0, 0], sizes = [64, 32], strides = [1, 1]} : vector<64x96xf32> to vector<64x32xf32>
    %33 = vector.extract_strided_slice %31 {offsets = [0, 32], sizes = [64, 32], strides = [1, 1]} : vector<64x96xf32> to vector<64x32xf32>
    %34 = vector.extract_strided_slice %31 {offsets = [0, 64], sizes = [64, 32], strides = [1, 1]} : vector<64x96xf32> to vector<64x32xf32>
    %c0_15 = arith.constant 0 : index
    %c0_16 = arith.constant 0 : index
    %c0_17 = arith.constant 0 : index
    %35 = vector.load %arg7[%c0_15, %c0_16, %c0_17] : memref<2x16x16xf32, #tpu.memory_space<vmem>>, vector<2x16x16xf32>
    %36 = vector.extract_strided_slice %32 {offsets = [0, 0], sizes = [64, 16], strides = [1, 1]} : vector<64x32xf32> to vector<64x16xf32>
    %37 = vector.shape_cast %36 : vector<64x16xf32> to vector<4x16x16xf32>
    %38 = arith.truncf %37 : vector<4x16x16xf32> to vector<4x16x16xbf16>
    %39 = vector.extract_strided_slice %33 {offsets = [0, 0], sizes = [64, 16], strides = [1, 1]} : vector<64x32xf32> to vector<64x16xf32>
    %40 = vector.shape_cast %39 : vector<64x16xf32> to vector<4x16x16xf32>
    %41 = arith.truncf %40 : vector<4x16x16xf32> to vector<4x16x16xbf16>
    %42 = vector.extract_strided_slice %34 {offsets = [0, 0], sizes = [64, 16], strides = [1, 1]} : vector<64x32xf32> to vector<64x16xf32>
    %43 = vector.shape_cast %42 : vector<64x16xf32> to vector<4x16x16xf32>
    %44 = arith.truncf %43 : vector<4x16x16xf32> to vector<4x16x16xbf16>
    "tpu.trace_start"() <{level = 10 : i32, message = "wnd,wmd->wnm"}> : () -> ()
    %cst_18 = arith.constant dense<0.000000e+00> : vector<4x16x16xf32>
    %45 = tpu.matmul %38, %41, %cst_18 {dimension_numbers = #tpu.dot_dimension_numbers<[2], [2], [1], [1], [0, 0, 0, 1, 1, 1], [0], [0]>} : vector<4x16x16xbf16>, vector<4x16x16xbf16>, vector<4x16x16xf32> -> vector<4x16x16xf32>
    "tpu.trace_stop"() : () -> ()
    %46 = vector.extract_strided_slice %35 {offsets = [0, 0, 0], sizes = [1, 16, 16], strides = [1, 1, 1]} : vector<2x16x16xf32> to vector<1x16x16xf32>
    %47 = vector.shape_cast %46 : vector<1x16x16xf32> to vector<16x16xf32>
    %48 = vector.shape_cast %47 : vector<16x16xf32> to vector<1x16x16xf32>
    %49 = vector.broadcast %48 : vector<1x16x16xf32> to vector<4x16x16xf32>
    %50 = arith.addf %45, %49 : vector<4x16x16xf32>
    %cst_19 = arith.constant dense<0xFF800000> : vector<4x16xf32>
    %51 = vector.multi_reduction <maximumf>, %50, %cst_19 [2] : vector<4x16x16xf32> to vector<4x16xf32>
    %52 = vector.shape_cast %51 : vector<4x16xf32> to vector<4x16x1xf32>
    %53 = vector.broadcast %52 : vector<4x16x1xf32> to vector<4x16x16xf32>
    %54 = arith.subf %50, %53 : vector<4x16x16xf32>
    %55 = math.exp %54 : vector<4x16x16xf32>
    %cst_20 = arith.constant dense<0.000000e+00> : vector<4x16xf32>
    %56 = vector.multi_reduction <add>, %55, %cst_20 [2] : vector<4x16x16xf32> to vector<4x16xf32>
    %57 = vector.shape_cast %56 : vector<4x16xf32> to vector<4x16x1xf32>
    %58 = tpu.reciprocal %57 {approx = true} : vector<4x16x1xf32> -> vector<4x16x1xf32>
    %59 = vector.broadcast %58 : vector<4x16x1xf32> to vector<4x16x16xf32>
    %60 = arith.mulf %55, %59 : vector<4x16x16xf32>
    %61 = arith.truncf %60 : vector<4x16x16xf32> to vector<4x16x16xbf16>
    "tpu.trace_start"() <{level = 10 : i32, message = "wnm,wmd->wnd"}> : () -> ()
    %cst_21 = arith.constant dense<0.000000e+00> : vector<4x16x16xf32>
    %62 = tpu.matmul %61, %44, %cst_21 {dimension_numbers = #tpu.dot_dimension_numbers<[2], [1], [1], [2], [0, 0, 0, 1, 1, 2], [0], [0]>} : vector<4x16x16xbf16>, vector<4x16x16xbf16>, vector<4x16x16xf32> -> vector<4x16x16xf32>
    "tpu.trace_stop"() : () -> ()
    %63 = vector.shape_cast %62 : vector<4x16x16xf32> to vector<64x16xf32>
    %64 = arith.truncf %63 : vector<64x16xf32> to vector<64x16xbf16>
    %65 = vector.extract_strided_slice %32 {offsets = [0, 16], sizes = [64, 16], strides = [1, 1]} : vector<64x32xf32> to vector<64x16xf32>
    %66 = vector.shape_cast %65 : vector<64x16xf32> to vector<4x16x16xf32>
    %67 = arith.truncf %66 : vector<4x16x16xf32> to vector<4x16x16xbf16>
    %68 = vector.extract_strided_slice %33 {offsets = [0, 16], sizes = [64, 16], strides = [1, 1]} : vector<64x32xf32> to vector<64x16xf32>
    %69 = vector.shape_cast %68 : vector<64x16xf32> to vector<4x16x16xf32>
    %70 = arith.truncf %69 : vector<4x16x16xf32> to vector<4x16x16xbf16>
    %71 = vector.extract_strided_slice %34 {offsets = [0, 16], sizes = [64, 16], strides = [1, 1]} : vector<64x32xf32> to vector<64x16xf32>
    %72 = vector.shape_cast %71 : vector<64x16xf32> to vector<4x16x16xf32>
    %73 = arith.truncf %72 : vector<4x16x16xf32> to vector<4x16x16xbf16>
    "tpu.trace_start"() <{level = 10 : i32, message = "wnd,wmd->wnm"}> : () -> ()
    %cst_22 = arith.constant dense<0.000000e+00> : vector<4x16x16xf32>
    %74 = tpu.matmul %67, %70, %cst_22 {dimension_numbers = #tpu.dot_dimension_numbers<[2], [2], [1], [1], [0, 0, 0, 1, 1, 1], [0], [0]>} : vector<4x16x16xbf16>, vector<4x16x16xbf16>, vector<4x16x16xf32> -> vector<4x16x16xf32>
    "tpu.trace_stop"() : () -> ()
    %75 = vector.extract_strided_slice %35 {offsets = [1, 0, 0], sizes = [1, 16, 16], strides = [1, 1, 1]} : vector<2x16x16xf32> to vector<1x16x16xf32>
    %76 = vector.shape_cast %75 : vector<1x16x16xf32> to vector<16x16xf32>
    %77 = vector.shape_cast %76 : vector<16x16xf32> to vector<1x16x16xf32>
    %78 = vector.broadcast %77 : vector<1x16x16xf32> to vector<4x16x16xf32>
    %79 = arith.addf %74, %78 : vector<4x16x16xf32>
    %cst_23 = arith.constant dense<0xFF800000> : vector<4x16xf32>
    %80 = vector.multi_reduction <maximumf>, %79, %cst_23 [2] : vector<4x16x16xf32> to vector<4x16xf32>
    %81 = vector.shape_cast %80 : vector<4x16xf32> to vector<4x16x1xf32>
    %82 = vector.broadcast %81 : vector<4x16x1xf32> to vector<4x16x16xf32>
    %83 = arith.subf %79, %82 : vector<4x16x16xf32>
    %84 = math.exp %83 : vector<4x16x16xf32>
    %cst_24 = arith.constant dense<0.000000e+00> : vector<4x16xf32>
    %85 = vector.multi_reduction <add>, %84, %cst_24 [2] : vector<4x16x16xf32> to vector<4x16xf32>
    %86 = vector.shape_cast %85 : vector<4x16xf32> to vector<4x16x1xf32>
    %87 = tpu.reciprocal %86 {approx = true} : vector<4x16x1xf32> -> vector<4x16x1xf32>
    %88 = vector.broadcast %87 : vector<4x16x1xf32> to vector<4x16x16xf32>
    %89 = arith.mulf %84, %88 : vector<4x16x16xf32>
    %90 = arith.truncf %89 : vector<4x16x16xf32> to vector<4x16x16xbf16>
    "tpu.trace_start"() <{level = 10 : i32, message = "wnm,wmd->wnd"}> : () -> ()
    %cst_25 = arith.constant dense<0.000000e+00> : vector<4x16x16xf32>
    %91 = tpu.matmul %90, %73, %cst_25 {dimension_numbers = #tpu.dot_dimension_numbers<[2], [1], [1], [2], [0, 0, 0, 1, 1, 2], [0], [0]>} : vector<4x16x16xbf16>, vector<4x16x16xbf16>, vector<4x16x16xf32> -> vector<4x16x16xf32>
    "tpu.trace_stop"() : () -> ()
    %92 = vector.shape_cast %91 : vector<4x16x16xf32> to vector<64x16xf32>
    %93 = arith.truncf %92 : vector<64x16xf32> to vector<64x16xbf16>
    %94 = tpu.concatenate %64, %93 in 1 : vector<64x16xbf16>, vector<64x16xbf16> -> vector<64x32xbf16>
    %c0_26 = arith.constant 0 : index
    %c0_27 = arith.constant 0 : index
    %95 = vector.load %arg8[%c0_26, %c0_27] : memref<32x32xbf16, #tpu.memory_space<vmem>>, vector<32x32xbf16>
    %cst_28 = arith.constant dense<0.000000e+00> : vector<64x32xf32>
    %96 = tpu.matmul %94, %95, %cst_28 {dimension_numbers = #tpu.dot_dimension_numbers<[1], [0], [0], [1], [0, 0, 1, 1], [], []>} : vector<64x32xbf16>, vector<32x32xbf16>, vector<64x32xf32> -> vector<64x32xf32>
    %c0_29 = arith.constant 0 : index
    %c0_30 = arith.constant 0 : index
    %97 = vector.load %arg9[%c0_29, %c0_30] : memref<1x32xf32, #tpu.memory_space<vmem>>, vector<1x32xf32>
    %98 = vector.broadcast %97 : vector<1x32xf32> to vector<64x32xf32>
    %99 = arith.addf %96, %98 : vector<64x32xf32>
    %100 = arith.addf %1, %99 : vector<64x32xf32>
    %101 = vector.shape_cast %100 : vector<64x32xf32> to vector<4x16x32xf32>
    %c0_31 = arith.constant 0 : index
    %c0_32 = arith.constant 0 : index
    %c0_33 = arith.constant 0 : index
    %102 = vector.load %arg10[%c0_31, %c0_32, %c0_33] : memref<4x16x32xf32, #tpu.memory_space<vmem>>, vector<4x16x32xf32>
    tpu.vector_store %arg10[%c0_31, %c0_32, %c0_33], %101 {strides = array<i32>} : memref<4x16x32xf32, #tpu.memory_space<vmem>>, vector<4x16x32xf32>,
    return
  }
  func.func @transform_0(%arg0: i32, %arg1: i32) -> (i32, i32, i32) {
    %c1_i32 = arith.constant 1 : i32
    %0 = arith.muli %arg0, %c1_i32 : i32
    %1 = arith.addi %0, %arg1 : i32
    %c0_i32 = arith.constant 0 : i32
    %c0_i32_0 = arith.constant 0 : i32
    %c0_i32_1 = arith.constant 0 : i32
    return %1, %c0_i32, %c0_i32_0 : i32, i32, i32
  }
  func.func @transform_1(%arg0: i32, %arg1: i32) -> (i32, i32) {
    %c0_i32 = arith.constant 0 : i32
    %c0_i32_0 = arith.constant 0 : i32
    %c0_i32_1 = arith.constant 0 : i32
    return %c0_i32, %c0_i32_0 : i32, i32
  }
  func.func @transform_2(%arg0: i32, %arg1: i32) -> (i32, i32) {
    %c0_i32 = arith.constant 0 : i32
    %c0_i32_0 = arith.constant 0 : i32
    %c0_i32_1 = arith.constant 0 : i32
    return %c0_i32, %c0_i32_0 : i32, i32
  }
  func.func @transform_3(%arg0: i32, %arg1: i32) -> (i32, i32) {
    %c0_i32 = arith.constant 0 : i32
    %c0_i32_0 = arith.constant 0 : i32
    %c0_i32_1 = arith.constant 0 : i32
    return %c0_i32, %c0_i32_0 : i32, i32
  }
  func.func @transform_4(%arg0: i32, %arg1: i32) -> (i32, i32) {
    %c0_i32 = arith.constant 0 : i32
    %c0_i32_0 = arith.constant 0 : i32
    %c0_i32_1 = arith.constant 0 : i32
    return %c0_i32, %c0_i32_0 : i32, i32
  }
  func.func @transform_5(%arg0: i32, %arg1: i32) -> (i32, i32, i32) {
    %c0_i32 = arith.constant 0 : i32
    %c0_i32_0 = arith.constant 0 : i32
    %c0_i32_1 = arith.constant 0 : i32
    %c0_i32_2 = arith.constant 0 : i32
    return %c0_i32, %c0_i32_0, %c0_i32_1 : i32, i32, i32
  }
  func.func @transform_6(%arg0: i32, %arg1: i32) -> (i32, i32) {
    %c0_i32 = arith.constant 0 : i32
    %c0_i32_0 = arith.constant 0 : i32
    %c0_i32_1 = arith.constant 0 : i32
    return %c0_i32, %c0_i32_0 : i32, i32
  }
  func.func @transform_7(%arg0: i32, %arg1: i32) -> (i32, i32) {
    %c0_i32 = arith.constant 0 : i32
    %c0_i32_0 = arith.constant 0 : i32
    %c0_i32_1 = arith.constant 0 : i32
    return %c0_i32, %c0_i32_0 : i32, i32
  }
  func.func @transform_8(%arg0: i32, %arg1: i32) -> (i32, i32, i32) {
    %c1_i32 = arith.constant 1 : i32
    %0 = arith.muli %arg0, %c1_i32 : i32
    %1 = arith.addi %0, %arg1 : i32
    %c0_i32 = arith.constant 0 : i32
    %c0_i32_0 = arith.constant 0 : i32
    %c0_i32_1 = arith.constant 0 : i32
    return %1, %c0_i32, %c0_i32_0 : i32, i32, i32
  }
}

module attributes {stable_mosaic.version = 11 : i64} {
  func.func @_mlp_block_kernel(%arg0: i32, %arg1: memref<128x32xf32, #tpu.memory_space<vmem>>, %arg2: memref<1x32xf32, #tpu.memory_space<vmem>>, %arg3: memref<1x32xf32, #tpu.memory_space<vmem>>, %arg4: memref<32x128xbf16, #tpu.memory_space<vmem>>, %arg5: memref<1x128xf32, #tpu.memory_space<vmem>>, %arg6: memref<128x32xbf16, #tpu.memory_space<vmem>>, %arg7: memref<1x32xf32, #tpu.memory_space<vmem>>, %arg8: memref<128x32xf32, #tpu.memory_space<vmem>>) attributes {dimension_semantics = [#tpu.dimension_semantics<parallel>], iteration_bounds = array<i64: 1>, scalar_prefetch = 0 : i64, scratch_operands = 0 : i64, tpu.core_type = #tpu.core_type<tc>, window_params = [{transform_indices = @transform_0, window_bounds = array<i64: 128, 32>}, {pipeline_mode = #tpu.pipeline_mode<synchronous>, transform_indices = @transform_1, window_bounds = array<i64: 1, 32>}, {pipeline_mode = #tpu.pipeline_mode<synchronous>, transform_indices = @transform_2, window_bounds = array<i64: 1, 32>}, {pipeline_mode = #tpu.pipeline_mode<synchronous>, transform_indices = @transform_3, window_bounds = array<i64: 32, 128>}, {pipeline_mode = #tpu.pipeline_mode<synchronous>, transform_indices = @transform_4, window_bounds = array<i64: 1, 128>}, {pipeline_mode = #tpu.pipeline_mode<synchronous>, transform_indices = @transform_5, window_bounds = array<i64: 128, 32>}, {pipeline_mode = #tpu.pipeline_mode<synchronous>, transform_indices = @transform_6, window_bounds = array<i64: 1, 32>}, {transform_indices = @transform_7, window_bounds = array<i64: 128, 32>}]} {
    %c0 = arith.constant 0 : index
    %c0_0 = arith.constant 0 : index
    %0 = vector.load %arg1[%c0, %c0_0] : memref<128x32xf32, #tpu.memory_space<vmem>>, vector<128x32xf32>
    %c0_1 = arith.constant 0 : index
    %c0_2 = arith.constant 0 : index
    %1 = vector.load %arg2[%c0_1, %c0_2] : memref<1x32xf32, #tpu.memory_space<vmem>>, vector<1x32xf32>
    %c0_3 = arith.constant 0 : index
    %c0_4 = arith.constant 0 : index
    %2 = vector.load %arg3[%c0_3, %c0_4] : memref<1x32xf32, #tpu.memory_space<vmem>>, vector<1x32xf32>
    %cst = arith.constant dense<0.000000e+00> : vector<128xf32>
    %3 = vector.multi_reduction <add>, %0, %cst [1] : vector<128x32xf32> to vector<128xf32>
    %4 = vector.shape_cast %3 : vector<128xf32> to vector<128x1xf32>
    %cst_5 = arith.constant 3.200000e+01 : f32
    %5 = vector.broadcast %cst_5 : f32 to vector<128x1xf32>
    %6 = arith.divf %4, %5 : vector<128x1xf32>
    %7 = vector.broadcast %6 : vector<128x1xf32> to vector<128x32xf32>
    %8 = arith.subf %0, %7 : vector<128x32xf32>
    %9 = arith.mulf %8, %8 : vector<128x32xf32>
    %cst_6 = arith.constant dense<0.000000e+00> : vector<128xf32>
    %10 = vector.multi_reduction <add>, %9, %cst_6 [1] : vector<128x32xf32> to vector<128xf32>
    %11 = vector.shape_cast %10 : vector<128xf32> to vector<128x1xf32>
    %cst_7 = arith.constant 3.200000e+01 : f32
    %12 = vector.broadcast %cst_7 : f32 to vector<128x1xf32>
    %13 = arith.divf %11, %12 : vector<128x1xf32>
    %14 = vector.broadcast %6 : vector<128x1xf32> to vector<128x32xf32>
    %15 = arith.subf %0, %14 : vector<128x32xf32>
    %cst_8 = arith.constant 9.99999974E-6 : f32
    %16 = vector.broadcast %cst_8 : f32 to vector<128x1xf32>
    %17 = arith.addf %13, %16 : vector<128x1xf32>
    %18 = math.rsqrt %17 : vector<128x1xf32>
    %19 = vector.broadcast %18 : vector<128x1xf32> to vector<128x32xf32>
    %20 = arith.mulf %15, %19 : vector<128x32xf32>
    %21 = vector.broadcast %1 : vector<1x32xf32> to vector<128x32xf32>
    %22 = arith.mulf %20, %21 : vector<128x32xf32>
    %23 = vector.broadcast %2 : vector<1x32xf32> to vector<128x32xf32>
    %24 = arith.addf %22, %23 : vector<128x32xf32>
    %25 = arith.truncf %24 : vector<128x32xf32> to vector<128x32xbf16>
    %c0_9 = arith.constant 0 : index
    %c0_10 = arith.constant 0 : index
    %26 = vector.load %arg4[%c0_9, %c0_10] : memref<32x128xbf16, #tpu.memory_space<vmem>>, vector<32x128xbf16>
    %cst_11 = arith.constant dense<0.000000e+00> : vector<128x128xf32>
    %27 = tpu.matmul %25, %26, %cst_11 {dimension_numbers = #tpu.dot_dimension_numbers<[1], [0], [0], [1], [0, 0, 1, 1], [], []>} : vector<128x32xbf16>, vector<32x128xbf16>, vector<128x128xf32> -> vector<128x128xf32>
    %c0_12 = arith.constant 0 : index
    %c0_13 = arith.constant 0 : index
    %28 = vector.load %arg5[%c0_12, %c0_13] : memref<1x128xf32, #tpu.memory_space<vmem>>, vector<1x128xf32>
    %29 = vector.broadcast %28 : vector<1x128xf32> to vector<128x128xf32>
    %30 = arith.addf %27, %29 : vector<128x128xf32>
    %cst_14 = arith.constant 5.000000e-01 : f32
    %31 = vector.broadcast %cst_14 : f32 to vector<128x128xf32>
    %32 = arith.mulf %31, %30 : vector<128x128xf32>
    %33 = arith.mulf %30, %30 : vector<128x128xf32>
    %34 = arith.mulf %33, %30 : vector<128x128xf32>
    %cst_15 = arith.constant 4.471500e-02 : f32
    %35 = vector.broadcast %cst_15 : f32 to vector<128x128xf32>
    %36 = arith.mulf %35, %34 : vector<128x128xf32>
    %37 = arith.addf %30, %36 : vector<128x128xf32>
    %cst_16 = arith.constant 0.797884583 : f32
    %38 = vector.broadcast %cst_16 : f32 to vector<128x128xf32>
    %39 = arith.mulf %38, %37 : vector<128x128xf32>
    %40 = math.tanh %39 : vector<128x128xf32>
    %cst_17 = arith.constant 1.000000e+00 : f32
    %41 = vector.broadcast %cst_17 : f32 to vector<128x128xf32>
    %42 = arith.addf %41, %40 : vector<128x128xf32>
    %43 = arith.mulf %32, %42 : vector<128x128xf32>
    %44 = arith.truncf %43 : vector<128x128xf32> to vector<128x128xbf16>
    %c0_18 = arith.constant 0 : index
    %c0_19 = arith.constant 0 : index
    %45 = vector.load %arg6[%c0_18, %c0_19] : memref<128x32xbf16, #tpu.memory_space<vmem>>, vector<128x32xbf16>
    %cst_20 = arith.constant dense<0.000000e+00> : vector<128x32xf32>
    %46 = tpu.matmul %44, %45, %cst_20 {dimension_numbers = #tpu.dot_dimension_numbers<[1], [0], [0], [1], [0, 0, 1, 1], [], []>} : vector<128x128xbf16>, vector<128x32xbf16>, vector<128x32xf32> -> vector<128x32xf32>
    %c0_21 = arith.constant 0 : index
    %c0_22 = arith.constant 0 : index
    %47 = vector.load %arg7[%c0_21, %c0_22] : memref<1x32xf32, #tpu.memory_space<vmem>>, vector<1x32xf32>
    %48 = vector.broadcast %47 : vector<1x32xf32> to vector<128x32xf32>
    %49 = arith.addf %46, %48 : vector<128x32xf32>
    %50 = arith.addf %0, %49 : vector<128x32xf32>
    %c0_23 = arith.constant 0 : index
    %c0_24 = arith.constant 0 : index
    %51 = vector.load %arg8[%c0_23, %c0_24] : memref<128x32xf32, #tpu.memory_space<vmem>>, vector<128x32xf32>
    tpu.vector_store %arg8[%c0_23, %c0_24], %50 {strides = array<i32>} : memref<128x32xf32, #tpu.memory_space<vmem>>, vector<128x32xf32>,
    return
  }
  func.func @transform_0(%arg0: i32) -> (i32, i32) {
    %c0_i32 = arith.constant 0 : i32
    %c0_i32_0 = arith.constant 0 : i32
    return %arg0, %c0_i32 : i32, i32
  }
  func.func @transform_1(%arg0: i32) -> (i32, i32) {
    %c0_i32 = arith.constant 0 : i32
    %c0_i32_0 = arith.constant 0 : i32
    %c0_i32_1 = arith.constant 0 : i32
    return %c0_i32, %c0_i32_0 : i32, i32
  }
  func.func @transform_2(%arg0: i32) -> (i32, i32) {
    %c0_i32 = arith.constant 0 : i32
    %c0_i32_0 = arith.constant 0 : i32
    %c0_i32_1 = arith.constant 0 : i32
    return %c0_i32, %c0_i32_0 : i32, i32
  }
  func.func @transform_3(%arg0: i32) -> (i32, i32) {
    %c0_i32 = arith.constant 0 : i32
    %c0_i32_0 = arith.constant 0 : i32
    %c0_i32_1 = arith.constant 0 : i32
    return %c0_i32, %c0_i32_0 : i32, i32
  }
  func.func @transform_4(%arg0: i32) -> (i32, i32) {
    %c0_i32 = arith.constant 0 : i32
    %c0_i32_0 = arith.constant 0 : i32
    %c0_i32_1 = arith.constant 0 : i32
    return %c0_i32, %c0_i32_0 : i32, i32
  }
  func.func @transform_5(%arg0: i32) -> (i32, i32) {
    %c0_i32 = arith.constant 0 : i32
    %c0_i32_0 = arith.constant 0 : i32
    %c0_i32_1 = arith.constant 0 : i32
    return %c0_i32, %c0_i32_0 : i32, i32
  }
  func.func @transform_6(%arg0: i32) -> (i32, i32) {
    %c0_i32 = arith.constant 0 : i32
    %c0_i32_0 = arith.constant 0 : i32
    %c0_i32_1 = arith.constant 0 : i32
    return %c0_i32, %c0_i32_0 : i32, i32
  }
  func.func @transform_7(%arg0: i32) -> (i32, i32) {
    %c0_i32 = arith.constant 0 : i32
    %c0_i32_0 = arith.constant 0 : i32
    return %arg0, %c0_i32 : i32, i32
  }
}

module attributes {stable_mosaic.version = 11 : i64} {
  func.func @_attn_block_kernel(%arg0: i32, %arg1: i32, %arg2: memref<4x16x32xf32, #tpu.memory_space<vmem>>, %arg3: memref<1x32xf32, #tpu.memory_space<vmem>>, %arg4: memref<1x32xf32, #tpu.memory_space<vmem>>, %arg5: memref<32x96xbf16, #tpu.memory_space<vmem>>, %arg6: memref<1x96xf32, #tpu.memory_space<vmem>>, %arg7: memref<4x2x16x16xf32, #tpu.memory_space<vmem>>, %arg8: memref<32x32xbf16, #tpu.memory_space<vmem>>, %arg9: memref<1x32xf32, #tpu.memory_space<vmem>>, %arg10: memref<4x16x32xf32, #tpu.memory_space<vmem>>) attributes {dimension_semantics = [#tpu.dimension_semantics<parallel>, #tpu.dimension_semantics<parallel>], iteration_bounds = array<i64: 2, 1>, scalar_prefetch = 0 : i64, scratch_operands = 0 : i64, tpu.core_type = #tpu.core_type<tc>, window_params = [{transform_indices = @transform_0, window_bounds = array<i64: 4, 16, 32>}, {pipeline_mode = #tpu.pipeline_mode<synchronous>, transform_indices = @transform_1, window_bounds = array<i64: 1, 32>}, {pipeline_mode = #tpu.pipeline_mode<synchronous>, transform_indices = @transform_2, window_bounds = array<i64: 1, 32>}, {pipeline_mode = #tpu.pipeline_mode<synchronous>, transform_indices = @transform_3, window_bounds = array<i64: 32, 96>}, {pipeline_mode = #tpu.pipeline_mode<synchronous>, transform_indices = @transform_4, window_bounds = array<i64: 1, 96>}, {transform_indices = @transform_5, window_bounds = array<i64: 4, 2, 16, 16>}, {pipeline_mode = #tpu.pipeline_mode<synchronous>, transform_indices = @transform_6, window_bounds = array<i64: 32, 32>}, {pipeline_mode = #tpu.pipeline_mode<synchronous>, transform_indices = @transform_7, window_bounds = array<i64: 1, 32>}, {transform_indices = @transform_8, window_bounds = array<i64: 4, 16, 32>}]} {
    %c0 = arith.constant 0 : index
    %c0_0 = arith.constant 0 : index
    %c0_1 = arith.constant 0 : index
    %0 = vector.load %arg2[%c0, %c0_0, %c0_1] : memref<4x16x32xf32, #tpu.memory_space<vmem>>, vector<4x16x32xf32>
    %1 = vector.shape_cast %0 : vector<4x16x32xf32> to vector<64x32xf32>
    %c0_2 = arith.constant 0 : index
    %c0_3 = arith.constant 0 : index
    %2 = vector.load %arg3[%c0_2, %c0_3] : memref<1x32xf32, #tpu.memory_space<vmem>>, vector<1x32xf32>
    %c0_4 = arith.constant 0 : index
    %c0_5 = arith.constant 0 : index
    %3 = vector.load %arg4[%c0_4, %c0_5] : memref<1x32xf32, #tpu.memory_space<vmem>>, vector<1x32xf32>
    %cst = arith.constant dense<0.000000e+00> : vector<64xf32>
    %4 = vector.multi_reduction <add>, %1, %cst [1] : vector<64x32xf32> to vector<64xf32>
    %5 = vector.shape_cast %4 : vector<64xf32> to vector<64x1xf32>
    %cst_6 = arith.constant 3.200000e+01 : f32
    %6 = vector.broadcast %cst_6 : f32 to vector<64x1xf32>
    %7 = arith.divf %5, %6 : vector<64x1xf32>
    %8 = vector.broadcast %7 : vector<64x1xf32> to vector<64x32xf32>
    %9 = arith.subf %1, %8 : vector<64x32xf32>
    %10 = arith.mulf %9, %9 : vector<64x32xf32>
    %cst_7 = arith.constant dense<0.000000e+00> : vector<64xf32>
    %11 = vector.multi_reduction <add>, %10, %cst_7 [1] : vector<64x32xf32> to vector<64xf32>
    %12 = vector.shape_cast %11 : vector<64xf32> to vector<64x1xf32>
    %cst_8 = arith.constant 3.200000e+01 : f32
    %13 = vector.broadcast %cst_8 : f32 to vector<64x1xf32>
    %14 = arith.divf %12, %13 : vector<64x1xf32>
    %15 = vector.broadcast %7 : vector<64x1xf32> to vector<64x32xf32>
    %16 = arith.subf %1, %15 : vector<64x32xf32>
    %cst_9 = arith.constant 9.99999974E-6 : f32
    %17 = vector.broadcast %cst_9 : f32 to vector<64x1xf32>
    %18 = arith.addf %14, %17 : vector<64x1xf32>
    %19 = math.rsqrt %18 : vector<64x1xf32>
    %20 = vector.broadcast %19 : vector<64x1xf32> to vector<64x32xf32>
    %21 = arith.mulf %16, %20 : vector<64x32xf32>
    %22 = vector.broadcast %2 : vector<1x32xf32> to vector<64x32xf32>
    %23 = arith.mulf %21, %22 : vector<64x32xf32>
    %24 = vector.broadcast %3 : vector<1x32xf32> to vector<64x32xf32>
    %25 = arith.addf %23, %24 : vector<64x32xf32>
    %26 = arith.truncf %25 : vector<64x32xf32> to vector<64x32xbf16>
    %c0_10 = arith.constant 0 : index
    %c0_11 = arith.constant 0 : index
    %27 = vector.load %arg5[%c0_10, %c0_11] : memref<32x96xbf16, #tpu.memory_space<vmem>>, vector<32x96xbf16>
    %cst_12 = arith.constant dense<0.000000e+00> : vector<64x96xf32>
    %28 = tpu.matmul %26, %27, %cst_12 {dimension_numbers = #tpu.dot_dimension_numbers<[1], [0], [0], [1], [0, 0, 1, 1], [], []>} : vector<64x32xbf16>, vector<32x96xbf16>, vector<64x96xf32> -> vector<64x96xf32>
    %c0_13 = arith.constant 0 : index
    %c0_14 = arith.constant 0 : index
    %29 = vector.load %arg6[%c0_13, %c0_14] : memref<1x96xf32, #tpu.memory_space<vmem>>, vector<1x96xf32>
    %30 = vector.broadcast %29 : vector<1x96xf32> to vector<64x96xf32>
    %31 = arith.addf %28, %30 : vector<64x96xf32>
    %32 = vector.extract_strided_slice %31 {offsets = [0, 0], sizes = [64, 32], strides = [1, 1]} : vector<64x96xf32> to vector<64x32xf32>
    %33 = vector.extract_strided_slice %31 {offsets = [0, 32], sizes = [64, 32], strides = [1, 1]} : vector<64x96xf32> to vector<64x32xf32>
    %34 = vector.extract_strided_slice %31 {offsets = [0, 64], sizes = [64, 32], strides = [1, 1]} : vector<64x96xf32> to vector<64x32xf32>
    %c0_15 = arith.constant 0 : index
    %c0_16 = arith.constant 0 : index
    %c0_17 = arith.constant 0 : index
    %c0_18 = arith.constant 0 : index
    %35 = vector.load %arg7[%c0_15, %c0_16, %c0_17, %c0_18] : memref<4x2x16x16xf32, #tpu.memory_space<vmem>>, vector<4x2x16x16xf32>
    %36 = vector.extract_strided_slice %32 {offsets = [0, 0], sizes = [64, 16], strides = [1, 1]} : vector<64x32xf32> to vector<64x16xf32>
    %37 = vector.shape_cast %36 : vector<64x16xf32> to vector<4x16x16xf32>
    %38 = arith.truncf %37 : vector<4x16x16xf32> to vector<4x16x16xbf16>
    %39 = vector.extract_strided_slice %33 {offsets = [0, 0], sizes = [64, 16], strides = [1, 1]} : vector<64x32xf32> to vector<64x16xf32>
    %40 = vector.shape_cast %39 : vector<64x16xf32> to vector<4x16x16xf32>
    %41 = arith.truncf %40 : vector<4x16x16xf32> to vector<4x16x16xbf16>
    %42 = vector.extract_strided_slice %34 {offsets = [0, 0], sizes = [64, 16], strides = [1, 1]} : vector<64x32xf32> to vector<64x16xf32>
    %43 = vector.shape_cast %42 : vector<64x16xf32> to vector<4x16x16xf32>
    %44 = arith.truncf %43 : vector<4x16x16xf32> to vector<4x16x16xbf16>
    "tpu.trace_start"() <{level = 10 : i32, message = "wnd,wmd->wnm"}> : () -> ()
    %cst_19 = arith.constant dense<0.000000e+00> : vector<4x16x16xf32>
    %45 = tpu.matmul %38, %41, %cst_19 {dimension_numbers = #tpu.dot_dimension_numbers<[2], [2], [1], [1], [0, 0, 0, 1, 1, 1], [0], [0]>} : vector<4x16x16xbf16>, vector<4x16x16xbf16>, vector<4x16x16xf32> -> vector<4x16x16xf32>
    "tpu.trace_stop"() : () -> ()
    %46 = vector.extract_strided_slice %35 {offsets = [0, 0, 0, 0], sizes = [4, 1, 16, 16], strides = [1, 1, 1, 1]} : vector<4x2x16x16xf32> to vector<4x1x16x16xf32>
    %47 = vector.shape_cast %46 : vector<4x1x16x16xf32> to vector<4x16x16xf32>
    %48 = arith.addf %45, %47 : vector<4x16x16xf32>
    %cst_20 = arith.constant dense<0xFF800000> : vector<4x16xf32>
    %49 = vector.multi_reduction <maximumf>, %48, %cst_20 [2] : vector<4x16x16xf32> to vector<4x16xf32>
    %50 = vector.shape_cast %49 : vector<4x16xf32> to vector<4x16x1xf32>
    %51 = vector.broadcast %50 : vector<4x16x1xf32> to vector<4x16x16xf32>
    %52 = arith.subf %48, %51 : vector<4x16x16xf32>
    %53 = math.exp %52 : vector<4x16x16xf32>
    %cst_21 = arith.constant dense<0.000000e+00> : vector<4x16xf32>
    %54 = vector.multi_reduction <add>, %53, %cst_21 [2] : vector<4x16x16xf32> to vector<4x16xf32>
    %55 = vector.shape_cast %54 : vector<4x16xf32> to vector<4x16x1xf32>
    %56 = tpu.reciprocal %55 {approx = true} : vector<4x16x1xf32> -> vector<4x16x1xf32>
    %57 = vector.broadcast %56 : vector<4x16x1xf32> to vector<4x16x16xf32>
    %58 = arith.mulf %53, %57 : vector<4x16x16xf32>
    %59 = arith.truncf %58 : vector<4x16x16xf32> to vector<4x16x16xbf16>
    "tpu.trace_start"() <{level = 10 : i32, message = "wnm,wmd->wnd"}> : () -> ()
    %cst_22 = arith.constant dense<0.000000e+00> : vector<4x16x16xf32>
    %60 = tpu.matmul %59, %44, %cst_22 {dimension_numbers = #tpu.dot_dimension_numbers<[2], [1], [1], [2], [0, 0, 0, 1, 1, 2], [0], [0]>} : vector<4x16x16xbf16>, vector<4x16x16xbf16>, vector<4x16x16xf32> -> vector<4x16x16xf32>
    "tpu.trace_stop"() : () -> ()
    %61 = vector.shape_cast %60 : vector<4x16x16xf32> to vector<64x16xf32>
    %62 = arith.truncf %61 : vector<64x16xf32> to vector<64x16xbf16>
    %63 = vector.extract_strided_slice %32 {offsets = [0, 16], sizes = [64, 16], strides = [1, 1]} : vector<64x32xf32> to vector<64x16xf32>
    %64 = vector.shape_cast %63 : vector<64x16xf32> to vector<4x16x16xf32>
    %65 = arith.truncf %64 : vector<4x16x16xf32> to vector<4x16x16xbf16>
    %66 = vector.extract_strided_slice %33 {offsets = [0, 16], sizes = [64, 16], strides = [1, 1]} : vector<64x32xf32> to vector<64x16xf32>
    %67 = vector.shape_cast %66 : vector<64x16xf32> to vector<4x16x16xf32>
    %68 = arith.truncf %67 : vector<4x16x16xf32> to vector<4x16x16xbf16>
    %69 = vector.extract_strided_slice %34 {offsets = [0, 16], sizes = [64, 16], strides = [1, 1]} : vector<64x32xf32> to vector<64x16xf32>
    %70 = vector.shape_cast %69 : vector<64x16xf32> to vector<4x16x16xf32>
    %71 = arith.truncf %70 : vector<4x16x16xf32> to vector<4x16x16xbf16>
    "tpu.trace_start"() <{level = 10 : i32, message = "wnd,wmd->wnm"}> : () -> ()
    %cst_23 = arith.constant dense<0.000000e+00> : vector<4x16x16xf32>
    %72 = tpu.matmul %65, %68, %cst_23 {dimension_numbers = #tpu.dot_dimension_numbers<[2], [2], [1], [1], [0, 0, 0, 1, 1, 1], [0], [0]>} : vector<4x16x16xbf16>, vector<4x16x16xbf16>, vector<4x16x16xf32> -> vector<4x16x16xf32>
    "tpu.trace_stop"() : () -> ()
    %73 = vector.extract_strided_slice %35 {offsets = [0, 1, 0, 0], sizes = [4, 1, 16, 16], strides = [1, 1, 1, 1]} : vector<4x2x16x16xf32> to vector<4x1x16x16xf32>
    %74 = vector.shape_cast %73 : vector<4x1x16x16xf32> to vector<4x16x16xf32>
    %75 = arith.addf %72, %74 : vector<4x16x16xf32>
    %cst_24 = arith.constant dense<0xFF800000> : vector<4x16xf32>
    %76 = vector.multi_reduction <maximumf>, %75, %cst_24 [2] : vector<4x16x16xf32> to vector<4x16xf32>
    %77 = vector.shape_cast %76 : vector<4x16xf32> to vector<4x16x1xf32>
    %78 = vector.broadcast %77 : vector<4x16x1xf32> to vector<4x16x16xf32>
    %79 = arith.subf %75, %78 : vector<4x16x16xf32>
    %80 = math.exp %79 : vector<4x16x16xf32>
    %cst_25 = arith.constant dense<0.000000e+00> : vector<4x16xf32>
    %81 = vector.multi_reduction <add>, %80, %cst_25 [2] : vector<4x16x16xf32> to vector<4x16xf32>
    %82 = vector.shape_cast %81 : vector<4x16xf32> to vector<4x16x1xf32>
    %83 = tpu.reciprocal %82 {approx = true} : vector<4x16x1xf32> -> vector<4x16x1xf32>
    %84 = vector.broadcast %83 : vector<4x16x1xf32> to vector<4x16x16xf32>
    %85 = arith.mulf %80, %84 : vector<4x16x16xf32>
    %86 = arith.truncf %85 : vector<4x16x16xf32> to vector<4x16x16xbf16>
    "tpu.trace_start"() <{level = 10 : i32, message = "wnm,wmd->wnd"}> : () -> ()
    %cst_26 = arith.constant dense<0.000000e+00> : vector<4x16x16xf32>
    %87 = tpu.matmul %86, %71, %cst_26 {dimension_numbers = #tpu.dot_dimension_numbers<[2], [1], [1], [2], [0, 0, 0, 1, 1, 2], [0], [0]>} : vector<4x16x16xbf16>, vector<4x16x16xbf16>, vector<4x16x16xf32> -> vector<4x16x16xf32>
    "tpu.trace_stop"() : () -> ()
    %88 = vector.shape_cast %87 : vector<4x16x16xf32> to vector<64x16xf32>
    %89 = arith.truncf %88 : vector<64x16xf32> to vector<64x16xbf16>
    %90 = tpu.concatenate %62, %89 in 1 : vector<64x16xbf16>, vector<64x16xbf16> -> vector<64x32xbf16>
    %c0_27 = arith.constant 0 : index
    %c0_28 = arith.constant 0 : index
    %91 = vector.load %arg8[%c0_27, %c0_28] : memref<32x32xbf16, #tpu.memory_space<vmem>>, vector<32x32xbf16>
    %cst_29 = arith.constant dense<0.000000e+00> : vector<64x32xf32>
    %92 = tpu.matmul %90, %91, %cst_29 {dimension_numbers = #tpu.dot_dimension_numbers<[1], [0], [0], [1], [0, 0, 1, 1], [], []>} : vector<64x32xbf16>, vector<32x32xbf16>, vector<64x32xf32> -> vector<64x32xf32>
    %c0_30 = arith.constant 0 : index
    %c0_31 = arith.constant 0 : index
    %93 = vector.load %arg9[%c0_30, %c0_31] : memref<1x32xf32, #tpu.memory_space<vmem>>, vector<1x32xf32>
    %94 = vector.broadcast %93 : vector<1x32xf32> to vector<64x32xf32>
    %95 = arith.addf %92, %94 : vector<64x32xf32>
    %96 = arith.addf %1, %95 : vector<64x32xf32>
    %97 = vector.shape_cast %96 : vector<64x32xf32> to vector<4x16x32xf32>
    %c0_32 = arith.constant 0 : index
    %c0_33 = arith.constant 0 : index
    %c0_34 = arith.constant 0 : index
    %98 = vector.load %arg10[%c0_32, %c0_33, %c0_34] : memref<4x16x32xf32, #tpu.memory_space<vmem>>, vector<4x16x32xf32>
    tpu.vector_store %arg10[%c0_32, %c0_33, %c0_34], %97 {strides = array<i32>} : memref<4x16x32xf32, #tpu.memory_space<vmem>>, vector<4x16x32xf32>,
    return
  }
  func.func @transform_0(%arg0: i32, %arg1: i32) -> (i32, i32, i32) {
    %c1_i32 = arith.constant 1 : i32
    %0 = arith.muli %arg0, %c1_i32 : i32
    %1 = arith.addi %0, %arg1 : i32
    %c0_i32 = arith.constant 0 : i32
    %c0_i32_0 = arith.constant 0 : i32
    %c0_i32_1 = arith.constant 0 : i32
    return %1, %c0_i32, %c0_i32_0 : i32, i32, i32
  }
  func.func @transform_1(%arg0: i32, %arg1: i32) -> (i32, i32) {
    %c0_i32 = arith.constant 0 : i32
    %c0_i32_0 = arith.constant 0 : i32
    %c0_i32_1 = arith.constant 0 : i32
    return %c0_i32, %c0_i32_0 : i32, i32
  }
  func.func @transform_2(%arg0: i32, %arg1: i32) -> (i32, i32) {
    %c0_i32 = arith.constant 0 : i32
    %c0_i32_0 = arith.constant 0 : i32
    %c0_i32_1 = arith.constant 0 : i32
    return %c0_i32, %c0_i32_0 : i32, i32
  }
  func.func @transform_3(%arg0: i32, %arg1: i32) -> (i32, i32) {
    %c0_i32 = arith.constant 0 : i32
    %c0_i32_0 = arith.constant 0 : i32
    %c0_i32_1 = arith.constant 0 : i32
    return %c0_i32, %c0_i32_0 : i32, i32
  }
  func.func @transform_4(%arg0: i32, %arg1: i32) -> (i32, i32) {
    %c0_i32 = arith.constant 0 : i32
    %c0_i32_0 = arith.constant 0 : i32
    %c0_i32_1 = arith.constant 0 : i32
    return %c0_i32, %c0_i32_0 : i32, i32
  }
  func.func @transform_5(%arg0: i32, %arg1: i32) -> (i32, i32, i32, i32) {
    %c0_i32 = arith.constant 0 : i32
    %c0_i32_0 = arith.constant 0 : i32
    %c0_i32_1 = arith.constant 0 : i32
    %c0_i32_2 = arith.constant 0 : i32
    return %arg1, %c0_i32, %c0_i32_0, %c0_i32_1 : i32, i32, i32, i32
  }
  func.func @transform_6(%arg0: i32, %arg1: i32) -> (i32, i32) {
    %c0_i32 = arith.constant 0 : i32
    %c0_i32_0 = arith.constant 0 : i32
    %c0_i32_1 = arith.constant 0 : i32
    return %c0_i32, %c0_i32_0 : i32, i32
  }
  func.func @transform_7(%arg0: i32, %arg1: i32) -> (i32, i32) {
    %c0_i32 = arith.constant 0 : i32
    %c0_i32_0 = arith.constant 0 : i32
    %c0_i32_1 = arith.constant 0 : i32
    return %c0_i32, %c0_i32_0 : i32, i32
  }
  func.func @transform_8(%arg0: i32, %arg1: i32) -> (i32, i32, i32) {
    %c1_i32 = arith.constant 1 : i32
    %0 = arith.muli %arg0, %c1_i32 : i32
    %1 = arith.addi %0, %arg1 : i32
    %c0_i32 = arith.constant 0 : i32
    %c0_i32_0 = arith.constant 0 : i32
    %c0_i32_1 = arith.constant 0 : i32
    return %1, %c0_i32, %c0_i32_0 : i32, i32, i32
  }
}

module attributes {stable_mosaic.version = 11 : i64} {
  func.func @_merge_kernel(%arg0: i32, %arg1: memref<32x128xf32, #tpu.memory_space<vmem>>, %arg2: memref<1x128xf32, #tpu.memory_space<vmem>>, %arg3: memref<1x128xf32, #tpu.memory_space<vmem>>, %arg4: memref<128x64xbf16, #tpu.memory_space<vmem>>, %arg5: memref<32x64xf32, #tpu.memory_space<vmem>>) attributes {dimension_semantics = [#tpu.dimension_semantics<parallel>], iteration_bounds = array<i64: 1>, scalar_prefetch = 0 : i64, scratch_operands = 0 : i64, tpu.core_type = #tpu.core_type<tc>, window_params = [{transform_indices = @transform_0, window_bounds = array<i64: 32, 128>}, {pipeline_mode = #tpu.pipeline_mode<synchronous>, transform_indices = @transform_1, window_bounds = array<i64: 1, 128>}, {pipeline_mode = #tpu.pipeline_mode<synchronous>, transform_indices = @transform_2, window_bounds = array<i64: 1, 128>}, {pipeline_mode = #tpu.pipeline_mode<synchronous>, transform_indices = @transform_3, window_bounds = array<i64: 128, 64>}, {transform_indices = @transform_4, window_bounds = array<i64: 32, 64>}]} {
    %c0 = arith.constant 0 : index
    %c0_0 = arith.constant 0 : index
    %0 = vector.load %arg1[%c0, %c0_0] : memref<32x128xf32, #tpu.memory_space<vmem>>, vector<32x128xf32>
    %c0_1 = arith.constant 0 : index
    %c0_2 = arith.constant 0 : index
    %1 = vector.load %arg2[%c0_1, %c0_2] : memref<1x128xf32, #tpu.memory_space<vmem>>, vector<1x128xf32>
    %c0_3 = arith.constant 0 : index
    %c0_4 = arith.constant 0 : index
    %2 = vector.load %arg3[%c0_3, %c0_4] : memref<1x128xf32, #tpu.memory_space<vmem>>, vector<1x128xf32>
    %cst = arith.constant dense<0.000000e+00> : vector<32xf32>
    %3 = vector.multi_reduction <add>, %0, %cst [1] : vector<32x128xf32> to vector<32xf32>
    %4 = vector.shape_cast %3 : vector<32xf32> to vector<32x1xf32>
    %cst_5 = arith.constant 1.280000e+02 : f32
    %5 = vector.broadcast %cst_5 : f32 to vector<32x1xf32>
    %6 = arith.divf %4, %5 : vector<32x1xf32>
    %7 = vector.broadcast %6 : vector<32x1xf32> to vector<32x128xf32>
    %8 = arith.subf %0, %7 : vector<32x128xf32>
    %9 = arith.mulf %8, %8 : vector<32x128xf32>
    %cst_6 = arith.constant dense<0.000000e+00> : vector<32xf32>
    %10 = vector.multi_reduction <add>, %9, %cst_6 [1] : vector<32x128xf32> to vector<32xf32>
    %11 = vector.shape_cast %10 : vector<32xf32> to vector<32x1xf32>
    %cst_7 = arith.constant 1.280000e+02 : f32
    %12 = vector.broadcast %cst_7 : f32 to vector<32x1xf32>
    %13 = arith.divf %11, %12 : vector<32x1xf32>
    %14 = vector.broadcast %6 : vector<32x1xf32> to vector<32x128xf32>
    %15 = arith.subf %0, %14 : vector<32x128xf32>
    %cst_8 = arith.constant 9.99999974E-6 : f32
    %16 = vector.broadcast %cst_8 : f32 to vector<32x1xf32>
    %17 = arith.addf %13, %16 : vector<32x1xf32>
    %18 = math.rsqrt %17 : vector<32x1xf32>
    %19 = vector.broadcast %18 : vector<32x1xf32> to vector<32x128xf32>
    %20 = arith.mulf %15, %19 : vector<32x128xf32>
    %21 = vector.broadcast %1 : vector<1x128xf32> to vector<32x128xf32>
    %22 = arith.mulf %20, %21 : vector<32x128xf32>
    %23 = vector.broadcast %2 : vector<1x128xf32> to vector<32x128xf32>
    %24 = arith.addf %22, %23 : vector<32x128xf32>
    %25 = arith.truncf %24 : vector<32x128xf32> to vector<32x128xbf16>
    %c0_9 = arith.constant 0 : index
    %c0_10 = arith.constant 0 : index
    %26 = vector.load %arg4[%c0_9, %c0_10] : memref<128x64xbf16, #tpu.memory_space<vmem>>, vector<128x64xbf16>
    %cst_11 = arith.constant dense<0.000000e+00> : vector<32x64xf32>
    %27 = tpu.matmul %25, %26, %cst_11 {dimension_numbers = #tpu.dot_dimension_numbers<[1], [0], [0], [1], [0, 0, 1, 1], [], []>} : vector<32x128xbf16>, vector<128x64xbf16>, vector<32x64xf32> -> vector<32x64xf32>
    %c0_12 = arith.constant 0 : index
    %c0_13 = arith.constant 0 : index
    %28 = vector.load %arg5[%c0_12, %c0_13] : memref<32x64xf32, #tpu.memory_space<vmem>>, vector<32x64xf32>
    tpu.vector_store %arg5[%c0_12, %c0_13], %27 {strides = array<i32>} : memref<32x64xf32, #tpu.memory_space<vmem>>, vector<32x64xf32>,
    return
  }
  func.func @transform_0(%arg0: i32) -> (i32, i32) {
    %c0_i32 = arith.constant 0 : i32
    %c0_i32_0 = arith.constant 0 : i32
    return %arg0, %c0_i32 : i32, i32
  }
  func.func @transform_1(%arg0: i32) -> (i32, i32) {
    %c0_i32 = arith.constant 0 : i32
    %c0_i32_0 = arith.constant 0 : i32
    %c0_i32_1 = arith.constant 0 : i32
    return %c0_i32, %c0_i32_0 : i32, i32
  }
  func.func @transform_2(%arg0: i32) -> (i32, i32) {
    %c0_i32 = arith.constant 0 : i32
    %c0_i32_0 = arith.constant 0 : i32
    %c0_i32_1 = arith.constant 0 : i32
    return %c0_i32, %c0_i32_0 : i32, i32
  }
  func.func @transform_3(%arg0: i32) -> (i32, i32) {
    %c0_i32 = arith.constant 0 : i32
    %c0_i32_0 = arith.constant 0 : i32
    %c0_i32_1 = arith.constant 0 : i32
    return %c0_i32, %c0_i32_0 : i32, i32
  }
  func.func @transform_4(%arg0: i32) -> (i32, i32) {
    %c0_i32 = arith.constant 0 : i32
    %c0_i32_0 = arith.constant 0 : i32
    return %arg0, %c0_i32 : i32, i32
  }
}

</mosaic_0001>

<bundles_post_ra>
// kernel: basic_block_down.6
= control target key start
LH: loop header
LB: loop body
LE: loop exit
PB: predicated region body
PF: predicated region fallthrough
CT: control target
= control target key end

     0   :  { %vm45_vm0 = vcmask 261120   ;;  %s1595_s0 = inlined_call_operand.vmem [shape: f32[128,32], index: 0, kind: input, shape index: {}]   ;;  %s1596_s3 = inlined_call_operand.vmem [shape: bf16[32,128], index: 3, kind: input, shape index: {}]   ;;  %s1597_s1 = inlined_call_operand.vmem [shape: f32[1,32], index: 1, kind: input, shape index: {}]   ;;  %s1598_s2 = inlined_call_operand.vmem [shape: f32[1,32], index: 2, kind: input, shape index: {}]   ;;  %s1599_s5 = inlined_call_operand.vmem [shape: bf16[128,32], index: 5, kind: input, shape index: {}]   ;;  %s1600_s4 = inlined_call_operand.vmem [shape: f32[1,128], index: 4, kind: input, shape index: {}]   ;;  %s1601_s6 = inlined_call_operand.vmem [shape: f32[1,32], index: 6, kind: input, shape index: {}]   ;;  %s1602_s7 = inlined_call_operand.vmem [shape: f32[128,32], index: 7, kind: output, shape index: {}]  }
   0x1   :  { %v27_v0 = vld [vmem:[%s1595_s0] sm:$0xff]  ;;  %v29_v1 = vld [vmem:[%s1595_s0 + $0x10] sm:$0xff]  ;;  %v28_v2 = vld [vmem:[%s1595_s0 + $0x8] sm:$0xff] }
   0x2   :  { %v46_v3 = vsel %vm45_vm0, %v27_v0, 0.0  ;;  %v52_v4 = vsel %vm45_vm0, %v29_v1, 0.0  ;;  %v30_v5 = vld [vmem:[%s1595_s0 + $0x18] sm:$0xff]  ;;  %v49_v6 = vsel %vm45_vm0, %v28_v2, 0.0  ;;  %v31_v8 = vld [vmem:[%s1595_s0 + $0x20] sm:$0xff]  ;;  %v32_v9 = vld [vmem:[%s1595_s0 + $0x28] sm:$0xff] }
   0x3   :  { %47 = vadd.xlane.f32.xlu0 %v46_v3  ;;  %53 = vadd.xlane.f32.xlu1 %v52_v4  ;;  %v55_v7 = vsel %vm45_vm0, %v30_v5, 0.0  ;;  %v58_v10 = vsel %vm45_vm0, %v31_v8, 0.0  ;;  %v61_v11 = vsel %vm45_vm0, %v32_v9, 0.0  ;;  %v1080_v12 = vld [vmem:[%s1595_s0 + $0x30] sm:$0xff]  ;;  %v1085_v13 = vld [vmem:[%s1595_s0 + $0x38] sm:$0xff]  ;;  %v1094_v16 = vld [vmem:[%s1595_s0 + $0x40] sm:$0xff] }
   0x4   :  { %v64_v14 = vsel %vm45_vm0, %v1080_v12, 0.0  ;;  %v67_v15 = vsel %vm45_vm0, %v1085_v13, 0.0  ;;  %v1099_v17 = vld [vmem:[%s1595_s0 + $0x48] sm:$0xff]  ;;  %v70_v18 = vsel %vm45_vm0, %v1094_v16, 0.0  ;;  %v1108_v20 = vld [vmem:[%s1595_s0 + $0x50] sm:$0xff]  ;;  %v1113_v21 = vld [vmem:[%s1595_s0 + $0x58] sm:$0xff] }
   0x5   :  { %v73_v19 = vsel %vm45_vm0, %v1099_v17, 0.0  ;;  %v76_v22 = vsel %vm45_vm0, %v1108_v20, 0.0  ;;  %v79_v23 = vsel %vm45_vm0, %v1113_v21, 0.0  ;;  %v1122_v24 = vld [vmem:[%s1595_s0 + $0x60] sm:$0xff]  ;;  %v1127_v25 = vld [vmem:[%s1595_s0 + $0x68] sm:$0xff]  ;;  %v1136_v28 = vld [vmem:[%s1595_s0 + $0x70] sm:$0xff] }
   0x6   :  { %v82_v26 = vsel %vm45_vm0, %v1122_v24, 0.0  ;;  %v85_v27 = vsel %vm45_vm0, %v1127_v25, 0.0  ;;  %v1141_v29 = vld [vmem:[%s1595_s0 + $0x78] sm:$0xff]  ;;  %v88_v30 = vsel %vm45_vm0, %v1136_v28, 0.0 }
   0x7   :  { %50 = vadd.xlane.f32.xlu0 %v49_v6  ;;  %56 = vadd.xlane.f32.xlu1 %v55_v7  ;;  %v91_v31 = vsel %vm45_vm0, %v1141_v29, 0.0 }
   0xb   :  { %59 = vadd.xlane.f32.xlu0 %v58_v10  ;;  %62 = vadd.xlane.f32.xlu1 %v61_v11 }
   0xf   :  { %65 = vadd.xlane.f32.xlu0 %v64_v14  ;;  %68 = vadd.xlane.f32.xlu1 %v67_v15 }
  0x13   :  { %71 = vadd.xlane.f32.xlu0 %v70_v18  ;;  %74 = vadd.xlane.f32.xlu1 %v73_v19 }
  0x17   :  { %77 = vadd.xlane.f32.xlu0 %v76_v22  ;;  %80 = vadd.xlane.f32.xlu1 %v79_v23 }
  0x1b   :  { %83 = vadd.xlane.f32.xlu0 %v82_v26  ;;  %86 = vadd.xlane.f32.xlu1 %v85_v27 }
  0x1f   :  { %89 = vadd.xlane.f32.xlu0 %v88_v30  ;;  %92 = vadd.xlane.f32.xlu1 %v91_v31 }
  0x8c   :  { %v48_v32 = vpop.xlane.xlu0 %47  ;;  %v54_v33 = vpop.xlane.xlu1 %53 }
  0x8d   :  { %v95_v34 = vmul.f32 0.03125, %v48_v32  ;;  %v97_v35 = vmul.f32 0.03125, %v54_v33 }
  0x8f   :  { %v1147_v36 = vsub.f32 %v27_v0, %v95_v34  ;;  %v1149_v37 = vsub.f32 %v29_v1, %v97_v35 }
  0x90   :  { %v51_v38 = vpop.xlane.xlu0 %50  ;;  %v57_v39 = vpop.xlane.xlu1 %56 }
  0x91   :  { %v96_v40 = vmul.f32 0.03125, %v51_v38  ;;  %v98_v41 = vmul.f32 0.03125, %v57_v39  ;;  %v127_v42 = vmul.f32 %v1147_v36, %v1147_v36  ;;  %v129_v43 = vmul.f32 %v1149_v37, %v1149_v37 }
  0x93   :  { %v1155_v44 = vsub.f32 %v28_v2, %v96_v40  ;;  %v1157_v45 = vsub.f32 %v30_v5, %v98_v41  ;;  %v143_v46 = vsel %vm45_vm0, %v127_v42, 0.0  ;;  %v149_v49 = vsel %vm45_vm0, %v129_v43, 0.0 }
  0x94   :  { %144 = vadd.xlane.f32.xlu0 %v143_v46  ;;  %v60_v47 = vpop.xlane.xlu0 %59  ;;  %v63_v48 = vpop.xlane.xlu1 %62 }
  0x95   :  { %v99_v50 = vmul.f32 0.03125, %v60_v47  ;;  %v100_v51 = vmul.f32 0.03125, %v63_v48  ;;  %v128_v52 = vmul.f32 %v1155_v44, %v1155_v44  ;;  %v130_v53 = vmul.f32 %v1157_v45, %v1157_v45 }
  0x97   :  { %v1165_v54 = vsub.f32 %v31_v8, %v99_v50  ;;  %v1167_v55 = vsub.f32 %v32_v9, %v100_v51  ;;  %v146_v56 = vsel %vm45_vm0, %v128_v52, 0.0  ;;  %v152_v59 = vsel %vm45_vm0, %v130_v53, 0.0  ;;  %v924_v53 = vld [vmem:[%s1596_s3] sm:$0xff]  }
  0x98   :  { %150 = vadd.xlane.f32.xlu0 %v149_v49  ;;  %147 = vadd.xlane.f32.xlu1 %v146_v56  ;;  %v66_v57 = vpop.xlane.xlu0 %65  ;;  %v69_v58 = vpop.xlane.xlu1 %68 }
  0x99   :  { %v101_v60 = vmul.f32 0.03125, %v66_v57  ;;  %v102_v61 = vmul.f32 0.03125, %v69_v58  ;;  %v131_v62 = vmul.f32 %v1165_v54, %v1165_v54  ;;  %v132_v63 = vmul.f32 %v1167_v55, %v1167_v55 }
  0x9b   :  { %v1176_v0 = vsub.f32 %v1080_v12, %v101_v60  ;;  %v1179_v1 = vsub.f32 %v1085_v13, %v102_v61  ;;  %v155_v2 = vsel %vm45_vm0, %v131_v62, 0.0  ;;  %v158_v5 = vsel %vm45_vm0, %v132_v63, 0.0 }
  0x9c   :  { %153 = vadd.xlane.f32.xlu1 %v152_v59  ;;  %156 = vadd.xlane.f32.xlu0 %v155_v2  ;;  %v72_v3 = vpop.xlane.xlu0 %71  ;;  %v75_v4 = vpop.xlane.xlu1 %74 }
  0x9d   :  { %v103_v6 = vmul.f32 0.03125, %v72_v3  ;;  %v104_v7 = vmul.f32 0.03125, %v75_v4  ;;  %v133_v8 = vmul.f32 %v1176_v0, %v1176_v0  ;;  %v134_v9 = vmul.f32 %v1179_v1, %v1179_v1 }
  0x9f   :  { %v1188_v10 = vsub.f32 %v1094_v16, %v103_v6  ;;  %v1191_v11 = vsub.f32 %v1099_v17, %v104_v7  ;;  %v161_v12 = vsel %vm45_vm0, %v133_v8, 0.0  ;;  %v164_v15 = vsel %vm45_vm0, %v134_v9, 0.0 }
  0xa0   :  { %159 = vadd.xlane.f32.xlu1 %v158_v5  ;;  %162 = vadd.xlane.f32.xlu0 %v161_v12  ;;  %v78_v13 = vpop.xlane.xlu0 %77  ;;  %v81_v14 = vpop.xlane.xlu1 %80 }
  0xa1   :  { %v105_v18 = vmul.f32 0.03125, %v78_v13  ;;  %v106_v19 = vmul.f32 0.03125, %v81_v14  ;;  %v135_v22 = vmul.f32 %v1188_v10, %v1188_v10  ;;  %v136_v16 = vmul.f32 %v1191_v11, %v1191_v11 }
  0xa3   :  { %v1200_v23 = vsub.f32 %v1108_v20, %v105_v18  ;;  %v1203_v17 = vsub.f32 %v1113_v21, %v106_v19  ;;  %v167_v26 = vsel %vm45_vm0, %v135_v22, 0.0  ;;  %v170_v31 = vsel %vm45_vm0, %v136_v16, 0.0 }
  0xa4   :  { %165 = vadd.xlane.f32.xlu1 %v164_v15  ;;  %168 = vadd.xlane.f32.xlu0 %v167_v26  ;;  %v84_v27 = vpop.xlane.xlu0 %83  ;;  %v87_v30 = vpop.xlane.xlu1 %86 }
  0xa5   :  { %v107_v32 = vmul.f32 0.03125, %v84_v27  ;;  %v108_v33 = vmul.f32 0.03125, %v87_v30  ;;  %v137_v34 = vmul.f32 %v1200_v23, %v1200_v23  ;;  %v138_v20 = vmul.f32 %v1203_v17, %v1203_v17 }
  0xa7   :  { %v1212_v35 = vsub.f32 %v1122_v24, %v107_v32  ;;  %v1215_v21 = vsub.f32 %v1127_v25, %v108_v33  ;;  %v173_v38 = vsel %vm45_vm0, %v137_v34, 0.0  ;;  %v176_v41 = vsel %vm45_vm0, %v138_v20, 0.0  ;;  %v1246_v32 = vld [vmem:[%s1597_s1] ss:$0 sm:$0xff] }
  0xa8   :  { %171 = vadd.xlane.f32.xlu1 %v170_v31  ;;  %174 = vadd.xlane.f32.xlu0 %v173_v38  ;;  %v90_v39 = vpop.xlane.xlu0 %89  ;;  %v93_v40 = vpop.xlane.xlu1 %92 }
  0xa9   :  { %v109_v42 = vmul.f32 0.03125, %v90_v39  ;;  %v110_v43 = vmul.f32 0.03125, %v93_v40  ;;  %v139_v46 = vmul.f32 %v1212_v35, %v1212_v35  ;;  %v140_v24 = vmul.f32 %v1215_v21, %v1215_v21 }
  0xab   :  { %v1224_v47 = vsub.f32 %v1136_v28, %v109_v42  ;;  %v1227_v25 = vsub.f32 %v1141_v29, %v110_v43  ;;  %v179_v48 = vsel %vm45_vm0, %v139_v46, 0.0  ;;  %v182_v49 = vsel %vm45_vm0, %v140_v24, 0.0  ;;  %v923_v29 = vld [vmem:[%s1596_s3 + $0x8] sm:$0xff]   ;;  %v1253_v24 = vld [vmem:[%s1598_s2] ss:$0 sm:$0xff] }
  0xac   :  { %177 = vadd.xlane.f32.xlu1 %v176_v41  ;;  %180 = vadd.xlane.f32.xlu0 %v179_v48 }
  0xad   :  { %v141_v50 = vmul.f32 %v1224_v47, %v1224_v47  ;;  %v142_v51 = vmul.f32 %v1227_v25, %v1227_v25  ;;  %855 = vmatprep.subr.bf16.mxu0 %v923_v29 }
  0xae   :  { %856 = vmatpush3.bf16.msra.mxu0 %v923_v29 }
  0xaf   :  { %v185_v52 = vsel %vm45_vm0, %v141_v50, 0.0  ;;  %v188_v28 = vsel %vm45_vm0, %v142_v51, 0.0  ;;  %857 = vmatprep.subr.bf16.mxu0 %v924_v53 }
  0xb0   :  { %183 = vadd.xlane.f32.xlu1 %v182_v49  ;;  %186 = vadd.xlane.f32.xlu0 %v185_v52 }
  0xb2   :  { %858 = vmatpush3.bf16.msra.mxu0 %v924_v53 }
  0xb4   :  { %189 = vadd.xlane.f32.xlu1 %v188_v28 }
 0x11d   :  { %v145_v56 = vpop.xlane.xlu0 %144 }
 0x11e   :  { %v191_v57 = vmul.f32 0.03125, %v145_v56 }
 0x120   :  { %v207_v58 = vadd.f32 1e-05, %v191_v57 }
 0x121   :  { %v148_v59 = vpop.xlane.xlu1 %147  ;;  %v151_v60 = vpop.xlane.xlu0 %150 }
 0x122   :  { %933 = vrsqrt.f32 %v207_v58  ;;  %v192_v61 = vmul.f32 0.03125, %v148_v59  ;;  %v193_v62 = vmul.f32 0.03125, %v151_v60 }
 0x124   :  { %v208_v63 = vadd.f32 1e-05, %v192_v61  ;;  %v209_v2 = vadd.f32 1e-05, %v193_v62 }
 0x125   :  { %v154_v3 = vpop.xlane.xlu1 %153  ;;  %v157_v4 = vpop.xlane.xlu0 %156 }
 0x126   :  { %935 = vrsqrt.f32 %v208_v63  ;;  %v194_v5 = vmul.f32 0.03125, %v154_v3  ;;  %v195_v6 = vmul.f32 0.03125, %v157_v4 }
 0x127   :  { %937 = vrsqrt.f32 %v209_v2 }
 0x128   :  { %v210_v7 = vadd.f32 1e-05, %v194_v5  ;;  %v211_v8 = vadd.f32 1e-05, %v195_v6 }
 0x129   :  { %v160_v9 = vpop.xlane.xlu1 %159  ;;  %v163_v12 = vpop.xlane.xlu0 %162 }
 0x12a   :  { %939 = vrsqrt.f32 %v210_v7  ;;  %v196_v13 = vmul.f32 0.03125, %v160_v9  ;;  %v197_v14 = vmul.f32 0.03125, %v163_v12 }
 0x12b   :  { %941 = vrsqrt.f32 %v211_v8 }
 0x12c   :  { %v212_v15 = vadd.f32 1e-05, %v196_v13  ;;  %v213_v18 = vadd.f32 1e-05, %v197_v14 }
 0x12d   :  { %v166_v19 = vpop.xlane.xlu1 %165  ;;  %v169_v22 = vpop.xlane.xlu0 %168 }
 0x12e   :  { %943 = vrsqrt.f32 %v212_v15  ;;  %v198_v16 = vmul.f32 0.03125, %v166_v19  ;;  %v199_v26 = vmul.f32 0.03125, %v169_v22 }
 0x12f   :  { %v934_v27 = vpop.eup %933  ;;  %945 = vrsqrt.f32 %v213_v18 }
 0x130   :  { %v214_v30 = vadd.f32 1e-05, %v198_v16  ;;  %v215_v31 = vadd.f32 1e-05, %v199_v26  ;;  %v239_v33 = vmul.f32 %v934_v27, %v1147_v36 }
 0x131   :  { %v172_v34 = vpop.xlane.xlu1 %171  ;;  %v175_v20 = vpop.xlane.xlu0 %174 }
 0x132   :  { %947 = vrsqrt.f32 %v214_v30  ;;  %v200_v38 = vmul.f32 0.03125, %v172_v34  ;;  %v201_v39 = vmul.f32 0.03125, %v175_v20  ;;  %v261_v41 = vmul.f32 %v1246_v32, %v239_v33 }
 0x133   :  { %v936_v40 = vpop.eup %935  ;;  %949 = vrsqrt.f32 %v215_v31 }
 0x134   :  { %v938_v42 = vpop.eup %937  ;;  %v216_v43 = vadd.f32 1e-05, %v200_v38  ;;  %v217_v46 = vadd.f32 1e-05, %v201_v39  ;;  %v240_v48 = vmul.f32 %v936_v40, %v1155_v44  ;;  %v283_v53 = vadd.f32 %v1253_v24, %v261_v41 }
 0x135   :  { %v178_v36 = vpop.xlane.xlu1 %177  ;;  %v181_v49 = vpop.xlane.xlu0 %180  ;;  %v241_v50 = vmul.f32 %v938_v42, %v1149_v37 }
 0x136   :  { %951 = vrsqrt.f32 %v216_v43  ;;  %v202_v51 = vmul.f32 0.03125, %v178_v36  ;;  %v203_v52 = vmul.f32 0.03125, %v181_v49  ;;  %v262_v28 = vmul.f32 %v1246_v32, %v240_v48 }
 0x137   :  { %v940_v29 = vpop.eup %939  ;;  %953 = vrsqrt.f32 %v217_v46  ;;  %v263_v37 = vmul.f32 %v1246_v32, %v241_v50 }
 0x138   :  { %v942_v56 = vpop.eup %941  ;;  %v218_v57 = vadd.f32 1e-05, %v202_v51  ;;  %v219_v58 = vadd.f32 1e-05, %v203_v52  ;;  %v284_v59 = vadd.f32 %v1253_v24, %v262_v28  ;;  %v242_v44 = vmul.f32 %v940_v29, %v1157_v45 }
 0x139   :  { %v184_v60 = vpop.xlane.xlu1 %183  ;;  %v187_v61 = vpop.xlane.xlu0 %186  ;;  %v243_v62 = vmul.f32 %v942_v56, %v1165_v54  ;;  %v285_v54 = vadd.f32 %v1253_v24, %v263_v37 }
 0x13a   :  { %955 = vrsqrt.f32 %v218_v57  ;;  %v204_v63 = vmul.f32 0.03125, %v184_v60  ;;  %v205_v2 = vmul.f32 0.03125, %v187_v61  ;;  %v299_v3 = vpack.c.bf16 %v284_v59, %v283_v53 }
 0x13b   :  { %v944_v4 = vpop.eup %943  ;;  %957 = vrsqrt.f32 %v219_v58  ;;  %v264_v5 = vmul.f32 %v1246_v32, %v242_v44  ;;  %v265_v6 = vmul.f32 %v1246_v32, %v243_v62 }
 0x13c   :  { %v946_v7 = vpop.eup %945  ;;  %v220_v8 = vadd.f32 1e-05, %v204_v63  ;;  %v221_v9 = vadd.f32 1e-05, %v205_v2  ;;  %859 = vmatprep.mubr.msk.bf16.mxu0 %vm45_vm0, %v299_v3  ;;  %v244_v45 = vmul.f32 %v944_v4, %v1167_v55  ;;  %v928_v4 = vld [vmem:[%s1599_s5 + $0x20] sm:$0xff]  }
 0x13d   :  { %v190_v12 = vpop.xlane.xlu1 %189  ;;  %v286_v13 = vadd.f32 %v1253_v24, %v264_v5  ;;  %v245_v14 = vmul.f32 %v946_v7, %v1176_v0  ;;  %v287_v16 = vadd.f32 %v1253_v24, %v265_v6  ;;  %v929_v5 = vld [vmem:[%s1599_s5 + $0x18] sm:$0xff]   ;;  %v930_v6 = vld [vmem:[%s1599_s5 + $0x10] sm:$0xff]   ;;  %v931_v7 = vld [vmem:[%s1599_s5 + $0x8] sm:$0xff]  }
 0x13e   :  { %959 = vrsqrt.f32 %v220_v8  ;;  %v206_v15 = vmul.f32 0.03125, %v190_v12  ;;  %v266_v18 = vmul.f32 %v1246_v32, %v244_v45  ;;  %v932_v8 = vld [vmem:[%s1599_s5] sm:$0xff]  }
 0x13f   :  { %v948_v19 = vpop.eup %947  ;;  %961 = vrsqrt.f32 %v221_v9  ;;  %v300_v22 = vpack.c.bf16 %v286_v13, %v285_v54  ;;  %v267_v31 = vmul.f32 %v1246_v32, %v245_v14  ;;  %v1336_v9 = vld [vmem:[%s1600_s4] ss:$0 sm:$0xff] }
 0x140   :  { %v950_v26 = vpop.eup %949  ;;  %v222_v27 = vadd.f32 1e-05, %v206_v15  ;;  %v288_v55 = vadd.f32 %v1253_v24, %v266_v18  ;;  %v246_v30 = vmul.f32 %v948_v19, %v1179_v1 }
 0x141   :  { %860 = vmatmul.mubr.msk.bf16.vlgmr.msra.gmra.mxu0 %vm45_vm0, %v300_v22  ;;  %v247_v0 = vmul.f32 %v950_v26, %v1188_v10  ;;  %v289_v39 = vadd.f32 %v1253_v24, %v267_v31 }
 0x142   :  { %963 = vrsqrt.f32 %v222_v27  ;;  %v301_v33 = vpack.c.bf16 %v288_v55, %v287_v16  ;;  %v268_v34 = vmul.f32 %v1246_v32, %v246_v30 }
 0x143   :  { %v952_v20 = vpop.eup %951  ;;  %v269_v41 = vmul.f32 %v1246_v32, %v247_v0 }
 0x144   :  { %v954_v38 = vpop.eup %953  ;;  %863 = vmatprep.mubr.msk.bf16.mxu0 %vm45_vm0, %v301_v33  ;;  %v290_v40 = vadd.f32 %v1253_v24, %v268_v34  ;;  %v248_v1 = vmul.f32 %v952_v20, %v1191_v11 }
 0x145   :  { %v249_v42 = vmul.f32 %v954_v38, %v1200_v23  ;;  %v291_v36 = vadd.f32 %v1253_v24, %v269_v41 }
 0x146   :  { %v302_v43 = vpack.c.bf16 %v290_v40, %v289_v39  ;;  %v270_v10 = vmul.f32 %v1246_v32, %v248_v1 }
 0x147   :  { %v956_v46 = vpop.eup %955  ;;  %v271_v51 = vmul.f32 %v1246_v32, %v249_v42 }
 0x148   :  { %v958_v48 = vpop.eup %957  ;;  %v292_v49 = vadd.f32 %v1253_v24, %v270_v10  ;;  %v250_v50 = vmul.f32 %v956_v46, %v1203_v17 }
 0x149   :  { %864 = vmatmul.mubr.msk.bf16.gmra.mxu0 %vm45_vm0, %v302_v43  ;;  %v251_v11 = vmul.f32 %v958_v48, %v1212_v35  ;;  %v293_v53 = vadd.f32 %v1253_v24, %v271_v51 }
 0x14a   :  { %v303_v52 = vpack.c.bf16 %v292_v49, %v291_v36  ;;  %v272_v23 = vmul.f32 %v1246_v32, %v250_v50 }
 0x14b   :  { %v960_v28 = vpop.eup %959  ;;  %v273_v17 = vmul.f32 %v1246_v32, %v251_v11 }
 0x14c   :  { %v962_v29 = vpop.eup %961  ;;  %867 = vmatprep.mubr.msk.bf16.mxu0 %vm45_vm0, %v303_v52  ;;  %v294_v56 = vadd.f32 %v1253_v24, %v272_v23  ;;  %v252_v57 = vmul.f32 %v960_v28, %v1215_v21 }
 0x14d   :  { %v253_v58 = vmul.f32 %v962_v29, %v1224_v47  ;;  %v295_v60 = vadd.f32 %v1253_v24, %v273_v17 }
 0x14e   :  { %v304_v59 = vpack.c.bf16 %v294_v56, %v293_v53  ;;  %v274_v35 = vmul.f32 %v1246_v32, %v252_v57 }
 0x14f   :  { %v964_v44 = vpop.eup %963  ;;  %v275_v62 = vmul.f32 %v1246_v32, %v253_v58 }
 0x150   :  { %v296_v61 = vadd.f32 %v1253_v24, %v274_v35  ;;  %v254_v37 = vmul.f32 %v964_v44, %v1227_v25  ;;  %v925_v25 = vld [vmem:[%s1599_s5 + $0x38] sm:$0xff]  }
 0x151   :  { %868 = vmatmul.mubr.msk.bf16.gmra.mxu0 %vm45_vm0, %v304_v59  ;;  %v297_v47 = vadd.f32 %v1253_v24, %v275_v62  ;;  %875 = vmatprep.subr.bf16.mxu0 %v925_v25 }
 0x152   :  { %v305_v63 = vpack.c.bf16 %v296_v61, %v295_v60  ;;  %v276_v21 = vmul.f32 %v1246_v32, %v254_v37  ;;  %907 = vmatprep.subr.bf16.mxu1 %v925_v25  ;;  %876 = vmatpush3.bf16.msra.mxu0 %v925_v25  ;;  %v926_v32 = vld [vmem:[%s1599_s5 + $0x30] sm:$0xff]  }
 0x153   :  { %915 = vmatpush3.bf16.msra.mxu1 %v925_v25  ;;  %877 = vmatprep.subr.bf16.mxu0 %v926_v32 }
 0x154   :  { %871 = vmatprep.mubr.msk.bf16.mxu0 %vm45_vm0, %v305_v63  ;;  %v298_v2 = vadd.f32 %v1253_v24, %v276_v21  ;;  %908 = vmatprep.subr.bf16.mxu1 %v926_v32  ;;  %v927_v24 = vld [vmem:[%s1599_s5 + $0x28] sm:$0xff]  }
 0x156   :  { %v306_v3 = vpack.c.bf16 %v298_v2, %v297_v47  ;;  %878 = vmatpush3.bf16.msra.mxu0 %v926_v32 }
 0x157   :  { %916 = vmatpush3.bf16.msra.mxu1 %v926_v32  ;;  %879 = vmatprep.subr.bf16.mxu0 %v927_v24 }
 0x158   :  { %909 = vmatprep.subr.bf16.mxu1 %v927_v24 }
 0x159   :  { %872 = vmatmul.mubr.msk.bf16.gmra.mxu0 %vm45_vm0, %v306_v3 }
 0x15a   :  { %880 = vmatpush3.bf16.msra.mxu0 %v927_v24 }
 0x15b   :  { %917 = vmatpush3.bf16.msra.mxu1 %v927_v24  ;;  %881 = vmatprep.subr.bf16.mxu0 %v928_v4 }
 0x15c   :  { %910 = vmatprep.subr.bf16.mxu1 %v928_v4 }
 0x15e   :  { %882 = vmatpush3.bf16.msra.mxu0 %v928_v4 }
 0x15f   :  { %918 = vmatpush3.bf16.msra.mxu1 %v928_v4  ;;  %883 = vmatprep.subr.bf16.mxu0 %v929_v5 }
 0x160   :  { %911 = vmatprep.subr.bf16.mxu1 %v929_v5 }
 0x162   :  { %884 = vmatpush3.bf16.msra.mxu0 %v929_v5 }
 0x163   :  { %919 = vmatpush3.bf16.msra.mxu1 %v929_v5  ;;  %885 = vmatprep.subr.bf16.mxu0 %v930_v6 }
 0x164   :  { %912 = vmatprep.subr.bf16.mxu1 %v930_v6 }
 0x166   :  { %886 = vmatpush3.bf16.msra.mxu0 %v930_v6 }
 0x167   :  { %920 = vmatpush3.bf16.msra.mxu1 %v930_v6  ;;  %887 = vmatprep.subr.bf16.mxu0 %v931_v7 }
 0x168   :  { %913 = vmatprep.subr.bf16.mxu1 %v931_v7 }
 0x16a   :  { %888 = vmatpush3.bf16.msra.mxu0 %v931_v7 }
 0x16b   :  { %921 = vmatpush3.bf16.msra.mxu1 %v931_v7  ;;  %889 = vmatprep.subr.bf16.mxu0 %v932_v8 }
 0x16c   :  { %914 = vmatprep.subr.bf16.mxu1 %v932_v8 }
 0x16e   :  { %890 = vmatpush3.bf16.msra.mxu0 %v932_v8 }
 0x16f   :  { %922 = vmatpush3.bf16.msra.mxu1 %v932_v8 }
 0x201   :  { %v861_v45 = vpop.f32.mrf.mxu0 }
 0x202   :  { %v397_v12 = vadd.f32 %v861_v45, %v1336_v9 }
 0x203   :  { %v388_v54 = vpop.f32.mrf.mxu0 }
 0x204   :  { %v469_v13 = vmul.f32 %v397_v12, %v397_v12  ;;  %v1340_v14 = vadd.f32 %v1336_v9, %v388_v54  ;;  %v1394_v32 = vmul.f32 0.5, %v397_v12 }
 0x205   :  { %v862_v15 = vpop.f32.mrf.mxu0 }
 0x206   :  { %v485_v18 = vmul.f32 %v469_v13, %v397_v12  ;;  %v467_v19 = vmul.f32 %v1340_v14, %v1340_v14  ;;  %v1345_v22 = vadd.f32 %v862_v15, %v1336_v9 }
 0x207   :  { %v391_v16 = vpop.f32.mrf.mxu0 }
 0x208   :  { %v501_v26 = vmul.f32 0.044715, %v485_v18  ;;  %v483_v27 = vmul.f32 %v467_v19, %v1340_v14  ;;  %v470_v55 = vmul.f32 %v1345_v22, %v1345_v22  ;;  %v1351_v30 = vadd.f32 %v1336_v9, %v391_v16 }
 0x209   :  { %v865_v31 = vpop.f32.mrf.mxu0 }
 0x20a   :  { %v517_v0 = vadd.f32 %v501_v26, %v397_v12  ;;  %v499_v33 = vmul.f32 0.044715, %v483_v27  ;;  %v486_v34 = vmul.f32 %v470_v55, %v1345_v22  ;;  %v1355_v20 = vadd.f32 %v865_v31, %v1336_v9 }
 0x20b   :  { %v468_v38 = vmul.f32 %v1351_v30, %v1351_v30  ;;  %v404_v39 = vpop.f32.mrf.mxu0  ;;  %v451_v26 = vmul.f32 0.5, %v1340_v14 }
 0x20c   :  { %v533_v40 = vmul.f32 0.7978846, %v517_v0  ;;  %v515_v1 = vadd.f32 %v499_v33, %v1340_v14  ;;  %v502_v41 = vmul.f32 0.044715, %v486_v34  ;;  %v473_v42 = vmul.f32 %v1355_v20, %v1355_v20 }
 0x20d   :  { %v484_v43 = vmul.f32 %v468_v38, %v1351_v30  ;;  %v1364_v10 = vadd.f32 %v1336_v9, %v404_v39  ;;  %v866_v46 = vpop.f32.mrf.mxu0  ;;  %v454_v34 = vmul.f32 0.5, %v1345_v22 }
 0x20e   :  { %965 = vtanh.f32 %v533_v40  ;;  %v531_v48 = vmul.f32 0.7978846, %v515_v1  ;;  %v518_v36 = vadd.f32 %v502_v41, %v1345_v22  ;;  %v489_v49 = vmul.f32 %v473_v42, %v1355_v20 }
 0x20f   :  { %v500_v50 = vmul.f32 0.044715, %v484_v43  ;;  %v471_v51 = vmul.f32 %v1364_v10, %v1364_v10  ;;  %v1371_v11 = vadd.f32 %v866_v46, %v1336_v9  ;;  %v407_v52 = vpop.f32.mrf.mxu0  ;;  %v452_v42 = vmul.f32 0.5, %v1351_v30 }
 0x210   :  { %v534_v23 = vmul.f32 0.7978846, %v518_v36  ;;  %v505_v28 = vmul.f32 0.044715, %v489_v49  ;;  %v1374_v29 = vadd.f32 %v1336_v9, %v407_v52  ;;  %967 = vtanh.f32 %v531_v48 }
 0x211   :  { %v516_v53 = vadd.f32 %v500_v50, %v1351_v30  ;;  %v487_v56 = vmul.f32 %v471_v51, %v1364_v10  ;;  %v474_v57 = vmul.f32 %v1371_v11, %v1371_v11  ;;  %v869_v17 = vpop.f32.mrf.mxu0 }
 0x212   :  { %969 = vtanh.f32 %v534_v23  ;;  %v521_v58 = vadd.f32 %v505_v28, %v1355_v20  ;;  %v472_v59 = vmul.f32 %v1374_v29, %v1374_v29  ;;  %v1384_v35 = vadd.f32 %v869_v17, %v1336_v9 }
 0x213   :  { %v532_v44 = vmul.f32 0.7978846, %v516_v53  ;;  %v503_v60 = vmul.f32 0.044715, %v487_v56  ;;  %v490_v61 = vmul.f32 %v474_v57, %v1371_v11  ;;  %v420_v37 = vpop.f32.mrf.mxu0 }
 0x214   :  { %v537_v62 = vmul.f32 0.7978846, %v521_v58  ;;  %v488_v63 = vmul.f32 %v472_v59, %v1374_v29  ;;  %v477_v21 = vmul.f32 %v1384_v35, %v1384_v35  ;;  %v1391_v47 = vadd.f32 %v1336_v9, %v420_v37 }
 0x215   :  { %971 = vtanh.f32 %v532_v44  ;;  %v506_v2 = vmul.f32 0.044715, %v490_v61  ;;  %v870_v3 = vpop.f32.mrf.mxu0  ;;  %v519_v25 = vadd.f32 %v503_v60, %v1364_v10 }
 0x216   :  { %v504_v24 = vmul.f32 0.044715, %v488_v63  ;;  %v493_v4 = vmul.f32 %v477_v21, %v1384_v35  ;;  %v475_v5 = vmul.f32 %v1391_v47, %v1391_v47  ;;  %973 = vtanh.f32 %v537_v62 }
 0x217   :  { %v522_v6 = vadd.f32 %v506_v2, %v1371_v11  ;;  %v1401_v7 = vadd.f32 %v870_v3, %v1336_v9  ;;  %v423_v8 = vpop.f32.mrf.mxu0  ;;  %v535_v45 = vmul.f32 0.7978846, %v519_v25 }
 0x218   :  { %v509_v54 = vmul.f32 0.044715, %v493_v4  ;;  %v491_v13 = vmul.f32 %v475_v5, %v1391_v47  ;;  %v1405_v12 = vadd.f32 %v1336_v9, %v423_v8  ;;  %v520_v15 = vadd.f32 %v504_v24, %v1374_v29 }
 0x219   :  { %v538_v18 = vmul.f32 0.7978846, %v522_v6  ;;  %v478_v19 = vmul.f32 %v1401_v7, %v1401_v7  ;;  %v873_v16 = vpop.f32.mrf.mxu0  ;;  %975 = vtanh.f32 %v535_v45 }
 0x21a   :  { %v525_v27 = vadd.f32 %v509_v54, %v1384_v35  ;;  %v507_v55 = vmul.f32 0.044715, %v491_v13  ;;  %v476_v31 = vmul.f32 %v1405_v12, %v1405_v12  ;;  %v1415_v0 = vadd.f32 %v873_v16, %v1336_v9 }
 0x21b   :  { %v966_v33 = vpop.eup %965  ;;  %977 = vtanh.f32 %v538_v18  ;;  %v494_v38 = vmul.f32 %v478_v19, %v1401_v7  ;;  %v436_v39 = vpop.f32.mrf.mxu0  ;;  %v536_v40 = vmul.f32 0.7978846, %v520_v15 }
 0x21c   :  { %v565_v1 = vadd.f32 1.0, %v966_v33  ;;  %v523_v14 = vadd.f32 %v507_v55, %v1391_v47  ;;  %v492_v41 = vmul.f32 %v476_v31, %v1405_v12  ;;  %v481_v46 = vmul.f32 %v1415_v0, %v1415_v0 }
 0x21d   :  { %v510_v43 = vmul.f32 0.044715, %v494_v38  ;;  %v1425_v48 = vadd.f32 %v1336_v9, %v436_v39  ;;  %v874_v22 = vpop.f32.mrf.mxu0  ;;  %979 = vtanh.f32 %v536_v40  ;;  %v968_v36 = vpop.eup %967  ;;  %v541_v49 = vmul.f32 0.7978846, %v525_v27 }
 0x21e   :  { %v539_v50 = vmul.f32 0.7978846, %v523_v14  ;;  %v508_v51 = vmul.f32 0.044715, %v492_v41  ;;  %v497_v28 = vmul.f32 %v481_v46, %v1415_v0  ;;  %v1432_v53 = vadd.f32 %v874_v22, %v1336_v9 }
 0x21f   :  { %v970_v52 = vpop.eup %969  ;;  %v526_v23 = vadd.f32 %v510_v43, %v1401_v7  ;;  %v479_v30 = vmul.f32 %v1425_v48, %v1425_v48  ;;  %v439_v56 = vpop.f32.mrf.mxu0  ;;  %v563_v21 = vadd.f32 1.0, %v968_v36  ;;  %v581_v6 = vmul.f32 %v565_v1, %v1394_v32 }
 0x220   :  { %v566_v57 = vadd.f32 1.0, %v970_v52  ;;  %981 = vtanh.f32 %v539_v50  ;;  %v524_v17 = vadd.f32 %v508_v51, %v1405_v12  ;;  %v1436_v58 = vadd.f32 %v1336_v9, %v439_v56 }
 0x221   :  { %v542_v59 = vmul.f32 0.7978846, %v526_v23  ;;  %v513_v44 = vmul.f32 0.044715, %v497_v28  ;;  %v495_v60 = vmul.f32 %v479_v30, %v1425_v48  ;;  %v482_v61 = vmul.f32 %v1432_v53, %v1432_v53 }
 0x222   :  { %v972_v37 = vpop.eup %971  ;;  %983 = vtanh.f32 %v541_v49  ;;  %v540_v62 = vmul.f32 0.7978846, %v524_v17  ;;  %v480_v63 = vmul.f32 %v1436_v58, %v1436_v58  ;;  %v582_v24 = vmul.f32 %v566_v57, %v454_v34 }
 0x223   :  { %985 = vtanh.f32 %v542_v59  ;;  %v529_v2 = vadd.f32 %v513_v44, %v1415_v0  ;;  %v511_v3 = vmul.f32 0.044715, %v495_v60  ;;  %v498_v9 = vmul.f32 %v482_v61, %v1432_v53  ;;  %v974_v25 = vpop.eup %973 }
 0x224   :  { %987 = vtanh.f32 %v540_v62  ;;  %v496_v4 = vmul.f32 %v480_v63, %v1436_v58  ;;  %v564_v5 = vadd.f32 1.0, %v972_v37  ;;  %v579_v18 = vmul.f32 %v563_v21, %v451_v26 }
 0x225   :  { %v527_v8 = vadd.f32 %v511_v3, %v1425_v48  ;;  %v514_v45 = vmul.f32 0.044715, %v498_v9  ;;  %v545_v13 = vmul.f32 0.7978846, %v529_v2  ;;  %v596_v34 = vpack.c.bf16 %v582_v24, %v581_v6 }
 0x226   :  { %v976_v54 = vpop.eup %975  ;;  %v512_v15 = vmul.f32 0.044715, %v496_v4  ;;  %v580_v19 = vmul.f32 %v564_v5, %v452_v42  ;;  %v458_v14 = vmul.f32 0.5, %v1371_v11  ;;  %v569_v26 = vadd.f32 1.0, %v974_v25 }
 0x227   :  { %v543_v16 = vmul.f32 0.7978846, %v527_v8  ;;  %v530_v27 = vadd.f32 %v514_v45, %v1432_v53  ;;  %v567_v39 = vadd.f32 1.0, %v976_v54  ;;  %v455_v41 = vmul.f32 0.5, %v1364_v10 }
 0x228   :  { %v978_v55 = vpop.eup %977  ;;  %v528_v31 = vadd.f32 %v512_v15, %v1436_v58  ;;  %v595_v33 = vpack.c.bf16 %v580_v19, %v579_v18  ;;  %v456_v42 = vmul.f32 0.5, %v1374_v29  ;;  %v457_v46 = vmul.f32 0.5, %v1355_v20 }
 0x229   :  { %989 = vtanh.f32 %v543_v16  ;;  %v546_v38 = vmul.f32 0.7978846, %v530_v27  ;;  %v570_v32 = vadd.f32 1.0, %v978_v55  ;;  %v583_v49 = vmul.f32 %v567_v39, %v455_v41  ;;  %v997_v16 = vld [vmem:[%s1595_s0 + $0x10] sm:$0xff]  ;;  %v999_v39 = vld [vmem:[%s1595_s0 + $0x18] sm:$0xff] }
 0x22a   :  { %v980_v40 = vpop.eup %979  ;;  %991 = vtanh.f32 %v545_v13  ;;  %v544_v1 = vmul.f32 0.7978846, %v528_v31  ;;  %891 = vmatprep.mubr.bf16.mxu0 %v595_v33  ;;  %v585_v51 = vmul.f32 %v569_v26, %v457_v46  ;;  %v459_v10 = vmul.f32 0.5, %v1391_v47  ;;  %v998_v31 = vld [vmem:[%s1595_s0] sm:$0xff]  ;;  %v1000_v26 = vld [vmem:[%s1595_s0 + $0x8] sm:$0xff] }
 0x22b   :  { %993 = vtanh.f32 %v546_v38  ;;  %892 = vmatmul.mubr.bf16.vlgmr.msra.gmra.mxu0 %v596_v34  ;;  %v568_v43 = vadd.f32 1.0, %v980_v40  ;;  %v586_v22 = vmul.f32 %v570_v32, %v458_v14  ;;  %v460_v29 = vmul.f32 0.5, %v1405_v12 }
 0x22c   :  { %995 = vtanh.f32 %v544_v1  ;;  %v462_v20 = vmul.f32 0.5, %v1401_v7  ;;  %v461_v61 = vmul.f32 0.5, %v1384_v35  ;;  %v463_v12 = vmul.f32 0.5, %v1425_v48  ;;  %v1465_v48 = vld [vmem:[%s1601_s6] ss:$0 sm:$0xff] }
 0x22d   :  { %v982_v36 = vpop.eup %981  ;;  %v584_v50 = vmul.f32 %v568_v43, %v456_v42  ;;  %v598_v11 = vpack.c.bf16 %v586_v22, %v585_v51  ;;  %v464_v7 = vmul.f32 0.5, %v1436_v58  ;;  %v466_v5 = vmul.f32 0.5, %v1432_v53  ;;  %v1001_v43 = vld [vmem:[%s1595_s0 + $0x30] sm:$0xff] }
 0x22e   :  { %v571_v30 = vadd.f32 1.0, %v982_v36  ;;  %v465_v45 = vmul.f32 0.5, %v1415_v0 }
 0x22f   :  { %v984_v52 = vpop.eup %983  ;;  %v597_v23 = vpack.c.bf16 %v584_v50, %v583_v49  ;;  %v1002_v49 = vld [vmem:[%s1595_s0 + $0x20] sm:$0xff] }
 0x230   :  { %v986_v28 = vpop.eup %985  ;;  %v573_v59 = vadd.f32 1.0, %v984_v52  ;;  %v587_v44 = vmul.f32 %v571_v30, %v459_v10 }
 0x231   :  { %v988_v56 = vpop.eup %987  ;;  %895 = vmatprep.mubr.bf16.mxu1 %v597_v23  ;;  %v574_v57 = vadd.f32 1.0, %v986_v28  ;;  %v1003_v23 = vld [vmem:[%s1595_s0 + $0x38] sm:$0xff] }
 0x232   :  { %896 = vmatmul.mubr.bf16.vlgmr.msra.gmra.mxu1 %v598_v11  ;;  %v572_v17 = vadd.f32 1.0, %v988_v56  ;;  %v589_v21 = vmul.f32 %v573_v59, %v461_v61  ;;  %v1004_v56 = vld [vmem:[%s1595_s0 + $0x28] sm:$0xff] }
 0x233   :  { %v590_v37 = vmul.f32 %v574_v57, %v462_v20 }
 0x234   :  { %v588_v60 = vmul.f32 %v572_v17, %v460_v29  ;;  %v1005_v17 = vld [vmem:[%s1595_s0 + $0x50] sm:$0xff] }
 0x235   :  { %v600_v47 = vpack.c.bf16 %v590_v37, %v589_v21 }
 0x236   :  { %v990_v62 = vpop.eup %989  ;;  %v599_v63 = vpack.c.bf16 %v588_v60, %v587_v44  ;;  %v1006_v60 = vld [vmem:[%s1595_s0 + $0x40] sm:$0xff] }
 0x237   :  { %v992_v2 = vpop.eup %991  ;;  %v575_v9 = vadd.f32 1.0, %v990_v62 }
 0x238   :  { %v994_v3 = vpop.eup %993  ;;  %899 = vmatprep.mubr.bf16.mxu1 %v599_v63  ;;  %v577_v35 = vadd.f32 1.0, %v992_v2  ;;  %v1007_v63 = vld [vmem:[%s1595_s0 + $0x58] sm:$0xff] }
 0x239   :  { %v996_v25 = vpop.eup %995  ;;  %v578_v24 = vadd.f32 1.0, %v994_v3  ;;  %v591_v6 = vmul.f32 %v575_v9, %v463_v12 }
 0x23a   :  { %900 = vmatmul.mubr.bf16.gmra.mxu1 %v600_v47  ;;  %v576_v4 = vadd.f32 1.0, %v996_v25  ;;  %v593_v15 = vmul.f32 %v577_v35, %v465_v45  ;;  %v1008_v47 = vld [vmem:[%s1595_s0 + $0x48] sm:$0xff]  ;;  %v1010_v35 = vld [vmem:[%s1595_s0 + $0x60] sm:$0xff] }
 0x23b   :  { %v594_v54 = vmul.f32 %v578_v24, %v466_v5  ;;  %v1009_v24 = vld [vmem:[%s1595_s0 + $0x70] sm:$0xff] }
 0x23c   :  { %v592_v8 = vmul.f32 %v576_v4, %v464_v7 }
 0x23d   :  { %v602_v18 = vpack.c.bf16 %v594_v54, %v593_v15  ;;  %v1011_v54 = vld [vmem:[%s1595_s0 + $0x78] sm:$0xff] }
 0x23e   :  { %v601_v13 = vpack.c.bf16 %v592_v8, %v591_v6 }
 0x240   :  { %903 = vmatprep.mubr.bf16.mxu1 %v601_v13 }
 0x242   :  { %904 = vmatmul.mubr.bf16.gmra.mxu1 %v602_v18  ;;  %v1012_v18 = vld [vmem:[%s1595_s0 + $0x68] sm:$0xff] }
 0x2eb   :  { %v893_v58 = vpop.f32.mrf.mxu0 }
 0x2ec   :  { %v717_v19 = vadd.f32 %v893_v58, %v1465_v48 }
 0x2ed   :  { %v708_v53 = vpop.f32.mrf.mxu0 }
 0x2ee   :  { %v773_v0 = vadd.f32 %v997_v16, %v717_v19  ;;  %v709_v27 = vadd.f32 %v1465_v48, %v708_v53 }
 0x2ef   :  { %v894_v55 = vpop.f32.mrf.mxu0 }
 0x2f0   :  { %789 = vst.msk [vmem:[%s1602_s7 + $0x10] sm:$0xff] %vm45_vm0, %v773_v0  ;;  %v771_v33 = vadd.f32 %v998_v31, %v709_v27  ;;  %v720_v34 = vadd.f32 %v894_v55, %v1465_v48 }
 0x2f1   :  { %v711_v38 = vpop.f32.mrf.mxu0 }
 0x2f2   :  { %787 = vst.msk [vmem:[%s1602_s7] sm:$0xff] %vm45_vm0, %v771_v33  ;;  %v774_v32 = vadd.f32 %v999_v39, %v720_v34  ;;  %v712_v40 = vadd.f32 %v1465_v48, %v711_v38  ;;  %v897_v1 = vpop.f32.mrf.mxu1 }
 0x2f3   :  { %v733_v14 = vadd.f32 %v897_v1, %v1465_v48 }
 0x2f4   :  { %790 = vst.msk [vmem:[%s1602_s7 + $0x18] sm:$0xff] %vm45_vm0, %v774_v32  ;;  %v772_v41 = vadd.f32 %v1000_v26, %v712_v40  ;;  %v724_v42 = vpop.f32.mrf.mxu1 }
 0x2f5   :  { %v777_v46 = vadd.f32 %v1001_v43, %v733_v14  ;;  %v725_v22 = vadd.f32 %v1465_v48, %v724_v42 }
 0x2f6   :  { %788 = vst.msk [vmem:[%s1602_s7 + $0x8] sm:$0xff] %vm45_vm0, %v772_v41  ;;  %v898_v36 = vpop.f32.mrf.mxu1 }
 0x2f7   :  { %793 = vst.msk [vmem:[%s1602_s7 + $0x30] sm:$0xff] %vm45_vm0, %v777_v46  ;;  %v775_v50 = vadd.f32 %v1002_v49, %v725_v22  ;;  %v736_v51 = vadd.f32 %v898_v36, %v1465_v48 }
 0x2f8   :  { %v727_v52 = vpop.f32.mrf.mxu1 }
 0x2f9   :  { %791 = vst.msk [vmem:[%s1602_s7 + $0x20] sm:$0xff] %vm45_vm0, %v775_v50  ;;  %v778_v28 = vadd.f32 %v1003_v23, %v736_v51  ;;  %v728_v11 = vadd.f32 %v1465_v48, %v727_v52 }
 0x2fa   :  { %v901_v30 = vpop.f32.mrf.mxu1 }
 0x2fb   :  { %794 = vst.msk [vmem:[%s1602_s7 + $0x38] sm:$0xff] %vm45_vm0, %v778_v28  ;;  %v776_v10 = vadd.f32 %v1004_v56, %v728_v11  ;;  %v749_v57 = vadd.f32 %v901_v30, %v1465_v48 }
 0x2fc   :  { %v740_v29 = vpop.f32.mrf.mxu1 }
 0x2fd   :  { %792 = vst.msk [vmem:[%s1602_s7 + $0x28] sm:$0xff] %vm45_vm0, %v776_v10  ;;  %v781_v20 = vadd.f32 %v1005_v17, %v749_v57  ;;  %v741_v59 = vadd.f32 %v1465_v48, %v740_v29 }
 0x2fe   :  { %v902_v44 = vpop.f32.mrf.mxu1 }
 0x2ff   :  { %797 = vst.msk [vmem:[%s1602_s7 + $0x50] sm:$0xff] %vm45_vm0, %v781_v20  ;;  %v779_v61 = vadd.f32 %v1006_v60, %v741_v59  ;;  %v752_v37 = vadd.f32 %v902_v44, %v1465_v48 }
 0x300   :  { %v743_v62 = vpop.f32.mrf.mxu1 }
 0x301   :  { %795 = vst.msk [vmem:[%s1602_s7 + $0x40] sm:$0xff] %vm45_vm0, %v779_v61  ;;  %v782_v21 = vadd.f32 %v1007_v63, %v752_v37  ;;  %v744_v2 = vadd.f32 %v1465_v48, %v743_v62 }
 0x302   :  { %v905_v3 = vpop.f32.mrf.mxu1 }
 0x303   :  { %798 = vst.msk [vmem:[%s1602_s7 + $0x58] sm:$0xff] %vm45_vm0, %v782_v21  ;;  %v780_v9 = vadd.f32 %v1008_v47, %v744_v2  ;;  %v765_v25 = vadd.f32 %v905_v3, %v1465_v48 }
 0x304   :  { %v756_v12 = vpop.f32.mrf.mxu1 }
 0x305   :  { %796 = vst.msk [vmem:[%s1602_s7 + $0x48] sm:$0xff] %vm45_vm0, %v780_v9  ;;  %v785_v7 = vadd.f32 %v1009_v24, %v765_v25  ;;  %v757_v4 = vadd.f32 %v1465_v48, %v756_v12 }
 0x306   :  { %v906_v5 = vpop.f32.mrf.mxu1 }
 0x307   :  { %801 = vst.msk [vmem:[%s1602_s7 + $0x70] sm:$0xff] %vm45_vm0, %v785_v7  ;;  %v783_v6 = vadd.f32 %v1010_v35, %v757_v4  ;;  %v768_v8 = vadd.f32 %v906_v5, %v1465_v48 }
 0x308   :  { %v759_v45 = vpop.f32.mrf.mxu1 }
 0x309   :  { %799 = vst.msk [vmem:[%s1602_s7 + $0x60] sm:$0xff] %vm45_vm0, %v783_v6  ;;  %v786_v13 = vadd.f32 %v1011_v54, %v768_v8  ;;  %v760_v15 = vadd.f32 %v1465_v48, %v759_v45 }
 0x30b   :  { %802 = vst.msk [vmem:[%s1602_s7 + $0x78] sm:$0xff] %vm45_vm0, %v786_v13  ;;  %v784_v58 = vadd.f32 %v1012_v18, %v760_v15 }
 0x30d   :  { %800 = vst.msk [vmem:[%s1602_s7 + $0x68] sm:$0xff] %vm45_vm0, %v784_v58 }

// kernel: basic_block_down.5
= control target key start
LH: loop header
LB: loop body
LE: loop exit
PB: predicated region body
PF: predicated region fallthrough
CT: control target
= control target key end

     0   :  { %s2190_s27 = smov 0   ;;  %s2192_s28 = smov 0   ;;  %s2590_s0 = inlined_call_operand.vmem [shape: f32[8,16,32], index: 0, kind: input, shape index: {}]   ;;  %s2591_s1 = inlined_call_operand.vmem [shape: f32[1,32], index: 1, kind: input, shape index: {}]   ;;  %s2592_s2 = inlined_call_operand.vmem [shape: f32[1,32], index: 2, kind: input, shape index: {}]   ;;  %s2593_s3 = inlined_call_operand.vmem [shape: bf16[32,96], index: 3, kind: input, shape index: {}]   ;;  %s2594_s4 = inlined_call_operand.vmem [shape: f32[1,96], index: 4, kind: input, shape index: {}]   ;;  %s2595_s5 = inlined_call_operand.vmem [shape: f32[2,16,16], index: 5, kind: input, shape index: {}]   ;;  %s2596_s6 = inlined_call_operand.vmem [shape: bf16[32,32], index: 6, kind: input, shape index: {}]   ;;  %s2597_s7 = inlined_call_operand.vmem [shape: f32[1,32], index: 7, kind: input, shape index: {}]   ;;  %s2598_s8 = inlined_call_operand.vmem [shape: f32[8,16,32], index: 8, kind: output, shape index: {}]  }
   0x1   :  { %s2194_s29 = smov 0  }
   0x2 LB: > { %s30_s30 = sadd.s32 1, %s2131_s28  ;;  %p1778_p0 = scmp.ge.s32.totalorder %s2135_s29, 1  ;;  %s2135_s29 = sphi %s2194_s29, %s18_s29   ;;  %s2131_s28 = sphi %s2192_s28, %s2600_s28   ;;  %s2127_s27 = sphi %s2190_s27, %s2599_s27  }
   0x3   : > { %p32_p1 = scmp.ge.s32.totalorder %s30_s30, 2  ;;  %p282_p2 = scmp.lt.s32.totalorder %s2135_s29, 3 }
   0x5   : > { %s2602_s30 = smov (%p32_p1, %s30_s30), 0  ;;  %p283_p3 = pnand %p1778_p0, %p282_p2 }
   0x6   : > { %s1779_s9 = sshll.u32 (!%p283_p3), %s2127_s27, 2  ;;  %s2139_s24 = smov (!%p283_p3), 96  }
   0x7   : > { %286 = sbr.rel (%p283_p3) target bundleno = 2396 (0x95c), region = 52  ;;  %p322_p4 = scmp.lt.s32.totalorder (!%p283_p3), %s1779_s9, 7 }
   0x8   : > { %s2140_s12 = smov (!%p283_p3), 64   ;;  %s2141_s14 = smov (!%p283_p3), 80  }
   0x9   : > { %s2142_s15 = smov (!%p283_p3), 112   ;;  %s2143_s20 = smov (!%p283_p3), 48  }
   0xa   : > { %s2144_s25 = smov (!%p283_p3), 16  }
   0xc   : > { %s2604_s9 = smov (!%p322_p4, %s1779_s9), 7  ;;  %vm349_vm0 = vcmask 261120   ;;  %v2021_v56 = vld [vmem:[%s2593_s3 + $0x8] sm:$0xff]   ;;  %v2022_v57 = vld [vmem:[%s2593_s3] sm:$0xff]   ;;  %vm2138_vm1 = vmmov 0   ;;  %vm598_vm2 = vcmask 130048  }
   0xd   : > { %s1819_s10 = sshll.u32 %s2604_s9, 4  ;;  %1865 = vmatprep.subr.bf16.mxu0 %v2021_v56  ;;  %1985 = vmatprep.subr.bf16.mxu1 %v2021_v56 }
   0xe   : > { %s2216_s13 = scalar_lea.vmem %s2590_s0, %s1819_s10  ;;  %1866 = vmatpush3.bf16.msra.mxu0 %v2021_v56  ;;  %1987 = vmatpush3.bf16.msra.mxu1 %v2021_v56 }
   0xf   : > { %v339_v0 = vld [vmem:[%s2216_s13] sm:$0xff]  ;;  %v341_v1 = vld [vmem:[%s2216_s13 + $0x10] sm:$0xff]  ;;  %v340_v2 = vld [vmem:[%s2216_s13 + $0x8] sm:$0xff]  ;;  %1867 = vmatprep.subr.bf16.mxu0 %v2022_v57  ;;  %1986 = vmatprep.subr.bf16.mxu1 %v2022_v57 }
  0x10   : > { %v350_v3 = vsel %vm349_vm0, %v339_v0, 0.0  ;;  %v356_v4 = vsel %vm349_vm0, %v341_v1, 0.0  ;;  %v342_v5 = vld [vmem:[%s2216_s13 + $0x18] sm:$0xff]  ;;  %v353_v6 = vsel %vm349_vm0, %v340_v2, 0.0  ;;  %v343_v8 = vld [vmem:[%s2216_s13 + $0x20] sm:$0xff]  ;;  %v344_v9 = vld [vmem:[%s2216_s13 + $0x28] sm:$0xff] }
  0x11   : > { %351 = vadd.xlane.f32.xlu0 %v350_v3  ;;  %357 = vadd.xlane.f32.xlu1 %v356_v4  ;;  %v359_v7 = vsel %vm349_vm0, %v342_v5, 0.0  ;;  %v362_v10 = vsel %vm349_vm0, %v343_v8, 0.0  ;;  %v365_v11 = vsel %vm349_vm0, %v344_v9, 0.0  ;;  %v345_v12 = vld [vmem:[%s2216_s13 + $0x30] sm:$0xff]  ;;  %v346_v13 = vld [vmem:[%s2216_s13 + $0x38] sm:$0xff] }
  0x12   : > { %v368_v14 = vsel %vm349_vm0, %v345_v12, 0.0  ;;  %v371_v15 = vsel %vm349_vm0, %v346_v13, 0.0  ;;  %1868 = vmatpush3.bf16.msra.mxu0 %v2022_v57  ;;  %1988 = vmatpush3.bf16.msra.mxu1 %v2022_v57 }
  0x15   : > { %354 = vadd.xlane.f32.xlu0 %v353_v6  ;;  %360 = vadd.xlane.f32.xlu1 %v359_v7 }
  0x19   : > { %363 = vadd.xlane.f32.xlu0 %v362_v10  ;;  %366 = vadd.xlane.f32.xlu1 %v365_v11 }
  0x1d   : > { %369 = vadd.xlane.f32.xlu0 %v368_v14  ;;  %372 = vadd.xlane.f32.xlu1 %v371_v15 }
  0x9a   : > { %v352_v16 = vpop.xlane.xlu0 %351  ;;  %v358_v17 = vpop.xlane.xlu1 %357 }
  0x9b   : > { %v375_v18 = vmul.f32 0.03125, %v352_v16  ;;  %v377_v19 = vmul.f32 0.03125, %v358_v17 }
  0x9d   : > { %v2234_v20 = vsub.f32 %v339_v0, %v375_v18  ;;  %v2236_v21 = vsub.f32 %v341_v1, %v377_v19 }
  0x9e   : > { %v355_v22 = vpop.xlane.xlu0 %354  ;;  %v361_v23 = vpop.xlane.xlu1 %360 }
  0x9f   : > { %v376_v24 = vmul.f32 0.03125, %v355_v22  ;;  %v378_v25 = vmul.f32 0.03125, %v361_v23  ;;  %v391_v26 = vmul.f32 %v2234_v20, %v2234_v20  ;;  %v393_v27 = vmul.f32 %v2236_v21, %v2236_v21  ;;  %v1785_v22 = vld [vmem:[%s2591_s1] ss:$0 sm:$0xff] }
  0xa1   : > { %v2242_v28 = vsub.f32 %v340_v2, %v376_v24  ;;  %v2244_v29 = vsub.f32 %v342_v5, %v378_v25  ;;  %v399_v30 = vsel %vm349_vm0, %v391_v26, 0.0  ;;  %v405_v33 = vsel %vm349_vm0, %v393_v27, 0.0  ;;  %v1786_v27 = vld [vmem:[%s2592_s2] ss:$0 sm:$0xff] }
  0xa2   : > { %400 = vadd.xlane.f32.xlu0 %v399_v30  ;;  %v364_v31 = vpop.xlane.xlu0 %363  ;;  %v367_v32 = vpop.xlane.xlu1 %366 }
  0xa3   : > { %v379_v34 = vmul.f32 0.03125, %v364_v31  ;;  %v380_v35 = vmul.f32 0.03125, %v367_v32  ;;  %v392_v36 = vmul.f32 %v2242_v28, %v2242_v28  ;;  %v394_v37 = vmul.f32 %v2244_v29, %v2244_v29 }
  0xa5   : > { %v2252_v38 = vsub.f32 %v343_v8, %v379_v34  ;;  %v2254_v39 = vsub.f32 %v344_v9, %v380_v35  ;;  %v402_v40 = vsel %vm349_vm0, %v392_v36, 0.0  ;;  %v408_v43 = vsel %vm349_vm0, %v394_v37, 0.0 }
  0xa6   : > { %406 = vadd.xlane.f32.xlu0 %v405_v33  ;;  %403 = vadd.xlane.f32.xlu1 %v402_v40  ;;  %v370_v41 = vpop.xlane.xlu0 %369  ;;  %v373_v42 = vpop.xlane.xlu1 %372 }
  0xa7   : > { %v381_v44 = vmul.f32 0.03125, %v370_v41  ;;  %v382_v45 = vmul.f32 0.03125, %v373_v42  ;;  %v395_v46 = vmul.f32 %v2252_v38, %v2252_v38  ;;  %v396_v47 = vmul.f32 %v2254_v39, %v2254_v39 }
  0xa9   : > { %v2262_v48 = vsub.f32 %v345_v12, %v381_v44  ;;  %v2264_v49 = vsub.f32 %v346_v13, %v382_v45  ;;  %v411_v50 = vsel %vm349_vm0, %v395_v46, 0.0  ;;  %v414_v51 = vsel %vm349_vm0, %v396_v47, 0.0 }
  0xaa   : > { %409 = vadd.xlane.f32.xlu1 %v408_v43  ;;  %412 = vadd.xlane.f32.xlu0 %v411_v50 }
  0xab   : > { %v397_v52 = vmul.f32 %v2262_v48, %v2262_v48  ;;  %v398_v53 = vmul.f32 %v2264_v49, %v2264_v49 }
  0xad   : > { %v417_v54 = vsel %vm349_vm0, %v397_v52, 0.0  ;;  %v420_v55 = vsel %vm349_vm0, %v398_v53, 0.0 }
  0xae   : > { %415 = vadd.xlane.f32.xlu1 %v414_v51  ;;  %418 = vadd.xlane.f32.xlu0 %v417_v54 }
  0xb2   : > { %421 = vadd.xlane.f32.xlu1 %v420_v55 }
 0x12b   : > { %v401_v58 = vpop.xlane.xlu0 %400 }
 0x12c   : > { %v423_v59 = vmul.f32 0.03125, %v401_v58 }
 0x12e   : > { %v431_v60 = vadd.f32 1e-05, %v423_v59 }
 0x12f   : > { %v404_v61 = vpop.xlane.xlu1 %403  ;;  %v407_v62 = vpop.xlane.xlu0 %406 }
 0x130   : > { %2025 = vrsqrt.f32 %v431_v60  ;;  %v424_v63 = vmul.f32 0.03125, %v404_v61  ;;  %v425_v0 = vmul.f32 0.03125, %v407_v62 }
 0x132   : > { %v432_v1 = vadd.f32 1e-05, %v424_v63  ;;  %v433_v2 = vadd.f32 1e-05, %v425_v0 }
 0x133   : > { %v410_v3 = vpop.xlane.xlu1 %409  ;;  %v413_v4 = vpop.xlane.xlu0 %412 }
 0x134   : > { %2027 = vrsqrt.f32 %v432_v1  ;;  %v426_v5 = vmul.f32 0.03125, %v410_v3  ;;  %v427_v6 = vmul.f32 0.03125, %v413_v4 }
 0x135   : > { %2029 = vrsqrt.f32 %v433_v2 }
 0x136   : > { %v434_v7 = vadd.f32 1e-05, %v426_v5  ;;  %v435_v8 = vadd.f32 1e-05, %v427_v6 }
 0x137   : > { %v416_v9 = vpop.xlane.xlu1 %415  ;;  %v419_v10 = vpop.xlane.xlu0 %418 }
 0x138   : > { %2031 = vrsqrt.f32 %v434_v7  ;;  %v428_v11 = vmul.f32 0.03125, %v416_v9  ;;  %v429_v12 = vmul.f32 0.03125, %v419_v10 }
 0x139   : > { %2033 = vrsqrt.f32 %v435_v8 }
 0x13a   : > { %v436_v13 = vadd.f32 1e-05, %v428_v11  ;;  %v437_v14 = vadd.f32 1e-05, %v429_v12 }
 0x13b   : > { %v422_v15 = vpop.xlane.xlu1 %421 }
 0x13c   : > { %2035 = vrsqrt.f32 %v436_v13  ;;  %v430_v16 = vmul.f32 0.03125, %v422_v15 }
 0x13d   : > { %v2026_v17 = vpop.eup %2025  ;;  %2037 = vrsqrt.f32 %v437_v14 }
 0x13e   : > { %v438_v18 = vadd.f32 1e-05, %v430_v16  ;;  %v447_v19 = vmul.f32 %v2026_v17, %v2234_v20 }
 0x140   : > { %2039 = vrsqrt.f32 %v438_v18  ;;  %v461_v26 = vmul.f32 %v1785_v22, %v447_v19 }
 0x141   : > { %v2028_v23 = vpop.eup %2027 }
 0x142   : > { %v2030_v24 = vpop.eup %2029  ;;  %v448_v25 = vmul.f32 %v2028_v23, %v2242_v28  ;;  %v475_v20 = vadd.f32 %v1786_v27, %v461_v26 }
 0x143   : > { %v449_v30 = vmul.f32 %v2030_v24, %v2236_v21  ;;  %v587_v24 = vld [vmem:[%s2595_s5] sm:$0xff] }
 0x144   : > { %v462_v31 = vmul.f32 %v1785_v22, %v448_v25 }
 0x145   : > { %v2032_v32 = vpop.eup %2031  ;;  %v463_v36 = vmul.f32 %v1785_v22, %v449_v30  ;;  %v588_v30 = vld [vmem:[%s2595_s5 + $0x8] sm:$0xff] }
 0x146   : > { %v2034_v33 = vpop.eup %2033  ;;  %v476_v34 = vadd.f32 %v1786_v27, %v462_v31  ;;  %v450_v35 = vmul.f32 %v2032_v32, %v2244_v29 }
 0x147   : > { %v451_v37 = vmul.f32 %v2034_v33, %v2252_v38  ;;  %v477_v43 = vadd.f32 %v1786_v27, %v463_v36 }
 0x148   : > { %v483_v40 = vpack.c.bf16 %v476_v34, %v475_v20  ;;  %v464_v41 = vmul.f32 %v1785_v22, %v450_v35 }
 0x149   : > { %v2036_v28 = vpop.eup %2035  ;;  %v465_v45 = vmul.f32 %v1785_v22, %v451_v37 }
 0x14a   : > { %v2038_v42 = vpop.eup %2037  ;;  %1869 = vmatprep.mubr.msk.bf16.mxu0 %vm349_vm0, %v483_v40  ;;  %v478_v44 = vadd.f32 %v1786_v27, %v464_v41  ;;  %v452_v21 = vmul.f32 %v2036_v28, %v2254_v39 }
 0x14b   : > { %v453_v46 = vmul.f32 %v2038_v42, %v2262_v48  ;;  %v479_v29 = vadd.f32 %v1786_v27, %v465_v45  ;;  %v2137_v48 = vmov 0.0  }
 0x14c   : > { %v484_v47 = vpack.c.bf16 %v478_v44, %v477_v43  ;;  %v466_v50 = vmul.f32 %v1785_v22, %v452_v21  ;;  %1877 = vmatprep.subr.bf16.mxu1 %v2137_v48  ;;  %1889 = vmatprep.subr.bf16.mxu0 %v2137_v48 }
 0x14d   : > { %v2040_v51 = vpop.eup %2039  ;;  %v467_v53 = vmul.f32 %v1785_v22, %v453_v46 }
 0x14e   : > { %1870 = vmatmul.mubr.msk.bf16.vlgmr.msra.gmra.mxu0 %vm349_vm0, %v484_v47  ;;  %v480_v38 = vadd.f32 %v1786_v27, %v466_v50  ;;  %v454_v52 = vmul.f32 %v2040_v51, %v2264_v49  ;;  %v1787_v49 = vld [vmem:[%s2594_s4] ss:$0 sm:$0xff] }
 0x14f   : > { %v481_v56 = vadd.f32 %v1786_v27, %v467_v53  ;;  %1891 = vmatprep.mubr.msk.bf16.mxu0 %vm2138_vm1, %v2137_v48 }
 0x150   : > { %v485_v54 = vpack.c.bf16 %v480_v38, %v479_v29  ;;  %v468_v55 = vmul.f32 %v1785_v22, %v454_v52 }
 0x152   : > { %1873 = vmatprep.mubr.msk.bf16.mxu1 %vm349_vm0, %v485_v54  ;;  %v482_v57 = vadd.f32 %v1786_v27, %v468_v55 }
 0x154   : > { %v486_v39 = vpack.c.bf16 %v482_v57, %v481_v56 }
 0x156   : > { %1874 = vmatmul.mubr.msk.bf16.vlgmr.msra.gmra.mxu1 %vm349_vm0, %v486_v39 }
 0x157   : > { %1879 = vmatprep.mubr.msk.bf16.mxu1 %vm2138_vm1, %v2137_v48 }
 0x20e   : > { %v1871_v58 = vpop.f32.mrf.mxu0 }
 0x20f   : > { %v565_v61 = vadd.f32 %v1871_v58, %v1787_v49 }
 0x210   : > { %v556_v59 = vpop.f32.mrf.mxu0 }
 0x211   : > { %v557_v0 = vadd.f32 %v1787_v49, %v556_v59 }
 0x212   : > { %v1872_v60 = vpop.f32.mrf.mxu0 }
 0x213   : > { %v568_v62 = vadd.f32 %v1872_v60, %v1787_v49 }
 0x214   : > { %v559_v63 = vpop.f32.mrf.mxu0 }
 0x215   : > { %v2307_v1 = vpack.c.bf16 %v568_v62, %v565_v61  ;;  %v560_v2 = vadd.f32 %v1787_v49, %v559_v63 }
 0x216   : > { %v1875_v3 = vpop.f32.mrf.mxu1 }
 0x217   : > { %v2309_v4 = vpack.c.bf16 %v560_v2, %v557_v0  ;;  %647 = vrot.lane.b32.xlu1 %v2307_v1, %s2139_s24  ;;  %v581_v12 = vadd.f32 %v1875_v3, %v1787_v49 }
 0x218   : > { %v572_v5 = vpop.f32.mrf.mxu1 }
 0x219   : > { %596 = vrot.lane.b32.xlu0 %v2309_v4, %s2139_s24  ;;  %v573_v8 = vadd.f32 %v1787_v49, %v572_v5 }
 0x21a   : > { %v1876_v6 = vpop.f32.mrf.mxu1 }
 0x21b   : > { %v584_v10 = vadd.f32 %v1876_v6, %v1787_v49 }
 0x21c   : > { %v575_v7 = vpop.f32.mrf.mxu1 }
 0x21d   : > { %v576_v9 = vadd.f32 %v1787_v49, %v575_v7  ;;  %v2316_v13 = vpack.c.bf16 %v584_v10, %v581_v12 }
 0x21f   : > { %v2313_v11 = vpack.c.bf16 %v576_v9, %v573_v8 }
 0x221   : > { %697 = vrot.lane.b32.xlu1 %v2313_v11, %s2139_s24 }
 0x225   : > { %747 = vrot.lane.b32.xlu1 %v2316_v13, %s2139_s24 }
 0x289   : > { %v648_v16 = vpop.permute.xlu1 %647 }
 0x28a   : > { %v653_v18 = vsel %vm598_vm2, %v648_v16, 0 }
 0x28b   : > { %v597_v14 = vpop.permute.xlu0 %596 }
 0x28c   : > { %v603_v15 = vsel %vm598_vm2, %v597_v14, 0 }
 0x28d   : > { %1878 = vmatpush3.bf16.xpose.msra.mxu1 %v603_v15 }
 0x28e   : > { %1883 = vmatprep.subr.bf16.mxu1 %v2137_v48 }
 0x293   : > { %v698_v17 = vpop.permute.xlu1 %697 }
 0x294   : > { %v703_v19 = vsel %vm598_vm2, %v698_v17, 0  ;;  %1880 = vmatmul.mubr.msk.bf16.vlgmr.msra.gmra.mxu1 %vm598_vm2, %v2309_v4 }
 0x295   : > { %1884 = vmatpush3.bf16.xpose.msra.mxu1 %v653_v18  ;;  %1890 = vmatpush3.bf16.xpose.msra.mxu0 %v703_v19 }
 0x296   : > { %1885 = vmatprep.mubr.msk.bf16.mxu1 %vm2138_vm1, %v2137_v48  ;;  %1895 = vmatprep.subr.bf16.mxu1 %v2137_v48 }
 0x297   : > { %1901 = vmatprep.subr.bf16.mxu0 %v2137_v48  ;;  %v748_v22 = vpop.permute.xlu1 %747 }
 0x298   : > { %v753_v23 = vsel %vm598_vm2, %v748_v22, 0 }
 0x29c   : > { %1886 = vmatmul.mubr.msk.bf16.vlgmr.msra.gmra.mxu1 %vm598_vm2, %v2307_v1  ;;  %1892 = vmatmul.mubr.msk.bf16.vlgmr.msra.gmra.mxu0 %vm598_vm2, %v2313_v11 }
 0x29d   : > { %1896 = vmatpush3.bf16.xpose.msra.mxu1 %v753_v23  ;;  %1897 = vmatprep.mubr.msk.bf16.mxu1 %vm2138_vm1, %v2137_v48 }
 0x29e   : > { %1907 = vmatprep.subr.bf16.mxu1 %v2137_v48  ;;  %1903 = vmatprep.mubr.msk.bf16.mxu0 %vm2138_vm1, %v2137_v48 }
 0x2a4   : > { %1898 = vmatmul.mubr.msk.bf16.vlgmr.msra.gmra.mxu1 %vm598_vm2, %v2316_v13 }
 0x2a5   : > { %1909 = vmatprep.mubr.msk.bf16.mxu1 %vm2138_vm1, %v2137_v48 }
 0x354   : > { %v639_v25 = vpop.f32.mrf.mxu1 }
 0x355   : > { %v640_v26 = vadd.f32 %v639_v25, %v587_v24 }
 0x356   : > { %v1881_v27 = vpop.f32.mrf.mxu1 }
 0x357   : > { %v796_v31 = vsel %vm598_vm2, %v640_v26, -inf }
 0x358   : > { %797 = vmax.xlane.f32.xlu0 %v796_v31  ;;  %v642_v32 = vpop.f32.mrf.mxu1 }
 0x359   : > { %v643_v33 = vadd.f32 %v642_v32, %v588_v30 }
 0x35a   : > { %v1882_v20 = vpop.f32.mrf.mxu1 }
 0x35b   : > { %v799_v34 = vsel %vm598_vm2, %v643_v33, -inf }
 0x35c   : > { %v739_v35 = vpop.f32.mrf.mxu0  ;;  %800 = vmax.xlane.f32.xlu1 %v799_v34  ;;  %v689_v36 = vpop.f32.mrf.mxu1 }
 0x35d   : > { %v690_v37 = vadd.f32 %v689_v36, %v587_v24  ;;  %v740_v47 = vadd.f32 %v739_v35, %v587_v24 }
 0x35e   : > { %v1887_v40 = vpop.f32.mrf.mxu1  ;;  %v1893_v41 = vpop.f32.mrf.mxu0 }
 0x35f   : > { %v802_v28 = vsel %vm598_vm2, %v690_v37, -inf  ;;  %v808_v53 = vsel %vm598_vm2, %v740_v47, -inf }
 0x360   : > { %v742_v42 = vpop.f32.mrf.mxu0  ;;  %803 = vmax.xlane.f32.xlu0 %v802_v28  ;;  %v692_v43 = vpop.f32.mrf.mxu1 }
 0x361   : > { %v743_v44 = vadd.f32 %v742_v42, %v588_v30  ;;  %v2352_v21 = vadd.f32 %v692_v43, %v588_v30 }
 0x362   : > { %v1888_v45 = vpop.f32.mrf.mxu1  ;;  %v1894_v46 = vpop.f32.mrf.mxu0 }
 0x363   : > { %v811_v50 = vsel %vm598_vm2, %v743_v44, -inf  ;;  %v805_v51 = vsel %vm598_vm2, %v2352_v21, -inf }
 0x364   : > { %812 = vmax.xlane.f32.xlu1 %v811_v50  ;;  %806 = vmax.xlane.f32.xlu0 %v805_v51  ;;  %v789_v29 = vpop.f32.mrf.mxu1 }
 0x365   : > { %v790_v52 = vadd.f32 %v789_v29, %v587_v24 }
 0x366   : > { %v1899_v38 = vpop.f32.mrf.mxu1 }
 0x367   : > { %v814_v57 = vsel %vm598_vm2, %v790_v52, -inf }
 0x368   : > { %809 = vmax.xlane.f32.xlu0 %v808_v53  ;;  %v792_v54 = vpop.f32.mrf.mxu1 }
 0x369   : > { %v2358_v55 = vadd.f32 %v792_v54, %v588_v30 }
 0x36a   : > { %v1900_v56 = vpop.f32.mrf.mxu1 }
 0x36b   : > { %v817_v39 = vsel %vm598_vm2, %v2358_v55, -inf }
 0x36c   : > { %815 = vmax.xlane.f32.xlu0 %v814_v57  ;;  %818 = vmax.xlane.f32.xlu1 %v817_v39 }
 0x3e1   : > { %v798_v58 = vpop.xlane.xlu0 %797 }
 0x3e2   : > { %v820_v49 = vsub.f32 %v640_v26, %v798_v58 }
 0x3e4   : > { %v828_v59 = vmul.f32 1.442695, %v820_v49 }
 0x3e5   : > { %v801_v60 = vpop.xlane.xlu1 %800 }
 0x3e6   : > { %2041 = vpow2.f32 %v828_v59  ;;  %v821_v61 = vsub.f32 %v643_v33, %v801_v60 }
 0x3e8   : > { %v830_v62 = vmul.f32 1.442695, %v821_v61 }
 0x3e9   : > { %v804_v63 = vpop.xlane.xlu0 %803 }
 0x3ea   : > { %2043 = vpow2.f32 %v830_v62  ;;  %v822_v5 = vsub.f32 %v690_v37, %v804_v63 }
 0x3ec   : > { %v832_v10 = vmul.f32 1.442695, %v822_v5 }
 0x3ed   : > { %v813_v0 = vpop.xlane.xlu1 %812  ;;  %v807_v2 = vpop.xlane.xlu0 %806 }
 0x3ee   : > { %v825_v3 = vsub.f32 %v743_v44, %v813_v0  ;;  %v823_v26 = vsub.f32 %v2352_v21, %v807_v2 }
 0x3f0   : > { %v838_v6 = vmul.f32 1.442695, %v825_v3  ;;  %v834_v30 = vmul.f32 1.442695, %v823_v26 }
 0x3f1   : > { %v810_v7 = vpop.xlane.xlu0 %809 }
 0x3f2   : > { %2045 = vpow2.f32 %v838_v6  ;;  %v824_v8 = vsub.f32 %v740_v47, %v810_v7 }
 0x3f3   : > { %v2363_v9 = vpop.eup %2041 }
 0x3f4   : > { %v836_v12 = vmul.f32 1.442695, %v824_v8  ;;  %v844_v14 = vsel %vm598_vm2, %v2363_v9, 0.0 }
 0x3f5   : > { %845 = vadd.xlane.f32.xlu0 %v844_v14  ;;  %v816_v25 = vpop.xlane.xlu0 %815  ;;  %v819_v35 = vpop.xlane.xlu1 %818 }
 0x3f6   : > { %2047 = vpow2.f32 %v836_v12  ;;  %v826_v27 = vsub.f32 %v790_v52, %v816_v25  ;;  %v827_v36 = vsub.f32 %v2358_v55, %v819_v35  ;;  %v589_v35 = vld [vmem:[%s2595_s5 + $0x10] sm:$0xff] }
 0x3f7   : > { %v2044_v15 = vpop.eup %2043  ;;  %2049 = vpow2.f32 %v832_v10 }
 0x3f8   : > { %v847_v16 = vsel %vm598_vm2, %v2044_v15, 0.0  ;;  %v840_v31 = vmul.f32 1.442695, %v826_v27  ;;  %2051 = vpow2.f32 %v834_v30  ;;  %v842_v37 = vmul.f32 1.442695, %v827_v36 }
 0x3f9   : > { %848 = vadd.xlane.f32.xlu1 %v847_v16 }
 0x3fa   : > { %2053 = vpow2.f32 %v840_v31 }
 0x3fb   : > { %2055 = vpow2.f32 %v842_v37 }
 0x3ff   : > { %v2368_v17 = vpop.eup %2045 }
 0x400   : > { %v859_v18 = vsel %vm598_vm2, %v2368_v17, 0.0 }
 0x401   : > { %860 = vadd.xlane.f32.xlu1 %v859_v18 }
 0x403   : > { %v2372_v19 = vpop.eup %2047 }
 0x404   : > { %v856_v22 = vsel %vm598_vm2, %v2372_v19, 0.0  ;;  %v2376_v23 = vpop.eup %2049 }
 0x405   : > { %857 = vadd.xlane.f32.xlu0 %v856_v22  ;;  %v850_v24 = vsel %vm598_vm2, %v2376_v23, 0.0  ;;  %v2385_v32 = vpop.eup %2051 }
 0x406   : > { %v853_v34 = vsel %vm598_vm2, %v2385_v32, 0.0 }
 0x407   : > { %v2387_v33 = vpop.eup %2053 }
 0x408   : > { %v862_v20 = vsel %vm598_vm2, %v2387_v33, 0.0  ;;  %v2399_v40 = vpop.eup %2055 }
 0x409   : > { %851 = vadd.xlane.f32.xlu0 %v850_v24  ;;  %v865_v41 = vsel %vm598_vm2, %v2399_v40, 0.0 }
 0x412   : > { %935 = vrot.lane.b32.xlu1 %v2307_v1, %s2140_s12 }
 0x416   : > { %982 = vrot.lane.b32.xlu1 %v2313_v11, %s2140_s12 }
 0x41a   : > { %1029 = vrot.lane.b32.xlu1 %v2316_v13, %s2140_s12 }
 0x41f   : > { %888 = vrot.lane.b32.xlu0 %v2309_v4, %s2140_s12 }
 0x43e   : > { %863 = vadd.xlane.f32.xlu0 %v862_v20  ;;  %854 = vadd.xlane.f32.xlu1 %v853_v34 }
 0x44f   : > { %1133 = vrot.lane.b32.xlu1 %v2307_v1, %s2141_s14 }
 0x454   : > { %1082 = vrot.lane.b32.xlu0 %v2309_v4, %s2141_s14 }
 0x458   : > { %1080 = vrot.lane.b32.xlu0 %v2309_v4, %s2142_s15 }
 0x45c   : > { %1131 = vrot.lane.b32.xlu0 %v2307_v1, %s2142_s15 }
 0x460   : > { %1182 = vrot.lane.b32.xlu0 %v2313_v11, %s2142_s15 }
 0x473   : > { %866 = vadd.xlane.f32.xlu1 %v865_v41  ;;  %v590_v41 = vld [vmem:[%s2595_s5 + $0x18] sm:$0xff] }
 0x47e   : > { %v846_v42 = vpop.xlane.xlu0 %845 }
 0x482   : > { %v849_v28 = vpop.xlane.xlu1 %848 }
 0x483   : > { %2057 = vrcp.f32 %v849_v28 }
 0x484   : > { %1184 = vrot.lane.b32.xlu1 %v2313_v11, %s2141_s14  ;;  %2059 = vrcp.f32 %v846_v42 }
 0x488   : > { %1235 = vrot.lane.b32.xlu1 %v2316_v13, %s2141_s14  ;;  %s2555_s14 = scalar_lea.vmem %s2598_s8, %s1819_s10 }
 0x48a   : > { %v861_v43 = vpop.xlane.xlu1 %860 }
 0x48b   : > { %2061 = vrcp.f32 %v861_v43 }
 0x48c   : > { %1233 = vrot.lane.b32.xlu1 %v2316_v13, %s2142_s15 }
 0x48e   : > { %v858_v44 = vpop.xlane.xlu0 %857  ;;  %v936_v21 = vpop.permute.xlu1 %935 }
 0x48f   : > { %2063 = vrcp.f32 %v858_v44  ;;  %1908 = vmatpush3.bf16.msra.mxu1 %v936_v21 }
 0x490   : > { %1919 = vmatprep.subr.bf16.mxu1 %v2137_v48  ;;  %v2058_v45 = vpop.eup %2057 }
 0x491   : > { %v2060_v47 = vpop.eup %2059  ;;  %v877_v50 = vmul.f32 %v2058_v45, %v2044_v15 }
 0x492   : > { %v852_v46 = vpop.xlane.xlu0 %851  ;;  %v876_v29 = vmul.f32 %v2060_v47, %v2363_v9  ;;  %v983_v53 = vpop.permute.xlu1 %982 }
 0x493   : > { %2065 = vrcp.f32 %v852_v46 }
 0x494   : > { %v884_v38 = vpack.c.bf16 %v877_v50, %v876_v29 }
 0x496   : > { %v889_v51 = vpop.permute.xlu0 %888  ;;  %v1030_v39 = vpop.permute.xlu1 %1029 }
 0x497   : > { %1902 = vmatpush3.bf16.msra.mxu0 %v889_v51 }
 0x498   : > { %1913 = vmatprep.subr.bf16.mxu0 %v2137_v48  ;;  %v2062_v52 = vpop.eup %2061 }
 0x499   : > { %v881_v56 = vmul.f32 %v2062_v52, %v2368_v17 }
 0x49a   : > { %1904 = vmatmul.mubr.msk.bf16.vlgmr.msra.gmra.mxu0 %vm598_vm2, %v884_v38 }
 0x49b   : > { %1914 = vmatpush3.bf16.msra.mxu0 %v983_v53  ;;  %1915 = vmatprep.mubr.msk.bf16.mxu0 %vm2138_vm1, %v2137_v48 }
 0x49c   : > { %v2064_v54 = vpop.eup %2063  ;;  %1925 = vmatprep.subr.bf16.mxu0 %v2137_v48 }
 0x49d   : > { %v880_v55 = vmul.f32 %v2064_v54, %v2372_v19 }
 0x49f   : > { %v886_v57 = vpack.c.bf16 %v881_v56, %v880_v55 }
 0x4a0   : > { %v2066_v62 = vpop.eup %2065 }
 0x4a1   : > { %v878_v0 = vmul.f32 %v2066_v62, %v2376_v23 }
 0x4a2   : > { %1916 = vmatmul.mubr.msk.bf16.vlgmr.msra.gmra.mxu0 %vm598_vm2, %v886_v57 }
 0x4a3   : > { %1927 = vmatprep.mubr.msk.bf16.mxu0 %vm2138_vm1, %v2137_v48 }
 0x4c7   : > { %v864_v58 = vpop.xlane.xlu0 %863  ;;  %v855_v49 = vpop.xlane.xlu1 %854 }
 0x4c8   : > { %2067 = vrcp.f32 %v855_v49 }
 0x4c9   : > { %2069 = vrcp.f32 %v864_v58 }
 0x4cb   : > { %v1083_v59 = vpop.permute.xlu0 %1082  ;;  %v1134_v5 = vpop.permute.xlu1 %1133 }
 0x4cc   : > { %v1088_v60 = vsel %vm598_vm2, %v1083_v59, 0  ;;  %v1139_v18 = vsel %vm598_vm2, %v1134_v5, 0 }
 0x4cd   : > { %1926 = vmatpush3.bf16.xpose.msra.mxu0 %v1088_v60 }
 0x4ce   : > { %1937 = vmatprep.subr.bf16.mxu0 %v2137_v48 }
 0x4cf   : > { %v1081_v61 = vpop.permute.xlu0 %1080 }
 0x4d3   : > { %v1132_v9 = vpop.permute.xlu0 %1131 }
 0x4d4   : > { %1928 = vmatmul.mubr.msk.bf16.vlgmr.msra.gmra.mxu0 %vm598_vm2, %v1081_v61 }
 0x4d5   : > { %1939 = vmatprep.mubr.msk.bf16.mxu0 %vm2138_vm1, %v2137_v48  ;;  %v2068_v63 = vpop.eup %2067 }
 0x4d6   : > { %v879_v2 = vmul.f32 %v2068_v63, %v2385_v32  ;;  %v2070_v10 = vpop.eup %2069 }
 0x4d7   : > { %v1183_v12 = vpop.permute.xlu0 %1182  ;;  %v882_v15 = vmul.f32 %v2070_v10, %v2387_v33 }
 0x4d8   : > { %v885_v3 = vpack.c.bf16 %v879_v2, %v878_v0 }
 0x4da   : > { %1910 = vmatmul.mubr.msk.bf16.vlgmr.msra.gmra.mxu1 %vm598_vm2, %v885_v3 }
 0x4db   : > { %1920 = vmatpush3.bf16.msra.mxu1 %v1030_v39  ;;  %1921 = vmatprep.mubr.msk.bf16.mxu1 %vm2138_vm1, %v2137_v48 }
 0x4dc   : > { %1931 = vmatprep.subr.bf16.mxu1 %v2137_v48 }
 0x4fc   : > { %v867_v6 = vpop.xlane.xlu1 %866 }
 0x4fd   : > { %2071 = vrcp.f32 %v867_v6 }
 0x500   : > { %v1185_v7 = vpop.permute.xlu1 %1184 }
 0x501   : > { %v1190_v8 = vsel %vm598_vm2, %v1185_v7, 0 }
 0x502   : > { %1938 = vmatpush3.bf16.xpose.msra.mxu0 %v1190_v8 }
 0x503   : > { %1949 = vmatprep.subr.bf16.mxu0 %v2137_v48 }
 0x504   : > { %v1236_v19 = vpop.permute.xlu1 %1235 }
 0x505   : > { %v1241_v22 = vsel %vm598_vm2, %v1236_v19, 0 }
 0x508   : > { %v1234_v23 = vpop.permute.xlu1 %1233 }
 0x509   : > { %1940 = vmatmul.mubr.msk.bf16.vlgmr.msra.gmra.mxu0 %vm598_vm2, %v1183_v12 }
 0x50a   : > { %v2072_v14 = vpop.eup %2071  ;;  %1951 = vmatprep.mubr.msk.bf16.mxu0 %vm2138_vm1, %v2137_v48 }
 0x50b   : > { %v883_v16 = vmul.f32 %v2072_v14, %v2399_v40 }
 0x50d   : > { %v887_v17 = vpack.c.bf16 %v883_v16, %v882_v15 }
 0x50f   : > { %1922 = vmatmul.mubr.msk.bf16.vlgmr.msra.gmra.mxu1 %vm598_vm2, %v887_v17 }
 0x510   : > { %1932 = vmatpush3.bf16.xpose.msra.mxu1 %v1139_v18  ;;  %1933 = vmatprep.mubr.msk.bf16.mxu1 %vm2138_vm1, %v2137_v48 }
 0x511   : > { %1943 = vmatprep.subr.bf16.mxu1 %v2137_v48 }
 0x517   : > { %1934 = vmatmul.mubr.msk.bf16.vlgmr.msra.gmra.mxu1 %vm598_vm2, %v1132_v9 }
 0x518   : > { %1944 = vmatpush3.bf16.xpose.msra.mxu1 %v1241_v22  ;;  %1945 = vmatprep.mubr.msk.bf16.mxu1 %vm2138_vm1, %v2137_v48 }
 0x519   : > { %1955 = vmatprep.subr.bf16.mxu1 %v2137_v48 }
 0x51f   : > { %1946 = vmatmul.mubr.msk.bf16.vlgmr.msra.gmra.mxu1 %vm598_vm2, %v1234_v23 }
 0x520   : > { %1957 = vmatprep.mubr.msk.bf16.mxu1 %vm2138_vm1, %v2137_v48 }
 0x55a   : > { %v2449_v24 = vpop.f32.mrf.mxu0 }
 0x55c   : > { %v1905_v25 = vpop.f32.mrf.mxu0 }
 0x55e   : > { %v2451_v26 = vpop.f32.mrf.mxu0 }
 0x55f   : > { %v1076_v27 = vpack.c.bf16 %v2451_v26, %v2449_v24 }
 0x560   : > { %v1906_v30 = vpop.f32.mrf.mxu0 }
 0x562   : > { %v2455_v31 = vpop.f32.mrf.mxu0 }
 0x564   : > { %v1917_v32 = vpop.f32.mrf.mxu0 }
 0x566   : > { %v2457_v33 = vpop.f32.mrf.mxu0 }
 0x567   : > { %v1078_v20 = vpack.c.bf16 %v2457_v33, %v2455_v31 }
 0x568   : > { %v1918_v34 = vpop.f32.mrf.mxu0 }
 0x594   : > { %v1124_v36 = vpop.f32.mrf.mxu0 }
 0x595   : > { %v1125_v37 = vadd.f32 %v1124_v36, %v589_v35 }
 0x596   : > { %v1929_v40 = vpop.f32.mrf.mxu0 }
 0x597   : > { %v1284_v28 = vsel %vm598_vm2, %v1125_v37, -inf }
 0x598   : > { %1285 = vmax.xlane.f32.xlu0 %v1284_v28  ;;  %v1127_v42 = vpop.f32.mrf.mxu0 }
 0x599   : > { %v1128_v43 = vadd.f32 %v1127_v42, %v590_v41 }
 0x59a   : > { %v1930_v44 = vpop.f32.mrf.mxu0  ;;  %v2468_v21 = vpop.f32.mrf.mxu1 }
 0x59b   : > { %v1287_v45 = vsel %vm598_vm2, %v1128_v43, -inf }
 0x59c   : > { %1288 = vmax.xlane.f32.xlu1 %v1287_v45  ;;  %v1911_v46 = vpop.f32.mrf.mxu1 }
 0x59e   : > { %v2471_v47 = vpop.f32.mrf.mxu1 }
 0x59f   : > { %v1077_v50 = vpack.c.bf16 %v2471_v47, %v2468_v21  ;;  %v1810_v21 = vld [vmem:[%s2597_s7] ss:$0 sm:$0xff] }
 0x5a0   : > { %v1912_v51 = vpop.f32.mrf.mxu1 }
 0x5c9   : > { %v1226_v29 = vpop.f32.mrf.mxu0 }
 0x5ca   : > { %v1227_v3 = vadd.f32 %v1226_v29, %v589_v35 }
 0x5cb   : > { %v1941_v38 = vpop.f32.mrf.mxu0 }
 0x5cc   : > { %v1296_v9 = vsel %vm598_vm2, %v1227_v3, -inf }
 0x5cd   : > { %v1229_v52 = vpop.f32.mrf.mxu0 }
 0x5ce   : > { %v1230_v53 = vadd.f32 %v1229_v52, %v590_v41 }
 0x5cf   : > { %v2475_v54 = vpop.f32.mrf.mxu1  ;;  %v1942_v55 = vpop.f32.mrf.mxu0 }
 0x5d0   : > { %v1299_v56 = vsel %vm598_vm2, %v1230_v53, -inf }
 0x5d1   : > { %1300 = vmax.xlane.f32.xlu1 %v1299_v56  ;;  %v1923_v57 = vpop.f32.mrf.mxu1 }
 0x5d3   : > { %v2478_v39 = vpop.f32.mrf.mxu1 }
 0x5d4   : > { %v1079_v58 = vpack.c.bf16 %v2478_v39, %v2475_v54  ;;  %v2105_v54 = vld [vmem:[%s2216_s13] sm:$0xff] }
 0x5d5   : > { %v1924_v49 = vpop.f32.mrf.mxu1 }
 0x5d7   : > { %v1175_v59 = vpop.f32.mrf.mxu1 }
 0x5d8   : > { %v1176_v60 = vadd.f32 %v1175_v59, %v589_v35 }
 0x5d9   : > { %v1935_v61 = vpop.f32.mrf.mxu1 }
 0x5da   : > { %v1290_v62 = vsel %vm598_vm2, %v1176_v60, -inf }
 0x5db   : > { %1291 = vmax.xlane.f32.xlu0 %v1290_v62  ;;  %v1178_v63 = vpop.f32.mrf.mxu1 }
 0x5dc   : > { %v1179_v0 = vadd.f32 %v1178_v63, %v590_v41 }
 0x5dd   : > { %v1936_v2 = vpop.f32.mrf.mxu1 }
 0x5de   : > { %v1293_v5 = vsel %vm598_vm2, %v1179_v0, -inf }
 0x5df   : > { %1294 = vmax.xlane.f32.xlu0 %v1293_v5  ;;  %v1277_v6 = vpop.f32.mrf.mxu1 }
 0x5e0   : > { %v1278_v8 = vadd.f32 %v1277_v6, %v589_v35 }
 0x5e1   : > { %v1947_v7 = vpop.f32.mrf.mxu1 }
 0x5e2   : > { %v1302_v15 = vsel %vm598_vm2, %v1278_v8, -inf }
 0x5e3   : > { %1297 = vmax.xlane.f32.xlu0 %v1296_v9  ;;  %v1280_v10 = vpop.f32.mrf.mxu1 }
 0x5e4   : > { %v1281_v12 = vadd.f32 %v1280_v10, %v590_v41 }
 0x5e5   : > { %v1948_v14 = vpop.f32.mrf.mxu1 }
 0x5e6   : > { %v1305_v16 = vsel %vm598_vm2, %v1281_v12, -inf }
 0x5e7   : > { %1303 = vmax.xlane.f32.xlu0 %v1302_v15  ;;  %1306 = vmax.xlane.f32.xlu1 %v1305_v16 }
 0x621   : > { %v1286_v17 = vpop.xlane.xlu0 %1285 }
 0x622   : > { %v1308_v18 = vsub.f32 %v1125_v37, %v1286_v17 }
 0x624   : > { %v1316_v19 = vmul.f32 1.442695, %v1308_v18 }
 0x625   : > { %v1289_v22 = vpop.xlane.xlu1 %1288 }
 0x626   : > { %2073 = vpow2.f32 %v1316_v19  ;;  %v1309_v23 = vsub.f32 %v1128_v43, %v1289_v22 }
 0x628   : > { %v1318_v25 = vmul.f32 1.442695, %v1309_v23 }
 0x62a   : > { %2075 = vpow2.f32 %v1318_v25 }
 0x633   : > { %v2487_v30 = vpop.eup %2073 }
 0x634   : > { %v1332_v32 = vsel %vm598_vm2, %v2487_v30, 0.0 }
 0x635   : > { %1333 = vadd.xlane.f32.xlu0 %v1332_v32 }
 0x637   : > { %v2491_v34 = vpop.eup %2075 }
 0x638   : > { %v1335_v35 = vsel %vm598_vm2, %v2491_v34, 0.0 }
 0x639   : > { %1336 = vadd.xlane.f32.xlu1 %v1335_v35 }
 0x65a   : > { %v1301_v36 = vpop.xlane.xlu1 %1300 }
 0x65b   : > { %v1313_v41 = vsub.f32 %v1230_v53, %v1301_v36 }
 0x65d   : > { %v1326_v44 = vmul.f32 1.442695, %v1313_v41 }
 0x664   : > { %v1292_v37 = vpop.xlane.xlu0 %1291 }
 0x665   : > { %v1310_v40 = vsub.f32 %v1176_v60, %v1292_v37 }
 0x667   : > { %v1320_v28 = vmul.f32 1.442695, %v1310_v40 }
 0x668   : > { %v1295_v42 = vpop.xlane.xlu0 %1294 }
 0x669   : > { %2077 = vpow2.f32 %v1320_v28  ;;  %v1311_v43 = vsub.f32 %v1179_v0, %v1295_v42 }
 0x66b   : > { %v1322_v45 = vmul.f32 1.442695, %v1311_v43 }
 0x66c   : > { %v1298_v46 = vpop.xlane.xlu0 %1297 }
 0x66d   : > { %2079 = vpow2.f32 %v1322_v45  ;;  %v1312_v51 = vsub.f32 %v1227_v3, %v1298_v46 }
 0x66e   : > { %2081 = vpow2.f32 %v1326_v44 }
 0x66f   : > { %v1324_v29 = vmul.f32 1.442695, %v1312_v51 }
 0x670   : > { %v1304_v38 = vpop.xlane.xlu0 %1303  ;;  %v1307_v2 = vpop.xlane.xlu1 %1306 }
 0x671   : > { %2083 = vpow2.f32 %v1324_v29  ;;  %v1314_v52 = vsub.f32 %v1278_v8, %v1304_v38  ;;  %v1315_v3 = vsub.f32 %v1281_v12, %v1307_v2  ;;  %v2024_v29 = vld [vmem:[%s2596_s6] sm:$0xff]  }
 0x673   : > { %v1328_v55 = vmul.f32 1.442695, %v1314_v52  ;;  %v1330_v5 = vmul.f32 1.442695, %v1315_v3 }
 0x675   : > { %2085 = vpow2.f32 %v1328_v55 }
 0x676   : > { %v2078_v56 = vpop.eup %2077  ;;  %2087 = vpow2.f32 %v1330_v5 }
 0x677   : > { %v1338_v57 = vsel %vm598_vm2, %v2078_v56, 0.0 }
 0x678   : > { %1339 = vadd.xlane.f32.xlu0 %v1338_v57 }
 0x67a   : > { %v2080_v53 = vpop.eup %2079 }
 0x67b   : > { %v1341_v49 = vsel %vm598_vm2, %v2080_v53, 0.0  ;;  %v2082_v59 = vpop.eup %2081 }
 0x67c   : > { %1342 = vadd.xlane.f32.xlu1 %v1341_v49  ;;  %v1347_v62 = vsel %vm598_vm2, %v2082_v59, 0.0 }
 0x67e   : > { %v2084_v60 = vpop.eup %2083 }
 0x67f   : > { %v1344_v61 = vsel %vm598_vm2, %v2084_v60, 0.0 }
 0x680   : > { %1345 = vadd.xlane.f32.xlu0 %v1344_v61  ;;  %1348 = vadd.xlane.f32.xlu1 %v1347_v62 }
 0x682   : > { %v2499_v63 = vpop.eup %2085 }
 0x683   : > { %v1350_v0 = vsel %vm598_vm2, %v2499_v63, 0.0  ;;  %v2088_v6 = vpop.eup %2087 }
 0x684   : > { %1351 = vadd.xlane.f32.xlu0 %v1350_v0  ;;  %v1353_v7 = vsel %vm598_vm2, %v2088_v6, 0.0 }
 0x691   : > { %1423 = vrot.lane.b32.xlu1 %v2307_v1, %s2143_s20 }
 0x695   : > { %1470 = vrot.lane.b32.xlu1 %v2313_v11, %s2143_s20 }
 0x69a   : > { %1376 = vrot.lane.b32.xlu0 %v2309_v4, %s2143_s20 }
 0x6b9   : > { %1354 = vadd.xlane.f32.xlu1 %v1353_v7 }
 0x6be   : > { %v1334_v9 = vpop.xlane.xlu0 %1333 }
 0x6c2   : > { %v1337_v8 = vpop.xlane.xlu1 %1336 }
 0x6c3   : > { %2089 = vrcp.f32 %v1337_v8 }
 0x6c4   : > { %2091 = vrcp.f32 %v1334_v9 }
 0x6ca   : > { %1517 = vrot.lane.b32.xlu1 %v2316_v13, %s2143_s20 }
 0x6d0   : > { %v2090_v12 = vpop.eup %2089 }
 0x6d1   : > { %v2092_v16 = vpop.eup %2091  ;;  %v1365_v17 = vmul.f32 %v2090_v12, %v2491_v34 }
 0x6d2   : > { %v1364_v19 = vmul.f32 %v2092_v16, %v2487_v30 }
 0x6d4   : > { %v1372_v23 = vpack.c.bf16 %v1365_v17, %v1364_v19  ;;  %v2108_v19 = vld [vmem:[%s2216_s13 + $0x18] sm:$0xff] }
 0x701   : > { %v1340_v10 = vpop.xlane.xlu0 %1339 }
 0x702   : > { %2093 = vrcp.f32 %v1340_v10 }
 0x705   : > { %v1343_v1 = vpop.xlane.xlu1 %1342 }
 0x706   : > { %2095 = vrcp.f32 %v1343_v1 }
 0x709   : > { %v1346_v11 = vpop.xlane.xlu0 %1345  ;;  %v1349_v4 = vpop.xlane.xlu1 %1348 }
 0x70a   : > { %2097 = vrcp.f32 %v1346_v11 }
 0x70b   : > { %2099 = vrcp.f32 %v1349_v4 }
 0x70d   : > { %v1352_v14 = vpop.xlane.xlu0 %1351  ;;  %v1424_v15 = vpop.permute.xlu1 %1423 }
 0x70e   : > { %1956 = vmatpush3.bf16.msra.mxu1 %v1424_v15  ;;  %2101 = vrcp.f32 %v1352_v14 }
 0x70f   : > { %1967 = vmatprep.subr.bf16.mxu1 %v2137_v48  ;;  %v2094_v13 = vpop.eup %2093 }
 0x710   : > { %v1366_v25 = vmul.f32 %v2094_v13, %v2078_v56  ;;  %v2107_v13 = vld [vmem:[%s2216_s13 + $0x8] sm:$0xff] }
 0x711   : > { %v1377_v18 = vpop.permute.xlu0 %1376  ;;  %v1471_v35 = vpop.permute.xlu1 %1470 }
 0x712   : > { %1950 = vmatpush3.bf16.msra.mxu0 %v1377_v18 }
 0x713   : > { %v2096_v22 = vpop.eup %2095  ;;  %1961 = vmatprep.subr.bf16.mxu0 %v2137_v48 }
 0x714   : > { %v1367_v32 = vmul.f32 %v2096_v22, %v2080_v53 }
 0x715   : > { %1952 = vmatmul.mubr.msk.bf16.vlgmr.msra.gmra.mxu0 %vm598_vm2, %v1372_v23 }
 0x716   : > { %1962 = vmatpush3.bf16.msra.mxu0 %v1471_v35  ;;  %v1373_v36 = vpack.c.bf16 %v1367_v32, %v1366_v25  ;;  %1963 = vmatprep.mubr.msk.bf16.mxu0 %vm2138_vm1, %v2137_v48 }
 0x717   : > { %v2098_v34 = vpop.eup %2097 }
 0x718   : > { %v2100_v37 = vpop.eup %2099  ;;  %1958 = vmatmul.mubr.msk.bf16.vlgmr.msra.gmra.mxu1 %vm598_vm2, %v1373_v36  ;;  %v1368_v30 = vmul.f32 %v2098_v34, %v2084_v60  ;;  %v2109_v34 = vld [vmem:[%s2216_s13 + $0x20] sm:$0xff] }
 0x719   : > { %v1369_v40 = vmul.f32 %v2100_v37, %v2082_v59  ;;  %1969 = vmatprep.mubr.msk.bf16.mxu1 %vm2138_vm1, %v2137_v48  ;;  %v2023_v48 = vld [vmem:[%s2596_s6 + $0x8] sm:$0xff]  }
 0x71a   : > { %1973 = vmatprep.subr.bf16.mxu0 %v2023_v48 }
 0x71b   : > { %v1374_v41 = vpack.c.bf16 %v1369_v40, %v1368_v30  ;;  %v2102_v43 = vpop.eup %2101  ;;  %v2110_v30 = vld [vmem:[%s2216_s13 + $0x30] sm:$0xff] }
 0x71c   : > { %v1370_v45 = vmul.f32 %v2102_v43, %v2499_v63  ;;  %v2111_v43 = vld [vmem:[%s2216_s13 + $0x28] sm:$0xff] }
 0x71d   : > { %1964 = vmatmul.mubr.msk.bf16.vlgmr.msra.gmra.mxu0 %vm598_vm2, %v1374_v41 }
 0x71e   : > { %1974 = vmatpush3.bf16.msra.mxu0 %v2023_v48 }
 0x71f   : > { %1975 = vmatprep.subr.bf16.mxu0 %v2024_v29 }
 0x722   : > { %1976 = vmatpush3.bf16.msra.mxu0 %v2024_v29 }
 0x742   : > { %v1355_v28 = vpop.xlane.xlu1 %1354 }
 0x743   : > { %2103 = vrcp.f32 %v1355_v28 }
 0x746   : > { %v1518_v42 = vpop.permute.xlu1 %1517 }
 0x747   : > { %1968 = vmatpush3.bf16.msra.mxu1 %v1518_v42 }
 0x750   : > { %v2104_v44 = vpop.eup %2103 }
 0x751   : > { %v1371_v46 = vmul.f32 %v2104_v44, %v2088_v6 }
 0x753   : > { %v1375_v51 = vpack.c.bf16 %v1371_v46, %v1370_v45  ;;  %v2112_v45 = vld [vmem:[%s2216_s13 + $0x38] sm:$0xff] }
 0x755   : > { %1970 = vmatmul.mubr.msk.bf16.vlgmr.msra.gmra.mxu1 %vm598_vm2, %v1375_v51 }
 0x7d5   : > { %v1416_v38 = vpop.f32.mrf.mxu0 }
 0x7d7   : > { %v1953_v52 = vpop.f32.mrf.mxu0 }
 0x7d8   : > { %v1463_v55 = vpop.f32.mrf.mxu1 }
 0x7d9   : > { %v1419_v56 = vpop.f32.mrf.mxu0 }
 0x7da   : > { %v1564_v57 = vpack.c.bf16 %v1419_v56, %v1416_v38  ;;  %v1959_v53 = vpop.f32.mrf.mxu1 }
 0x7db   : > { %v1954_v49 = vpop.f32.mrf.mxu0 }
 0x7dc   : > { %1572 = vrot.lane.b32.xlu0 %v1564_v57, %s2144_s25  ;;  %v1466_v59 = vpop.f32.mrf.mxu1 }
 0x7dd   : > { %v1565_v60 = vpack.c.bf16 %v1466_v59, %v1463_v55  ;;  %v1510_v61 = vpop.f32.mrf.mxu0 }
 0x7de   : > { %v1960_v62 = vpop.f32.mrf.mxu1 }
 0x7df   : > { %v1965_v63 = vpop.f32.mrf.mxu0  ;;  %1574 = vrot.lane.b32.xlu1 %v1565_v60, %s2144_s25 }
 0x7e1   : > { %v1513_v0 = vpop.f32.mrf.mxu0 }
 0x7e2   : > { %v1566_v2 = vpack.c.bf16 %v1513_v0, %v1510_v61 }
 0x7e3   : > { %v1966_v3 = vpop.f32.mrf.mxu0 }
 0x7e4   : > { %1576 = vrot.lane.b32.xlu0 %v1566_v2, %s2144_s25 }
 0x815   : > { %v1557_v5 = vpop.f32.mrf.mxu1 }
 0x817   : > { %v1971_v6 = vpop.f32.mrf.mxu1 }
 0x819   : > { %v1560_v7 = vpop.f32.mrf.mxu1 }
 0x81a   : > { %v1567_v8 = vpack.c.bf16 %v1560_v7, %v1557_v5 }
 0x81b   : > { %v1972_v9 = vpop.f32.mrf.mxu1 }
 0x81c   : > { %1578 = vrot.lane.b32.xlu1 %v1567_v8, %s2144_s25 }
 0x84e   : > { %v1573_v10 = vpop.permute.xlu0 %1572 }
 0x84f   : > { %v1582_v1 = vsel %vm598_vm2, %v1076_v27, %v1573_v10 }
 0x850   : > { %1977 = vmatprep.mubr.msk.bf16.mxu0 %vm349_vm0, %v1582_v1 }
 0x851   : > { %v1575_v11 = vpop.permute.xlu1 %1574 }
 0x852   : > { %v1585_v4 = vsel %vm598_vm2, %v1077_v50, %v1575_v11 }
 0x853   : > { %1978 = vmatmul.mubr.msk.bf16.vlgmr.msra.gmra.mxu0 %vm349_vm0, %v1585_v4 }
 0x856   : > { %v1577_v12 = vpop.permute.xlu0 %1576 }
 0x857   : > { %v1588_v24 = vsel %vm598_vm2, %v1078_v20, %v1577_v12 }
 0x858   : > { %1981 = vmatprep.mubr.msk.bf16.mxu0 %vm349_vm0, %v1588_v24 }
 0x88e   : > { %v1579_v26 = vpop.permute.xlu1 %1578 }
 0x88f   : > { %v1591_v27 = vsel %vm598_vm2, %v1079_v58, %v1579_v26  ;;  %v2106_v58 = vld [vmem:[%s2216_s13 + $0x10] sm:$0xff] }
 0x890   : > { %1982 = vmatmul.mubr.msk.bf16.gmra.mxu0 %vm349_vm0, %v1591_v27 }
 0x913   : > { %v1979_v47 = vpop.f32.mrf.mxu0 }
 0x914   : > { %v1666_v50 = vadd.f32 %v1979_v47, %v1810_v21 }
 0x915   : > { %v1657_v31 = vpop.f32.mrf.mxu0 }
 0x916   : > { %v1658_v33 = vadd.f32 %v1810_v21, %v1657_v31  ;;  %v1690_v14 = vadd.f32 %v2106_v58, %v1666_v50 }
 0x917   : > { %v1980_v20 = vpop.f32.mrf.mxu0 }
 0x918   : > { %v1688_v39 = vadd.f32 %v2105_v54, %v1658_v33  ;;  %v1669_v15 = vadd.f32 %v1980_v20, %v1810_v21  ;;  %1698 = vst.msk [vmem:[%s2555_s14 + $0x10] sm:$0xff] %vm349_vm0, %v1690_v14 }
 0x919   : > { %v1660_v16 = vpop.f32.mrf.mxu0 }
 0x91a   : > { %1696 = vst.msk [vmem:[%s2555_s14] sm:$0xff] %vm349_vm0, %v1688_v39  ;;  %v1661_v17 = vadd.f32 %v1810_v21, %v1660_v16  ;;  %v1691_v22 = vadd.f32 %v2108_v19, %v1669_v15 }
 0x91c   : > { %v1689_v18 = vadd.f32 %v2107_v13, %v1661_v17  ;;  %1699 = vst.msk [vmem:[%s2555_s14 + $0x18] sm:$0xff] %vm349_vm0, %v1691_v22 }
 0x91e   : > { %1697 = vst.msk [vmem:[%s2555_s14 + $0x8] sm:$0xff] %vm349_vm0, %v1689_v18 }
 0x950   : > { %v1983_v23 = vpop.f32.mrf.mxu0 }
 0x951   : > { %v1682_v25 = vadd.f32 %v1983_v23, %v1810_v21 }
 0x952   : > { %v1673_v32 = vpop.f32.mrf.mxu0 }
 0x953   : > { %v1674_v35 = vadd.f32 %v1810_v21, %v1673_v32  ;;  %v1694_v40 = vadd.f32 %v2110_v30, %v1682_v25 }
 0x954   : > { %v1984_v36 = vpop.f32.mrf.mxu0 }
 0x955   : > { %v1692_v37 = vadd.f32 %v2109_v34, %v1674_v35  ;;  %v1685_v41 = vadd.f32 %v1984_v36, %v1810_v21  ;;  %1702 = vst.msk [vmem:[%s2555_s14 + $0x30] sm:$0xff] %vm349_vm0, %v1694_v40 }
 0x956   : > { %v1676_v28 = vpop.f32.mrf.mxu0 }
 0x957   : > { %1700 = vst.msk [vmem:[%s2555_s14 + $0x20] sm:$0xff] %vm349_vm0, %v1692_v37  ;;  %v1677_v42 = vadd.f32 %v1810_v21, %v1676_v28  ;;  %v1695_v46 = vadd.f32 %v2112_v45, %v1685_v41 }
 0x959   : > { %v1693_v44 = vadd.f32 %v2111_v43, %v1677_v42  ;;  %1703 = vst.msk [vmem:[%s2555_s14 + $0x38] sm:$0xff] %vm349_vm0, %v1695_v46 }
 0x95b   : > { %1701 = vst.msk [vmem:[%s2555_s14 + $0x28] sm:$0xff] %vm349_vm0, %v1693_v44 }
 0x95c PF: > { %s18_s29 = sadd.s32 1, %s2135_s29   ;;  %s2599_s27 = smov %s2131_s28 }
 0x95d   : > { %p15_p5 = scmp.ge.s32.totalorder %s18_s29, 4   ;;  %s2600_s28 = smov %s2602_s30 }
 0x95f   :  { %17 = sbr.rel (!%p15_p5) target bundleno = 2 (0x2), region = 82 }

// kernel: basic_block_down.7
= control target key start
LH: loop header
LB: loop body
LE: loop exit
PB: predicated region body
PF: predicated region fallthrough
CT: control target
= control target key end

     0   :  { %s2243_s27 = smov 0   ;;  %s2245_s28 = smov 0   ;;  %s2679_s0 = inlined_call_operand.vmem [shape: f32[8,16,32], index: 0, kind: input, shape index: {}]   ;;  %s2680_s1 = inlined_call_operand.vmem [shape: f32[1,32], index: 1, kind: input, shape index: {}]   ;;  %s2681_s2 = inlined_call_operand.vmem [shape: f32[1,32], index: 2, kind: input, shape index: {}]   ;;  %s2682_s3 = inlined_call_operand.vmem [shape: bf16[32,96], index: 3, kind: input, shape index: {}]   ;;  %s2683_s4 = inlined_call_operand.vmem [shape: f32[1,96], index: 4, kind: input, shape index: {}]   ;;  %s2684_s5 = inlined_call_operand.vmem [shape: f32[4,2,16,16], index: 5, kind: input, shape index: {}]   ;;  %s2685_s6 = inlined_call_operand.vmem [shape: bf16[32,32], index: 6, kind: input, shape index: {}]   ;;  %s2686_s7 = inlined_call_operand.vmem [shape: f32[1,32], index: 7, kind: input, shape index: {}]   ;;  %s2687_s8 = inlined_call_operand.vmem [shape: f32[8,16,32], index: 8, kind: output, shape index: {}]  }
   0x1   :  { %s2247_s29 = smov 0  }
   0x2 LB: > { %s30_s30 = sadd.s32 1, %s2184_s28  ;;  %p1831_p0 = scmp.ge.s32.totalorder %s2188_s29, 1  ;;  %s2188_s29 = sphi %s2247_s29, %s18_s29   ;;  %s2184_s28 = sphi %s2245_s28, %s2689_s28   ;;  %s2180_s27 = sphi %s2243_s27, %s2688_s27  }
   0x3   : > { %p32_p1 = scmp.ge.s32.totalorder %s30_s30, 2  ;;  %p294_p2 = scmp.lt.s32.totalorder %s2188_s29, 3 }
   0x5   : > { %s2691_s30 = smov (%p32_p1, %s30_s30), 0  ;;  %p295_p3 = pnand %p1831_p0, %p294_p2 }
   0x6   : > { %s1832_s9 = sshll.u32 (!%p295_p3), %s2180_s27, 2  ;;  %s2192_s24 = smov (!%p295_p3), 96  }
   0x7   : > { %298 = sbr.rel (%p295_p3) target bundleno = 2396 (0x95c), region = 52  ;;  %p340_p4 = scmp.lt.s32.totalorder (!%p295_p3), %s1832_s9, 7 }
   0x8   : > { %s2193_s25 = smov (!%p295_p3), 64   ;;  %s2194_s26 = smov (!%p295_p3), 80  }
   0x9   : > { %s2195_s27 = smov (!%p295_p3), 112   ;;  %s2196_s11 = smov (!%p295_p3), 48  }
   0xa   : > { %s2197_s17 = smov (!%p295_p3), 16  }
   0xc   : > { %s2693_s9 = smov (!%p340_p4, %s1832_s9), 7  ;;  %vm374_vm0 = vcmask 261120   ;;  %v2074_v56 = vld [vmem:[%s2682_s3 + $0x8] sm:$0xff]   ;;  %v2075_v57 = vld [vmem:[%s2682_s3] sm:$0xff]   ;;  %vm2191_vm1 = vmmov 0   ;;  %vm635_vm2 = vcmask 130048  }
   0xd   : > { %s1872_s10 = sshll.u32 %s2693_s9, 4  ;;  %1918 = vmatprep.subr.bf16.mxu0 %v2074_v56  ;;  %2038 = vmatprep.subr.bf16.mxu1 %v2074_v56 }
   0xe   : > { %s2269_s13 = scalar_lea.vmem %s2679_s0, %s1872_s10  ;;  %1919 = vmatpush3.bf16.msra.mxu0 %v2074_v56  ;;  %2040 = vmatpush3.bf16.msra.mxu1 %v2074_v56  ;;  %s2644_s22 = scalar_lea.vmem %s2687_s8, %s1872_s10 }
   0xf   : > { %v364_v0 = vld [vmem:[%s2269_s13] sm:$0xff]  ;;  %v366_v1 = vld [vmem:[%s2269_s13 + $0x10] sm:$0xff]  ;;  %v365_v2 = vld [vmem:[%s2269_s13 + $0x8] sm:$0xff]  ;;  %1920 = vmatprep.subr.bf16.mxu0 %v2075_v57  ;;  %2039 = vmatprep.subr.bf16.mxu1 %v2075_v57 }
  0x10   : > { %v375_v3 = vsel %vm374_vm0, %v364_v0, 0.0  ;;  %v381_v4 = vsel %vm374_vm0, %v366_v1, 0.0  ;;  %v367_v5 = vld [vmem:[%s2269_s13 + $0x18] sm:$0xff]  ;;  %v378_v6 = vsel %vm374_vm0, %v365_v2, 0.0  ;;  %v368_v8 = vld [vmem:[%s2269_s13 + $0x20] sm:$0xff]  ;;  %v369_v9 = vld [vmem:[%s2269_s13 + $0x28] sm:$0xff] }
  0x11   : > { %376 = vadd.xlane.f32.xlu0 %v375_v3  ;;  %382 = vadd.xlane.f32.xlu1 %v381_v4  ;;  %v384_v7 = vsel %vm374_vm0, %v367_v5, 0.0  ;;  %v387_v10 = vsel %vm374_vm0, %v368_v8, 0.0  ;;  %v390_v11 = vsel %vm374_vm0, %v369_v9, 0.0  ;;  %v370_v12 = vld [vmem:[%s2269_s13 + $0x30] sm:$0xff]  ;;  %v371_v13 = vld [vmem:[%s2269_s13 + $0x38] sm:$0xff] }
  0x12   : > { %v393_v14 = vsel %vm374_vm0, %v370_v12, 0.0  ;;  %v396_v15 = vsel %vm374_vm0, %v371_v13, 0.0  ;;  %1921 = vmatpush3.bf16.msra.mxu0 %v2075_v57  ;;  %2041 = vmatpush3.bf16.msra.mxu1 %v2075_v57 }
  0x15   : > { %379 = vadd.xlane.f32.xlu0 %v378_v6  ;;  %385 = vadd.xlane.f32.xlu1 %v384_v7 }
  0x19   : > { %388 = vadd.xlane.f32.xlu0 %v387_v10  ;;  %391 = vadd.xlane.f32.xlu1 %v390_v11 }
  0x1d   : > { %394 = vadd.xlane.f32.xlu0 %v393_v14  ;;  %397 = vadd.xlane.f32.xlu1 %v396_v15 }
  0x9a   : > { %v377_v16 = vpop.xlane.xlu0 %376  ;;  %v383_v17 = vpop.xlane.xlu1 %382 }
  0x9b   : > { %v400_v18 = vmul.f32 0.03125, %v377_v16  ;;  %v402_v19 = vmul.f32 0.03125, %v383_v17 }
  0x9d   : > { %v2287_v20 = vsub.f32 %v364_v0, %v400_v18  ;;  %v2289_v21 = vsub.f32 %v366_v1, %v402_v19 }
  0x9e   : > { %v380_v22 = vpop.xlane.xlu0 %379  ;;  %v386_v23 = vpop.xlane.xlu1 %385 }
  0x9f   : > { %v401_v24 = vmul.f32 0.03125, %v380_v22  ;;  %v403_v25 = vmul.f32 0.03125, %v386_v23  ;;  %v416_v26 = vmul.f32 %v2287_v20, %v2287_v20  ;;  %v418_v27 = vmul.f32 %v2289_v21, %v2289_v21  ;;  %v1838_v22 = vld [vmem:[%s2680_s1] ss:$0 sm:$0xff] }
  0xa1   : > { %v2295_v28 = vsub.f32 %v365_v2, %v401_v24  ;;  %v2297_v29 = vsub.f32 %v367_v5, %v403_v25  ;;  %v424_v30 = vsel %vm374_vm0, %v416_v26, 0.0  ;;  %v430_v33 = vsel %vm374_vm0, %v418_v27, 0.0  ;;  %v1839_v27 = vld [vmem:[%s2681_s2] ss:$0 sm:$0xff] }
  0xa2   : > { %425 = vadd.xlane.f32.xlu0 %v424_v30  ;;  %v389_v31 = vpop.xlane.xlu0 %388  ;;  %v392_v32 = vpop.xlane.xlu1 %391 }
  0xa3   : > { %v404_v34 = vmul.f32 0.03125, %v389_v31  ;;  %v405_v35 = vmul.f32 0.03125, %v392_v32  ;;  %v417_v36 = vmul.f32 %v2295_v28, %v2295_v28  ;;  %v419_v37 = vmul.f32 %v2297_v29, %v2297_v29 }
  0xa5   : > { %v2305_v38 = vsub.f32 %v368_v8, %v404_v34  ;;  %v2307_v39 = vsub.f32 %v369_v9, %v405_v35  ;;  %v427_v40 = vsel %vm374_vm0, %v417_v36, 0.0  ;;  %v433_v43 = vsel %vm374_vm0, %v419_v37, 0.0 }
  0xa6   : > { %431 = vadd.xlane.f32.xlu0 %v430_v33  ;;  %428 = vadd.xlane.f32.xlu1 %v427_v40  ;;  %v395_v41 = vpop.xlane.xlu0 %394  ;;  %v398_v42 = vpop.xlane.xlu1 %397 }
  0xa7   : > { %v406_v44 = vmul.f32 0.03125, %v395_v41  ;;  %v407_v45 = vmul.f32 0.03125, %v398_v42  ;;  %v420_v46 = vmul.f32 %v2305_v38, %v2305_v38  ;;  %v421_v47 = vmul.f32 %v2307_v39, %v2307_v39 }
  0xa9   : > { %v2315_v48 = vsub.f32 %v370_v12, %v406_v44  ;;  %v2317_v49 = vsub.f32 %v371_v13, %v407_v45  ;;  %v436_v50 = vsel %vm374_vm0, %v420_v46, 0.0  ;;  %v439_v51 = vsel %vm374_vm0, %v421_v47, 0.0 }
  0xaa   : > { %434 = vadd.xlane.f32.xlu1 %v433_v43  ;;  %437 = vadd.xlane.f32.xlu0 %v436_v50 }
  0xab   : > { %v422_v52 = vmul.f32 %v2315_v48, %v2315_v48  ;;  %v423_v53 = vmul.f32 %v2317_v49, %v2317_v49 }
  0xad   : > { %v442_v54 = vsel %vm374_vm0, %v422_v52, 0.0  ;;  %v445_v55 = vsel %vm374_vm0, %v423_v53, 0.0 }
  0xae   : > { %440 = vadd.xlane.f32.xlu1 %v439_v51  ;;  %443 = vadd.xlane.f32.xlu0 %v442_v54 }
  0xb2   : > { %446 = vadd.xlane.f32.xlu1 %v445_v55 }
 0x12b   : > { %v426_v58 = vpop.xlane.xlu0 %425 }
 0x12c   : > { %v448_v59 = vmul.f32 0.03125, %v426_v58 }
 0x12e   : > { %v456_v60 = vadd.f32 1e-05, %v448_v59 }
 0x12f   : > { %v429_v61 = vpop.xlane.xlu1 %428  ;;  %v432_v62 = vpop.xlane.xlu0 %431 }
 0x130   : > { %2078 = vrsqrt.f32 %v456_v60  ;;  %v449_v63 = vmul.f32 0.03125, %v429_v61  ;;  %v450_v0 = vmul.f32 0.03125, %v432_v62 }
 0x132   : > { %v457_v1 = vadd.f32 1e-05, %v449_v63  ;;  %v458_v2 = vadd.f32 1e-05, %v450_v0 }
 0x133   : > { %v435_v3 = vpop.xlane.xlu1 %434  ;;  %v438_v4 = vpop.xlane.xlu0 %437 }
 0x134   : > { %2080 = vrsqrt.f32 %v457_v1  ;;  %v451_v5 = vmul.f32 0.03125, %v435_v3  ;;  %v452_v6 = vmul.f32 0.03125, %v438_v4 }
 0x135   : > { %2082 = vrsqrt.f32 %v458_v2 }
 0x136   : > { %v459_v7 = vadd.f32 1e-05, %v451_v5  ;;  %v460_v8 = vadd.f32 1e-05, %v452_v6 }
 0x137   : > { %v441_v9 = vpop.xlane.xlu1 %440  ;;  %v444_v10 = vpop.xlane.xlu0 %443 }
 0x138   : > { %2084 = vrsqrt.f32 %v459_v7  ;;  %v453_v11 = vmul.f32 0.03125, %v441_v9  ;;  %v454_v12 = vmul.f32 0.03125, %v444_v10 }
 0x139   : > { %2086 = vrsqrt.f32 %v460_v8 }
 0x13a   : > { %v461_v13 = vadd.f32 1e-05, %v453_v11  ;;  %v462_v14 = vadd.f32 1e-05, %v454_v12 }
 0x13b   : > { %v447_v15 = vpop.xlane.xlu1 %446 }
 0x13c   : > { %2088 = vrsqrt.f32 %v461_v13  ;;  %v455_v16 = vmul.f32 0.03125, %v447_v15 }
 0x13d   : > { %v2079_v17 = vpop.eup %2078  ;;  %2090 = vrsqrt.f32 %v462_v14 }
 0x13e   : > { %v463_v18 = vadd.f32 1e-05, %v455_v16  ;;  %v472_v19 = vmul.f32 %v2079_v17, %v2287_v20 }
 0x140   : > { %2092 = vrsqrt.f32 %v463_v18  ;;  %v486_v26 = vmul.f32 %v1838_v22, %v472_v19 }
 0x141   : > { %v2081_v23 = vpop.eup %2080 }
 0x142   : > { %v2083_v24 = vpop.eup %2082  ;;  %v473_v25 = vmul.f32 %v2081_v23, %v2295_v28  ;;  %v500_v20 = vadd.f32 %v1839_v27, %v486_v26 }
 0x143   : > { %v474_v30 = vmul.f32 %v2083_v24, %v2289_v21  ;;  %v612_v24 = vld [vmem:[%s2684_s5] sm:$0xff] }
 0x144   : > { %v487_v31 = vmul.f32 %v1838_v22, %v473_v25 }
 0x145   : > { %v2085_v32 = vpop.eup %2084  ;;  %v488_v36 = vmul.f32 %v1838_v22, %v474_v30  ;;  %v613_v30 = vld [vmem:[%s2684_s5 + $0x8] sm:$0xff] }
 0x146   : > { %v2087_v33 = vpop.eup %2086  ;;  %v501_v34 = vadd.f32 %v1839_v27, %v487_v31  ;;  %v475_v35 = vmul.f32 %v2085_v32, %v2297_v29 }
 0x147   : > { %v476_v37 = vmul.f32 %v2087_v33, %v2305_v38  ;;  %v502_v43 = vadd.f32 %v1839_v27, %v488_v36 }
 0x148   : > { %v508_v40 = vpack.c.bf16 %v501_v34, %v500_v20  ;;  %v489_v41 = vmul.f32 %v1838_v22, %v475_v35  ;;  %v616_v34 = vld [vmem:[%s2684_s5 + $0x20] sm:$0xff] }
 0x149   : > { %v2089_v28 = vpop.eup %2088  ;;  %v490_v45 = vmul.f32 %v1838_v22, %v476_v37 }
 0x14a   : > { %v2091_v42 = vpop.eup %2090  ;;  %1922 = vmatprep.mubr.msk.bf16.mxu0 %vm374_vm0, %v508_v40  ;;  %v503_v44 = vadd.f32 %v1839_v27, %v489_v41  ;;  %v477_v21 = vmul.f32 %v2089_v28, %v2307_v39 }
 0x14b   : > { %v478_v46 = vmul.f32 %v2091_v42, %v2315_v48  ;;  %v504_v29 = vadd.f32 %v1839_v27, %v490_v45  ;;  %v2190_v48 = vmov 0.0   ;;  %v621_v42 = vld [vmem:[%s2684_s5 + $0x48] sm:$0xff] }
 0x14c   : > { %v509_v47 = vpack.c.bf16 %v503_v44, %v502_v43  ;;  %v491_v50 = vmul.f32 %v1838_v22, %v477_v21  ;;  %1930 = vmatprep.subr.bf16.mxu1 %v2190_v48  ;;  %1942 = vmatprep.subr.bf16.mxu0 %v2190_v48  ;;  %v617_v43 = vld [vmem:[%s2684_s5 + $0x28] sm:$0xff]  ;;  %v620_v21 = vld [vmem:[%s2684_s5 + $0x40] sm:$0xff] }
 0x14d   : > { %v2093_v51 = vpop.eup %2092  ;;  %v492_v53 = vmul.f32 %v1838_v22, %v478_v46 }
 0x14e   : > { %1923 = vmatmul.mubr.msk.bf16.vlgmr.msra.gmra.mxu0 %vm374_vm0, %v509_v47  ;;  %v505_v38 = vadd.f32 %v1839_v27, %v491_v50  ;;  %v479_v52 = vmul.f32 %v2093_v51, %v2317_v49  ;;  %v1840_v49 = vld [vmem:[%s2683_s4] ss:$0 sm:$0xff] }
 0x14f   : > { %v506_v56 = vadd.f32 %v1839_v27, %v492_v53  ;;  %1944 = vmatprep.mubr.msk.bf16.mxu0 %vm2191_vm1, %v2190_v48 }
 0x150   : > { %v510_v54 = vpack.c.bf16 %v505_v38, %v504_v29  ;;  %v493_v55 = vmul.f32 %v1838_v22, %v479_v52 }
 0x152   : > { %1926 = vmatprep.mubr.msk.bf16.mxu1 %vm374_vm0, %v510_v54  ;;  %v507_v57 = vadd.f32 %v1839_v27, %v493_v55  ;;  %v624_v54 = vld [vmem:[%s2684_s5 + $0x60] sm:$0xff] }
 0x154   : > { %v511_v39 = vpack.c.bf16 %v507_v57, %v506_v56  ;;  %v625_v57 = vld [vmem:[%s2684_s5 + $0x68] sm:$0xff] }
 0x156   : > { %1927 = vmatmul.mubr.msk.bf16.vlgmr.msra.gmra.mxu1 %vm374_vm0, %v511_v39 }
 0x157   : > { %1932 = vmatprep.mubr.msk.bf16.mxu1 %vm2191_vm1, %v2190_v48 }
 0x20e   : > { %v1924_v58 = vpop.f32.mrf.mxu0 }
 0x20f   : > { %v590_v61 = vadd.f32 %v1924_v58, %v1840_v49 }
 0x210   : > { %v581_v59 = vpop.f32.mrf.mxu0 }
 0x211   : > { %v582_v0 = vadd.f32 %v1840_v49, %v581_v59 }
 0x212   : > { %v1925_v60 = vpop.f32.mrf.mxu0 }
 0x213   : > { %v593_v62 = vadd.f32 %v1925_v60, %v1840_v49 }
 0x214   : > { %v584_v63 = vpop.f32.mrf.mxu0 }
 0x215   : > { %v2360_v1 = vpack.c.bf16 %v593_v62, %v590_v61  ;;  %v585_v2 = vadd.f32 %v1840_v49, %v584_v63 }
 0x216   : > { %v1928_v3 = vpop.f32.mrf.mxu1 }
 0x217   : > { %v2362_v4 = vpack.c.bf16 %v585_v2, %v582_v0  ;;  %684 = vrot.lane.b32.xlu1 %v2360_v1, %s2192_s24  ;;  %v606_v12 = vadd.f32 %v1928_v3, %v1840_v49 }
 0x218   : > { %v597_v5 = vpop.f32.mrf.mxu1 }
 0x219   : > { %633 = vrot.lane.b32.xlu0 %v2362_v4, %s2192_s24  ;;  %v598_v8 = vadd.f32 %v1840_v49, %v597_v5 }
 0x21a   : > { %v1929_v6 = vpop.f32.mrf.mxu1 }
 0x21b   : > { %v609_v10 = vadd.f32 %v1929_v6, %v1840_v49 }
 0x21c   : > { %v600_v7 = vpop.f32.mrf.mxu1 }
 0x21d   : > { %v601_v9 = vadd.f32 %v1840_v49, %v600_v7  ;;  %v2369_v13 = vpack.c.bf16 %v609_v10, %v606_v12 }
 0x21f   : > { %v2366_v11 = vpack.c.bf16 %v601_v9, %v598_v8 }
 0x221   : > { %734 = vrot.lane.b32.xlu1 %v2366_v11, %s2192_s24 }
 0x225   : > { %784 = vrot.lane.b32.xlu1 %v2369_v13, %s2192_s24 }
 0x289   : > { %v685_v16 = vpop.permute.xlu1 %684 }
 0x28a   : > { %v690_v18 = vsel %vm635_vm2, %v685_v16, 0 }
 0x28b   : > { %v634_v14 = vpop.permute.xlu0 %633 }
 0x28c   : > { %v640_v15 = vsel %vm635_vm2, %v634_v14, 0 }
 0x28d   : > { %1931 = vmatpush3.bf16.xpose.msra.mxu1 %v640_v15 }
 0x28e   : > { %1936 = vmatprep.subr.bf16.mxu1 %v2190_v48 }
 0x293   : > { %v735_v17 = vpop.permute.xlu1 %734 }
 0x294   : > { %v740_v19 = vsel %vm635_vm2, %v735_v17, 0  ;;  %1933 = vmatmul.mubr.msk.bf16.vlgmr.msra.gmra.mxu1 %vm635_vm2, %v2362_v4 }
 0x295   : > { %1937 = vmatpush3.bf16.xpose.msra.mxu1 %v690_v18  ;;  %1943 = vmatpush3.bf16.xpose.msra.mxu0 %v740_v19 }
 0x296   : > { %1938 = vmatprep.mubr.msk.bf16.mxu1 %vm2191_vm1, %v2190_v48  ;;  %1948 = vmatprep.subr.bf16.mxu1 %v2190_v48 }
 0x297   : > { %1954 = vmatprep.subr.bf16.mxu0 %v2190_v48  ;;  %v785_v22 = vpop.permute.xlu1 %784 }
 0x298   : > { %v790_v23 = vsel %vm635_vm2, %v785_v22, 0 }
 0x29c   : > { %1939 = vmatmul.mubr.msk.bf16.vlgmr.msra.gmra.mxu1 %vm635_vm2, %v2360_v1  ;;  %1945 = vmatmul.mubr.msk.bf16.vlgmr.msra.gmra.mxu0 %vm635_vm2, %v2366_v11 }
 0x29d   : > { %1949 = vmatpush3.bf16.xpose.msra.mxu1 %v790_v23  ;;  %1950 = vmatprep.mubr.msk.bf16.mxu1 %vm2191_vm1, %v2190_v48 }
 0x29e   : > { %1960 = vmatprep.subr.bf16.mxu1 %v2190_v48  ;;  %1956 = vmatprep.mubr.msk.bf16.mxu0 %vm2191_vm1, %v2190_v48 }
 0x2a4   : > { %1951 = vmatmul.mubr.msk.bf16.vlgmr.msra.gmra.mxu1 %vm635_vm2, %v2369_v13 }
 0x2a5   : > { %1962 = vmatprep.mubr.msk.bf16.mxu1 %vm2191_vm1, %v2190_v48 }
 0x354   : > { %v676_v25 = vpop.f32.mrf.mxu1 }
 0x355   : > { %v677_v26 = vadd.f32 %v676_v25, %v612_v24 }
 0x356   : > { %v1934_v27 = vpop.f32.mrf.mxu1 }
 0x357   : > { %v833_v31 = vsel %vm635_vm2, %v677_v26, -inf }
 0x358   : > { %834 = vmax.xlane.f32.xlu0 %v833_v31  ;;  %v679_v32 = vpop.f32.mrf.mxu1 }
 0x359   : > { %v680_v33 = vadd.f32 %v679_v32, %v613_v30 }
 0x35a   : > { %v1935_v20 = vpop.f32.mrf.mxu1 }
 0x35b   : > { %v836_v35 = vsel %vm635_vm2, %v680_v33, -inf }
 0x35c   : > { %v776_v36 = vpop.f32.mrf.mxu0  ;;  %837 = vmax.xlane.f32.xlu1 %v836_v35  ;;  %v726_v37 = vpop.f32.mrf.mxu1 }
 0x35d   : > { %v727_v40 = vadd.f32 %v726_v37, %v616_v34  ;;  %v777_v38 = vadd.f32 %v776_v36, %v620_v21 }
 0x35e   : > { %v1940_v41 = vpop.f32.mrf.mxu1  ;;  %v1946_v28 = vpop.f32.mrf.mxu0 }
 0x35f   : > { %v839_v44 = vsel %vm635_vm2, %v727_v40, -inf  ;;  %v845_v58 = vsel %vm635_vm2, %v777_v38, -inf }
 0x360   : > { %v779_v45 = vpop.f32.mrf.mxu0  ;;  %840 = vmax.xlane.f32.xlu0 %v839_v44  ;;  %v729_v46 = vpop.f32.mrf.mxu1 }
 0x361   : > { %v780_v47 = vadd.f32 %v779_v45, %v621_v42  ;;  %v2417_v50 = vadd.f32 %v729_v46, %v617_v43 }
 0x362   : > { %v1941_v51 = vpop.f32.mrf.mxu1  ;;  %v1947_v29 = vpop.f32.mrf.mxu0 }
 0x363   : > { %v848_v52 = vsel %vm635_vm2, %v780_v47, -inf  ;;  %v842_v53 = vsel %vm635_vm2, %v2417_v50, -inf }
 0x364   : > { %849 = vmax.xlane.f32.xlu1 %v848_v52  ;;  %843 = vmax.xlane.f32.xlu0 %v842_v53  ;;  %v826_v55 = vpop.f32.mrf.mxu1 }
 0x365   : > { %v827_v39 = vadd.f32 %v826_v55, %v624_v54 }
 0x366   : > { %v1952_v56 = vpop.f32.mrf.mxu1 }
 0x367   : > { %v851_v61 = vsel %vm635_vm2, %v827_v39, -inf }
 0x368   : > { %846 = vmax.xlane.f32.xlu0 %v845_v58  ;;  %v829_v49 = vpop.f32.mrf.mxu1 }
 0x369   : > { %v2429_v59 = vadd.f32 %v829_v49, %v625_v57 }
 0x36a   : > { %v1953_v60 = vpop.f32.mrf.mxu1 }
 0x36b   : > { %v854_v62 = vsel %vm635_vm2, %v2429_v59, -inf }
 0x36c   : > { %852 = vmax.xlane.f32.xlu0 %v851_v61  ;;  %855 = vmax.xlane.f32.xlu1 %v854_v62 }
 0x3e1   : > { %v835_v63 = vpop.xlane.xlu0 %834 }
 0x3e2   : > { %v857_v0 = vsub.f32 %v677_v26, %v835_v63 }
 0x3e4   : > { %v865_v2 = vmul.f32 1.442695, %v857_v0 }
 0x3e5   : > { %v838_v3 = vpop.xlane.xlu1 %837 }
 0x3e6   : > { %2094 = vpow2.f32 %v865_v2  ;;  %v858_v5 = vsub.f32 %v680_v33, %v838_v3 }
 0x3e8   : > { %v867_v6 = vmul.f32 1.442695, %v858_v5 }
 0x3e9   : > { %v841_v7 = vpop.xlane.xlu0 %840 }
 0x3ea   : > { %2096 = vpow2.f32 %v867_v6  ;;  %v859_v12 = vsub.f32 %v727_v40, %v841_v7 }
 0x3ec   : > { %v869_v18 = vmul.f32 1.442695, %v859_v12 }
 0x3ed   : > { %v850_v8 = vpop.xlane.xlu1 %849  ;;  %v844_v9 = vpop.xlane.xlu0 %843 }
 0x3ee   : > { %v862_v10 = vsub.f32 %v780_v47, %v850_v8  ;;  %v860_v20 = vsub.f32 %v2417_v50, %v844_v9 }
 0x3f0   : > { %v875_v14 = vmul.f32 1.442695, %v862_v10  ;;  %v871_v35 = vmul.f32 1.442695, %v860_v20 }
 0x3f1   : > { %v847_v15 = vpop.xlane.xlu0 %846 }
 0x3f2   : > { %2098 = vpow2.f32 %v875_v14  ;;  %v861_v16 = vsub.f32 %v777_v38, %v847_v15 }
 0x3f3   : > { %v2434_v17 = vpop.eup %2094 }
 0x3f4   : > { %v873_v19 = vmul.f32 1.442695, %v861_v16  ;;  %v881_v22 = vsel %vm635_vm2, %v2434_v17, 0.0 }
 0x3f5   : > { %882 = vadd.xlane.f32.xlu0 %v881_v22  ;;  %v853_v33 = vpop.xlane.xlu0 %852  ;;  %v856_v42 = vpop.xlane.xlu1 %855 }
 0x3f6   : > { %2100 = vpow2.f32 %v873_v19  ;;  %v863_v34 = vsub.f32 %v827_v39, %v853_v33  ;;  %v864_v43 = vsub.f32 %v2429_v59, %v856_v42  ;;  %v614_v42 = vld [vmem:[%s2684_s5 + $0x10] sm:$0xff] }
 0x3f7   : > { %v2097_v23 = vpop.eup %2096  ;;  %2102 = vpow2.f32 %v869_v18 }
 0x3f8   : > { %v884_v24 = vsel %vm635_vm2, %v2097_v23, 0.0  ;;  %v877_v36 = vmul.f32 1.442695, %v863_v34  ;;  %2104 = vpow2.f32 %v871_v35  ;;  %v879_v44 = vmul.f32 1.442695, %v864_v43 }
 0x3f9   : > { %885 = vadd.xlane.f32.xlu1 %v884_v24 }
 0x3fa   : > { %2106 = vpow2.f32 %v877_v36 }
 0x3fb   : > { %2108 = vpow2.f32 %v879_v44 }
 0x3ff   : > { %v2439_v25 = vpop.eup %2098 }
 0x400   : > { %v896_v26 = vsel %vm635_vm2, %v2439_v25, 0.0 }
 0x401   : > { %897 = vadd.xlane.f32.xlu1 %v896_v26 }
 0x403   : > { %v2443_v27 = vpop.eup %2100 }
 0x404   : > { %v893_v30 = vsel %vm635_vm2, %v2443_v27, 0.0  ;;  %v2447_v31 = vpop.eup %2102 }
 0x405   : > { %894 = vadd.xlane.f32.xlu0 %v893_v30  ;;  %v887_v32 = vsel %vm635_vm2, %v2447_v31, 0.0  ;;  %v2456_v37 = vpop.eup %2104 }
 0x406   : > { %v890_v28 = vsel %vm635_vm2, %v2456_v37, 0.0 }
 0x407   : > { %v2458_v40 = vpop.eup %2106 }
 0x408   : > { %v899_v41 = vsel %vm635_vm2, %v2458_v40, 0.0  ;;  %v2470_v21 = vpop.eup %2108 }
 0x409   : > { %888 = vadd.xlane.f32.xlu0 %v887_v32  ;;  %v902_v45 = vsel %vm635_vm2, %v2470_v21, 0.0 }
 0x412   : > { %972 = vrot.lane.b32.xlu1 %v2360_v1, %s2193_s25 }
 0x416   : > { %1019 = vrot.lane.b32.xlu1 %v2366_v11, %s2193_s25 }
 0x41a   : > { %1066 = vrot.lane.b32.xlu1 %v2369_v13, %s2193_s25 }
 0x41f   : > { %925 = vrot.lane.b32.xlu0 %v2362_v4, %s2193_s25 }
 0x43e   : > { %900 = vadd.xlane.f32.xlu0 %v899_v41  ;;  %891 = vadd.xlane.f32.xlu1 %v890_v28 }
 0x44f   : > { %1170 = vrot.lane.b32.xlu1 %v2360_v1, %s2194_s26 }
 0x454   : > { %1119 = vrot.lane.b32.xlu0 %v2362_v4, %s2194_s26 }
 0x458   : > { %1117 = vrot.lane.b32.xlu0 %v2362_v4, %s2195_s27 }
 0x45c   : > { %1168 = vrot.lane.b32.xlu0 %v2360_v1, %s2195_s27 }
 0x460   : > { %1219 = vrot.lane.b32.xlu0 %v2366_v11, %s2195_s27 }
 0x473   : > { %903 = vadd.xlane.f32.xlu1 %v902_v45  ;;  %v615_v45 = vld [vmem:[%s2684_s5 + $0x18] sm:$0xff] }
 0x47e   : > { %v883_v47 = vpop.xlane.xlu0 %882 }
 0x482   : > { %v886_v46 = vpop.xlane.xlu1 %885 }
 0x483   : > { %2110 = vrcp.f32 %v886_v46 }
 0x484   : > { %1221 = vrot.lane.b32.xlu1 %v2366_v11, %s2194_s26  ;;  %2112 = vrcp.f32 %v883_v47 }
 0x488   : > { %1272 = vrot.lane.b32.xlu1 %v2369_v13, %s2194_s26 }
 0x48a   : > { %v898_v50 = vpop.xlane.xlu1 %897 }
 0x48b   : > { %2114 = vrcp.f32 %v898_v50 }
 0x48c   : > { %1270 = vrot.lane.b32.xlu1 %v2369_v13, %s2195_s27 }
 0x48e   : > { %v895_v51 = vpop.xlane.xlu0 %894  ;;  %v973_v29 = vpop.permute.xlu1 %972 }
 0x48f   : > { %2116 = vrcp.f32 %v895_v51  ;;  %1961 = vmatpush3.bf16.msra.mxu1 %v973_v29 }
 0x490   : > { %1972 = vmatprep.subr.bf16.mxu1 %v2190_v48  ;;  %v2111_v38 = vpop.eup %2110 }
 0x491   : > { %v2113_v53 = vpop.eup %2112  ;;  %v914_v54 = vmul.f32 %v2111_v38, %v2097_v23 }
 0x492   : > { %v889_v52 = vpop.xlane.xlu0 %888  ;;  %v913_v56 = vmul.f32 %v2113_v53, %v2434_v17  ;;  %v1020_v58 = vpop.permute.xlu1 %1019 }
 0x493   : > { %2118 = vrcp.f32 %v889_v52 }
 0x494   : > { %v921_v57 = vpack.c.bf16 %v914_v54, %v913_v56 }
 0x496   : > { %v926_v55 = vpop.permute.xlu0 %925  ;;  %v1067_v62 = vpop.permute.xlu1 %1066 }
 0x497   : > { %1955 = vmatpush3.bf16.msra.mxu0 %v926_v55 }
 0x498   : > { %1966 = vmatprep.subr.bf16.mxu0 %v2190_v48  ;;  %v2115_v39 = vpop.eup %2114 }
 0x499   : > { %v918_v60 = vmul.f32 %v2115_v39, %v2439_v25  ;;  %v623_v39 = vld [vmem:[%s2684_s5 + $0x58] sm:$0xff] }
 0x49a   : > { %1957 = vmatmul.mubr.msk.bf16.vlgmr.msra.gmra.mxu0 %vm635_vm2, %v921_v57 }
 0x49b   : > { %1967 = vmatpush3.bf16.msra.mxu0 %v1020_v58  ;;  %1968 = vmatprep.mubr.msk.bf16.mxu0 %vm2191_vm1, %v2190_v48 }
 0x49c   : > { %v2117_v49 = vpop.eup %2116  ;;  %1978 = vmatprep.subr.bf16.mxu0 %v2190_v48 }
 0x49d   : > { %v917_v59 = vmul.f32 %v2117_v49, %v2443_v27 }
 0x49f   : > { %v923_v61 = vpack.c.bf16 %v918_v60, %v917_v59 }
 0x4a0   : > { %v2119_v6 = vpop.eup %2118 }
 0x4a1   : > { %v915_v8 = vmul.f32 %v2119_v6, %v2447_v31 }
 0x4a2   : > { %1969 = vmatmul.mubr.msk.bf16.vlgmr.msra.gmra.mxu0 %vm635_vm2, %v923_v61 }
 0x4a3   : > { %1980 = vmatprep.mubr.msk.bf16.mxu0 %vm2191_vm1, %v2190_v48 }
 0x4c7   : > { %v901_v63 = vpop.xlane.xlu0 %900  ;;  %v892_v0 = vpop.xlane.xlu1 %891 }
 0x4c8   : > { %2120 = vrcp.f32 %v892_v0 }
 0x4c9   : > { %2122 = vrcp.f32 %v901_v63 }
 0x4cb   : > { %v1120_v2 = vpop.permute.xlu0 %1119  ;;  %v1171_v12 = vpop.permute.xlu1 %1170 }
 0x4cc   : > { %v1125_v3 = vsel %vm635_vm2, %v1120_v2, 0  ;;  %v1176_v26 = vsel %vm635_vm2, %v1171_v12, 0 }
 0x4cd   : > { %1979 = vmatpush3.bf16.xpose.msra.mxu0 %v1125_v3  ;;  %v618_v3 = vld [vmem:[%s2684_s5 + $0x30] sm:$0xff] }
 0x4ce   : > { %1990 = vmatprep.subr.bf16.mxu0 %v2190_v48 }
 0x4cf   : > { %v1118_v5 = vpop.permute.xlu0 %1117 }
 0x4d3   : > { %v1169_v17 = vpop.permute.xlu0 %1168 }
 0x4d4   : > { %1981 = vmatmul.mubr.msk.bf16.vlgmr.msra.gmra.mxu0 %vm635_vm2, %v1118_v5 }
 0x4d5   : > { %1992 = vmatprep.mubr.msk.bf16.mxu0 %vm2191_vm1, %v2190_v48  ;;  %v2121_v7 = vpop.eup %2120 }
 0x4d6   : > { %v916_v9 = vmul.f32 %v2121_v7, %v2456_v37  ;;  %v2123_v18 = vpop.eup %2122 }
 0x4d7   : > { %v1220_v19 = vpop.permute.xlu0 %1219  ;;  %v919_v23 = vmul.f32 %v2123_v18, %v2458_v40  ;;  %v626_v18 = vld [vmem:[%s2684_s5 + $0x70] sm:$0xff] }
 0x4d8   : > { %v922_v10 = vpack.c.bf16 %v916_v9, %v915_v8  ;;  %v619_v8 = vld [vmem:[%s2684_s5 + $0x38] sm:$0xff] }
 0x4da   : > { %1963 = vmatmul.mubr.msk.bf16.vlgmr.msra.gmra.mxu1 %vm635_vm2, %v922_v10  ;;  %v622_v10 = vld [vmem:[%s2684_s5 + $0x50] sm:$0xff] }
 0x4db   : > { %1973 = vmatpush3.bf16.msra.mxu1 %v1067_v62  ;;  %1974 = vmatprep.mubr.msk.bf16.mxu1 %vm2191_vm1, %v2190_v48 }
 0x4dc   : > { %1984 = vmatprep.subr.bf16.mxu1 %v2190_v48 }
 0x4fc   : > { %v904_v14 = vpop.xlane.xlu1 %903 }
 0x4fd   : > { %2124 = vrcp.f32 %v904_v14 }
 0x500   : > { %v1222_v15 = vpop.permute.xlu1 %1221 }
 0x501   : > { %v1227_v16 = vsel %vm635_vm2, %v1222_v15, 0 }
 0x502   : > { %1991 = vmatpush3.bf16.xpose.msra.mxu0 %v1227_v16 }
 0x503   : > { %2002 = vmatprep.subr.bf16.mxu0 %v2190_v48 }
 0x504   : > { %v1273_v27 = vpop.permute.xlu1 %1272 }
 0x505   : > { %v1278_v30 = vsel %vm635_vm2, %v1273_v27, 0 }
 0x508   : > { %v1271_v31 = vpop.permute.xlu1 %1270 }
 0x509   : > { %1993 = vmatmul.mubr.msk.bf16.vlgmr.msra.gmra.mxu0 %vm635_vm2, %v1220_v19 }
 0x50a   : > { %v2125_v22 = vpop.eup %2124  ;;  %2004 = vmatprep.mubr.msk.bf16.mxu0 %vm2191_vm1, %v2190_v48 }
 0x50b   : > { %v920_v24 = vmul.f32 %v2125_v22, %v2470_v21 }
 0x50d   : > { %v924_v25 = vpack.c.bf16 %v920_v24, %v919_v23  ;;  %v627_v23 = vld [vmem:[%s2684_s5 + $0x78] sm:$0xff] }
 0x50f   : > { %1975 = vmatmul.mubr.msk.bf16.vlgmr.msra.gmra.mxu1 %vm635_vm2, %v924_v25 }
 0x510   : > { %1985 = vmatpush3.bf16.xpose.msra.mxu1 %v1176_v26  ;;  %1986 = vmatprep.mubr.msk.bf16.mxu1 %vm2191_vm1, %v2190_v48 }
 0x511   : > { %1996 = vmatprep.subr.bf16.mxu1 %v2190_v48 }
 0x517   : > { %1987 = vmatmul.mubr.msk.bf16.vlgmr.msra.gmra.mxu1 %vm635_vm2, %v1169_v17 }
 0x518   : > { %1997 = vmatpush3.bf16.xpose.msra.mxu1 %v1278_v30  ;;  %1998 = vmatprep.mubr.msk.bf16.mxu1 %vm2191_vm1, %v2190_v48 }
 0x519   : > { %2008 = vmatprep.subr.bf16.mxu1 %v2190_v48 }
 0x51f   : > { %1999 = vmatmul.mubr.msk.bf16.vlgmr.msra.gmra.mxu1 %vm635_vm2, %v1271_v31 }
 0x520   : > { %2010 = vmatprep.mubr.msk.bf16.mxu1 %vm2191_vm1, %v2190_v48 }
 0x55a   : > { %v2520_v32 = vpop.f32.mrf.mxu0 }
 0x55c   : > { %v1958_v33 = vpop.f32.mrf.mxu0 }
 0x55e   : > { %v2522_v20 = vpop.f32.mrf.mxu0 }
 0x55f   : > { %v1113_v34 = vpack.c.bf16 %v2522_v20, %v2520_v32 }
 0x560   : > { %v1959_v35 = vpop.f32.mrf.mxu0 }
 0x562   : > { %v2526_v36 = vpop.f32.mrf.mxu0 }
 0x564   : > { %v1970_v37 = vpop.f32.mrf.mxu0 }
 0x566   : > { %v2528_v40 = vpop.f32.mrf.mxu0 }
 0x567   : > { %v1115_v41 = vpack.c.bf16 %v2528_v40, %v2526_v36 }
 0x568   : > { %v1971_v28 = vpop.f32.mrf.mxu0 }
 0x594   : > { %v1161_v43 = vpop.f32.mrf.mxu0 }
 0x595   : > { %v1162_v44 = vadd.f32 %v1161_v43, %v614_v42 }
 0x596   : > { %v1982_v21 = vpop.f32.mrf.mxu0 }
 0x597   : > { %v1321_v46 = vsel %vm635_vm2, %v1162_v44, -inf }
 0x598   : > { %1322 = vmax.xlane.f32.xlu0 %v1321_v46  ;;  %v1164_v47 = vpop.f32.mrf.mxu0 }
 0x599   : > { %v1165_v50 = vadd.f32 %v1164_v47, %v615_v45 }
 0x59a   : > { %v1983_v51 = vpop.f32.mrf.mxu0  ;;  %v2539_v29 = vpop.f32.mrf.mxu1 }
 0x59b   : > { %v1324_v38 = vsel %vm635_vm2, %v1165_v50, -inf }
 0x59c   : > { %1325 = vmax.xlane.f32.xlu1 %v1324_v38  ;;  %v1964_v52 = vpop.f32.mrf.mxu1 }
 0x59e   : > { %v2542_v53 = vpop.f32.mrf.mxu1 }
 0x59f   : > { %v1114_v54 = vpack.c.bf16 %v2542_v53, %v2539_v29  ;;  %v1863_v29 = vld [vmem:[%s2686_s7] ss:$0 sm:$0xff] }
 0x5a0   : > { %v1965_v55 = vpop.f32.mrf.mxu1 }
 0x5c9   : > { %v1263_v56 = vpop.f32.mrf.mxu0 }
 0x5ca   : > { %v1264_v16 = vadd.f32 %v1263_v56, %v622_v10 }
 0x5cb   : > { %v1994_v57 = vpop.f32.mrf.mxu0 }
 0x5cc   : > { %v1333_v25 = vsel %vm635_vm2, %v1264_v16, -inf }
 0x5cd   : > { %v1266_v58 = vpop.f32.mrf.mxu0 }
 0x5ce   : > { %v1267_v49 = vadd.f32 %v1266_v58, %v623_v39 }
 0x5cf   : > { %v2549_v59 = vpop.f32.mrf.mxu1  ;;  %v1995_v60 = vpop.f32.mrf.mxu0 }
 0x5d0   : > { %v1336_v61 = vsel %vm635_vm2, %v1267_v49, -inf }
 0x5d1   : > { %1337 = vmax.xlane.f32.xlu1 %v1336_v61  ;;  %v1976_v62 = vpop.f32.mrf.mxu1 }
 0x5d3   : > { %v2552_v63 = vpop.f32.mrf.mxu1 }
 0x5d4   : > { %v1116_v0 = vpack.c.bf16 %v2552_v63, %v2549_v59  ;;  %v2158_v59 = vld [vmem:[%s2269_s13] sm:$0xff] }
 0x5d5   : > { %v1977_v2 = vpop.f32.mrf.mxu1 }
 0x5d7   : > { %v1212_v5 = vpop.f32.mrf.mxu1 }
 0x5d8   : > { %v1213_v6 = vadd.f32 %v1212_v5, %v618_v3 }
 0x5d9   : > { %v1988_v7 = vpop.f32.mrf.mxu1 }
 0x5da   : > { %v1327_v9 = vsel %vm635_vm2, %v1213_v6, -inf }
 0x5db   : > { %1328 = vmax.xlane.f32.xlu0 %v1327_v9  ;;  %v1215_v12 = vpop.f32.mrf.mxu1 }
 0x5dc   : > { %v1216_v14 = vadd.f32 %v1215_v12, %v619_v8 }
 0x5dd   : > { %v1989_v15 = vpop.f32.mrf.mxu1 }
 0x5de   : > { %v1330_v17 = vsel %vm635_vm2, %v1216_v14, -inf }
 0x5df   : > { %1331 = vmax.xlane.f32.xlu0 %v1330_v17  ;;  %v1314_v19 = vpop.f32.mrf.mxu1 }
 0x5e0   : > { %v1315_v24 = vadd.f32 %v1314_v19, %v626_v18 }
 0x5e1   : > { %v2000_v22 = vpop.f32.mrf.mxu1 }
 0x5e2   : > { %v1339_v31 = vsel %vm635_vm2, %v1315_v24, -inf }
 0x5e3   : > { %1334 = vmax.xlane.f32.xlu0 %v1333_v25  ;;  %v1317_v26 = vpop.f32.mrf.mxu1 }
 0x5e4   : > { %v1318_v27 = vadd.f32 %v1317_v26, %v627_v23 }
 0x5e5   : > { %v2001_v30 = vpop.f32.mrf.mxu1 }
 0x5e6   : > { %v1342_v33 = vsel %vm635_vm2, %v1318_v27, -inf }
 0x5e7   : > { %1340 = vmax.xlane.f32.xlu0 %v1339_v31  ;;  %1343 = vmax.xlane.f32.xlu1 %v1342_v33 }
 0x621   : > { %v1323_v35 = vpop.xlane.xlu0 %1322 }
 0x622   : > { %v1345_v37 = vsub.f32 %v1162_v44, %v1323_v35 }
 0x624   : > { %v1353_v28 = vmul.f32 1.442695, %v1345_v37 }
 0x625   : > { %v1326_v42 = vpop.xlane.xlu1 %1325 }
 0x626   : > { %2126 = vpow2.f32 %v1353_v28  ;;  %v1346_v43 = vsub.f32 %v1165_v50, %v1326_v42 }
 0x628   : > { %v1355_v21 = vmul.f32 1.442695, %v1346_v43 }
 0x62a   : > { %2128 = vpow2.f32 %v1355_v21 }
 0x633   : > { %v2576_v45 = vpop.eup %2126 }
 0x634   : > { %v1369_v46 = vsel %vm635_vm2, %v2576_v45, 0.0 }
 0x635   : > { %1370 = vadd.xlane.f32.xlu0 %v1369_v46 }
 0x637   : > { %v2580_v47 = vpop.eup %2128 }
 0x638   : > { %v1372_v51 = vsel %vm635_vm2, %v2580_v47, 0.0 }
 0x639   : > { %1373 = vadd.xlane.f32.xlu1 %v1372_v51 }
 0x65a   : > { %v1338_v38 = vpop.xlane.xlu1 %1337 }
 0x65b   : > { %v1350_v55 = vsub.f32 %v1267_v49, %v1338_v38 }
 0x65d   : > { %v1363_v39 = vmul.f32 1.442695, %v1350_v55 }
 0x664   : > { %v1329_v44 = vpop.xlane.xlu0 %1328 }
 0x665   : > { %v1347_v52 = vsub.f32 %v1213_v6, %v1329_v44 }
 0x667   : > { %v1357_v56 = vmul.f32 1.442695, %v1347_v52 }
 0x668   : > { %v1332_v50 = vpop.xlane.xlu0 %1331 }
 0x669   : > { %2130 = vpow2.f32 %v1357_v56  ;;  %v1348_v57 = vsub.f32 %v1216_v14, %v1332_v50 }
 0x66b   : > { %v1359_v58 = vmul.f32 1.442695, %v1348_v57 }
 0x66c   : > { %v1335_v60 = vpop.xlane.xlu0 %1334 }
 0x66d   : > { %2132 = vpow2.f32 %v1359_v58  ;;  %v1349_v61 = vsub.f32 %v1264_v16, %v1335_v60 }
 0x66e   : > { %2134 = vpow2.f32 %v1363_v39 }
 0x66f   : > { %v1361_v62 = vmul.f32 1.442695, %v1349_v61 }
 0x670   : > { %v1341_v2 = vpop.xlane.xlu0 %1340  ;;  %v1344_v17 = vpop.xlane.xlu1 %1343 }
 0x671   : > { %2136 = vpow2.f32 %v1361_v62  ;;  %v1351_v3 = vsub.f32 %v1315_v24, %v1341_v2  ;;  %v1352_v18 = vsub.f32 %v1318_v27, %v1344_v17  ;;  %v2077_v62 = vld [vmem:[%s2685_s6] sm:$0xff]  }
 0x673   : > { %v1365_v5 = vmul.f32 1.442695, %v1351_v3  ;;  %v1367_v19 = vmul.f32 1.442695, %v1352_v18 }
 0x675   : > { %2138 = vpow2.f32 %v1365_v5 }
 0x676   : > { %v2131_v7 = vpop.eup %2130  ;;  %2140 = vpow2.f32 %v1367_v19 }
 0x677   : > { %v1375_v6 = vsel %vm635_vm2, %v2131_v7, 0.0 }
 0x678   : > { %1376 = vadd.xlane.f32.xlu0 %v1375_v6 }
 0x67a   : > { %v2133_v49 = vpop.eup %2132 }
 0x67b   : > { %v1378_v8 = vsel %vm635_vm2, %v2133_v49, 0.0  ;;  %v2135_v9 = vpop.eup %2134 }
 0x67c   : > { %1379 = vadd.xlane.f32.xlu1 %v1378_v8  ;;  %v1384_v14 = vsel %vm635_vm2, %v2135_v9, 0.0 }
 0x67e   : > { %v2137_v10 = vpop.eup %2136 }
 0x67f   : > { %v1381_v12 = vsel %vm635_vm2, %v2137_v10, 0.0 }
 0x680   : > { %1382 = vadd.xlane.f32.xlu0 %v1381_v12  ;;  %1385 = vadd.xlane.f32.xlu1 %v1384_v14 }
 0x682   : > { %v2588_v15 = vpop.eup %2138 }
 0x683   : > { %v1387_v16 = vsel %vm635_vm2, %v2588_v15, 0.0  ;;  %v2141_v22 = vpop.eup %2140 }
 0x684   : > { %1388 = vadd.xlane.f32.xlu0 %v1387_v16  ;;  %v1390_v23 = vsel %vm635_vm2, %v2141_v22, 0.0 }
 0x691   : > { %1460 = vrot.lane.b32.xlu1 %v2360_v1, %s2196_s11 }
 0x695   : > { %1507 = vrot.lane.b32.xlu1 %v2366_v11, %s2196_s11 }
 0x69a   : > { %1413 = vrot.lane.b32.xlu0 %v2362_v4, %s2196_s11 }
 0x6b9   : > { %1391 = vadd.xlane.f32.xlu1 %v1390_v23 }
 0x6be   : > { %v1371_v25 = vpop.xlane.xlu0 %1370 }
 0x6c2   : > { %v1374_v24 = vpop.xlane.xlu1 %1373 }
 0x6c3   : > { %2142 = vrcp.f32 %v1374_v24 }
 0x6c4   : > { %2144 = vrcp.f32 %v1371_v25 }
 0x6ca   : > { %1554 = vrot.lane.b32.xlu1 %v2369_v13, %s2196_s11 }
 0x6d0   : > { %v2143_v27 = vpop.eup %2142 }
 0x6d1   : > { %v2145_v33 = vpop.eup %2144  ;;  %v1402_v35 = vmul.f32 %v2143_v27, %v2580_v47 }
 0x6d2   : > { %v1401_v28 = vmul.f32 %v2145_v33, %v2576_v45 }
 0x6d4   : > { %v1409_v43 = vpack.c.bf16 %v1402_v35, %v1401_v28  ;;  %v2161_v28 = vld [vmem:[%s2269_s13 + $0x18] sm:$0xff] }
 0x701   : > { %v1377_v26 = vpop.xlane.xlu0 %1376 }
 0x702   : > { %2146 = vrcp.f32 %v1377_v26 }
 0x705   : > { %v1380_v1 = vpop.xlane.xlu1 %1379 }
 0x706   : > { %2148 = vrcp.f32 %v1380_v1 }
 0x709   : > { %v1383_v11 = vpop.xlane.xlu0 %1382  ;;  %v1386_v4 = vpop.xlane.xlu1 %1385 }
 0x70a   : > { %2150 = vrcp.f32 %v1383_v11 }
 0x70b   : > { %2152 = vrcp.f32 %v1386_v4 }
 0x70d   : > { %v1389_v30 = vpop.xlane.xlu0 %1388  ;;  %v1461_v31 = vpop.permute.xlu1 %1460 }
 0x70e   : > { %2009 = vmatpush3.bf16.msra.mxu1 %v1461_v31  ;;  %2154 = vrcp.f32 %v1389_v30 }
 0x70f   : > { %2020 = vmatprep.subr.bf16.mxu1 %v2190_v48  ;;  %v2147_v13 = vpop.eup %2146 }
 0x710   : > { %v1403_v21 = vmul.f32 %v2147_v13, %v2131_v7  ;;  %v2160_v13 = vld [vmem:[%s2269_s13 + $0x8] sm:$0xff] }
 0x711   : > { %v1414_v37 = vpop.permute.xlu0 %1413  ;;  %v1508_v51 = vpop.permute.xlu1 %1507 }
 0x712   : > { %2003 = vmatpush3.bf16.msra.mxu0 %v1414_v37 }
 0x713   : > { %v2149_v42 = vpop.eup %2148  ;;  %2014 = vmatprep.subr.bf16.mxu0 %v2190_v48 }
 0x714   : > { %v1404_v46 = vmul.f32 %v2149_v42, %v2133_v49 }
 0x715   : > { %2005 = vmatmul.mubr.msk.bf16.vlgmr.msra.gmra.mxu0 %vm635_vm2, %v1409_v43 }
 0x716   : > { %2015 = vmatpush3.bf16.msra.mxu0 %v1508_v51  ;;  %v1410_v38 = vpack.c.bf16 %v1404_v46, %v1403_v21  ;;  %2016 = vmatprep.mubr.msk.bf16.mxu0 %vm2191_vm1, %v2190_v48 }
 0x717   : > { %v2151_v47 = vpop.eup %2150 }
 0x718   : > { %v2153_v44 = vpop.eup %2152  ;;  %2011 = vmatmul.mubr.msk.bf16.vlgmr.msra.gmra.mxu1 %vm635_vm2, %v1410_v38  ;;  %v1405_v45 = vmul.f32 %v2151_v47, %v2137_v10  ;;  %v2162_v47 = vld [vmem:[%s2269_s13 + $0x20] sm:$0xff] }
 0x719   : > { %v1406_v52 = vmul.f32 %v2153_v44, %v2135_v9  ;;  %2022 = vmatprep.mubr.msk.bf16.mxu1 %vm2191_vm1, %v2190_v48  ;;  %v2076_v48 = vld [vmem:[%s2685_s6 + $0x8] sm:$0xff]  }
 0x71a   : > { %2026 = vmatprep.subr.bf16.mxu0 %v2076_v48 }
 0x71b   : > { %v1411_v55 = vpack.c.bf16 %v1406_v52, %v1405_v45  ;;  %v2155_v57 = vpop.eup %2154  ;;  %v2163_v45 = vld [vmem:[%s2269_s13 + $0x30] sm:$0xff] }
 0x71c   : > { %v1407_v58 = vmul.f32 %v2155_v57, %v2588_v15  ;;  %v2164_v57 = vld [vmem:[%s2269_s13 + $0x28] sm:$0xff] }
 0x71d   : > { %2017 = vmatmul.mubr.msk.bf16.vlgmr.msra.gmra.mxu0 %vm635_vm2, %v1411_v55 }
 0x71e   : > { %2027 = vmatpush3.bf16.msra.mxu0 %v2076_v48 }
 0x71f   : > { %2028 = vmatprep.subr.bf16.mxu0 %v2077_v62 }
 0x722   : > { %2029 = vmatpush3.bf16.msra.mxu0 %v2077_v62 }
 0x742   : > { %v1392_v56 = vpop.xlane.xlu1 %1391 }
 0x743   : > { %2156 = vrcp.f32 %v1392_v56 }
 0x746   : > { %v1555_v50 = vpop.permute.xlu1 %1554 }
 0x747   : > { %2021 = vmatpush3.bf16.msra.mxu1 %v1555_v50 }
 0x750   : > { %v2157_v39 = vpop.eup %2156 }
 0x751   : > { %v1408_v60 = vmul.f32 %v2157_v39, %v2141_v22 }
 0x753   : > { %v1412_v61 = vpack.c.bf16 %v1408_v60, %v1407_v58  ;;  %v2165_v58 = vld [vmem:[%s2269_s13 + $0x38] sm:$0xff] }
 0x755   : > { %2023 = vmatmul.mubr.msk.bf16.vlgmr.msra.gmra.mxu1 %vm635_vm2, %v1412_v61 }
 0x7d5   : > { %v1453_v2 = vpop.f32.mrf.mxu0 }
 0x7d7   : > { %v2006_v3 = vpop.f32.mrf.mxu0 }
 0x7d8   : > { %v1500_v5 = vpop.f32.mrf.mxu1 }
 0x7d9   : > { %v1456_v7 = vpop.f32.mrf.mxu0 }
 0x7da   : > { %v1601_v6 = vpack.c.bf16 %v1456_v7, %v1453_v2  ;;  %v2012_v49 = vpop.f32.mrf.mxu1 }
 0x7db   : > { %v2007_v8 = vpop.f32.mrf.mxu0 }
 0x7dc   : > { %1609 = vrot.lane.b32.xlu0 %v1601_v6, %s2197_s17  ;;  %v1503_v9 = vpop.f32.mrf.mxu1 }
 0x7dd   : > { %v1602_v10 = vpack.c.bf16 %v1503_v9, %v1500_v5  ;;  %v1547_v12 = vpop.f32.mrf.mxu0 }
 0x7de   : > { %v2013_v14 = vpop.f32.mrf.mxu1 }
 0x7df   : > { %v2018_v15 = vpop.f32.mrf.mxu0  ;;  %1611 = vrot.lane.b32.xlu1 %v1602_v10, %s2197_s17 }
 0x7e1   : > { %v1550_v16 = vpop.f32.mrf.mxu0 }
 0x7e2   : > { %v1603_v17 = vpack.c.bf16 %v1550_v16, %v1547_v12 }
 0x7e3   : > { %v2019_v18 = vpop.f32.mrf.mxu0 }
 0x7e4   : > { %1613 = vrot.lane.b32.xlu0 %v1603_v17, %s2197_s17 }
 0x815   : > { %v1594_v19 = vpop.f32.mrf.mxu1 }
 0x817   : > { %v2024_v22 = vpop.f32.mrf.mxu1 }
 0x819   : > { %v1597_v23 = vpop.f32.mrf.mxu1 }
 0x81a   : > { %v1604_v24 = vpack.c.bf16 %v1597_v23, %v1594_v19 }
 0x81b   : > { %v2025_v25 = vpop.f32.mrf.mxu1 }
 0x81c   : > { %1615 = vrot.lane.b32.xlu1 %v1604_v24, %s2197_s17 }
 0x84e   : > { %v1610_v26 = vpop.permute.xlu0 %1609 }
 0x84f   : > { %v1619_v1 = vsel %vm635_vm2, %v1113_v34, %v1610_v26 }
 0x850   : > { %2030 = vmatprep.mubr.msk.bf16.mxu0 %vm374_vm0, %v1619_v1 }
 0x851   : > { %v1612_v11 = vpop.permute.xlu1 %1611 }
 0x852   : > { %v1622_v4 = vsel %vm635_vm2, %v1114_v54, %v1612_v11 }
 0x853   : > { %2031 = vmatmul.mubr.msk.bf16.vlgmr.msra.gmra.mxu0 %vm374_vm0, %v1622_v4 }
 0x856   : > { %v1614_v27 = vpop.permute.xlu0 %1613 }
 0x857   : > { %v1625_v32 = vsel %vm635_vm2, %v1115_v41, %v1614_v27 }
 0x858   : > { %2034 = vmatprep.mubr.msk.bf16.mxu0 %vm374_vm0, %v1625_v32 }
 0x88e   : > { %v1616_v20 = vpop.permute.xlu1 %1615 }
 0x88f   : > { %v1628_v34 = vsel %vm635_vm2, %v1116_v0, %v1616_v20  ;;  %v2159_v0 = vld [vmem:[%s2269_s13 + $0x10] sm:$0xff] }
 0x890   : > { %2035 = vmatmul.mubr.msk.bf16.gmra.mxu0 %vm374_vm0, %v1628_v34 }
 0x913   : > { %v2032_v53 = vpop.f32.mrf.mxu0 }
 0x914   : > { %v1703_v54 = vadd.f32 %v2032_v53, %v1863_v29 }
 0x915   : > { %v1694_v36 = vpop.f32.mrf.mxu0 }
 0x916   : > { %v1695_v40 = vadd.f32 %v1863_v29, %v1694_v36  ;;  %v1727_v30 = vadd.f32 %v2159_v0, %v1703_v54 }
 0x917   : > { %v2033_v41 = vpop.f32.mrf.mxu0 }
 0x918   : > { %v1725_v63 = vadd.f32 %v2158_v59, %v1695_v40  ;;  %v1706_v31 = vadd.f32 %v2033_v41, %v1863_v29  ;;  %1735 = vst.msk [vmem:[%s2644_s22 + $0x10] sm:$0xff] %vm374_vm0, %v1727_v30 }
 0x919   : > { %v1697_v33 = vpop.f32.mrf.mxu0 }
 0x91a   : > { %1733 = vst.msk [vmem:[%s2644_s22] sm:$0xff] %vm374_vm0, %v1725_v63  ;;  %v1698_v35 = vadd.f32 %v1863_v29, %v1697_v33  ;;  %v1728_v42 = vadd.f32 %v2161_v28, %v1706_v31 }
 0x91c   : > { %v1726_v37 = vadd.f32 %v2160_v13, %v1698_v35  ;;  %1736 = vst.msk [vmem:[%s2644_s22 + $0x18] sm:$0xff] %vm374_vm0, %v1728_v42 }
 0x91e   : > { %1734 = vst.msk [vmem:[%s2644_s22 + $0x8] sm:$0xff] %vm374_vm0, %v1726_v37 }
 0x950   : > { %v2036_v43 = vpop.f32.mrf.mxu0 }
 0x951   : > { %v1719_v21 = vadd.f32 %v2036_v43, %v1863_v29 }
 0x952   : > { %v1710_v46 = vpop.f32.mrf.mxu0 }
 0x953   : > { %v1711_v51 = vadd.f32 %v1863_v29, %v1710_v46  ;;  %v1731_v52 = vadd.f32 %v2163_v45, %v1719_v21 }
 0x954   : > { %v2037_v38 = vpop.f32.mrf.mxu0 }
 0x955   : > { %v1729_v44 = vadd.f32 %v2162_v47, %v1711_v51  ;;  %v1722_v55 = vadd.f32 %v2037_v38, %v1863_v29  ;;  %1739 = vst.msk [vmem:[%s2644_s22 + $0x30] sm:$0xff] %vm374_vm0, %v1731_v52 }
 0x956   : > { %v1713_v56 = vpop.f32.mrf.mxu0 }
 0x957   : > { %1737 = vst.msk [vmem:[%s2644_s22 + $0x20] sm:$0xff] %vm374_vm0, %v1729_v44  ;;  %v1714_v50 = vadd.f32 %v1863_v29, %v1713_v56  ;;  %v1732_v60 = vadd.f32 %v2165_v58, %v1722_v55 }
 0x959   : > { %v1730_v39 = vadd.f32 %v2164_v57, %v1714_v50  ;;  %1740 = vst.msk [vmem:[%s2644_s22 + $0x38] sm:$0xff] %vm374_vm0, %v1732_v60 }
 0x95b   : > { %1738 = vst.msk [vmem:[%s2644_s22 + $0x28] sm:$0xff] %vm374_vm0, %v1730_v39 }
 0x95c PF: > { %s18_s29 = sadd.s32 1, %s2188_s29   ;;  %s2688_s27 = smov %s2184_s28 }
 0x95d   : > { %p15_p5 = scmp.ge.s32.totalorder %s18_s29, 4   ;;  %s2689_s28 = smov %s2691_s30 }
 0x95f   :  { %17 = sbr.rel (!%p15_p5) target bundleno = 2 (0x2), region = 85 }

// kernel: basic_block_down.9
= control target key start
LH: loop header
LB: loop body
LE: loop exit
PB: predicated region body
PF: predicated region fallthrough
CT: control target
= control target key end

     0   :  { %s385_s0 = inlined_call_operand.vmem [shape: f32[32,128], index: 0, kind: input, shape index: {}]   ;;  %s386_s1 = inlined_call_operand.vmem [shape: f32[1,128], index: 1, kind: input, shape index: {}]   ;;  %s387_s2 = inlined_call_operand.vmem [shape: f32[1,128], index: 2, kind: input, shape index: {}]   ;;  %s388_s3 = inlined_call_operand.vmem [shape: bf16[128,64], index: 3, kind: input, shape index: {}]   ;;  %s389_s4 = inlined_call_operand.hbm [shape: f32[32,64], index: 4, kind: output, shape index: {}]  }
   0x1   :  { %v19_v0 = vld [vmem:[%s385_s0] sm:$0xff]  ;;  %v21_v1 = vld [vmem:[%s385_s0 + $0x10] sm:$0xff]  ;;  %v20_v2 = vld [vmem:[%s385_s0 + $0x8] sm:$0xff] }
   0x2   :  { %25 = vadd.xlane.f32.xlu0 %v19_v0  ;;  %29 = vadd.xlane.f32.xlu1 %v21_v1  ;;  %v22_v3 = vld [vmem:[%s385_s0 + $0x18] sm:$0xff] }
   0x6   :  { %27 = vadd.xlane.f32.xlu0 %v20_v2  ;;  %31 = vadd.xlane.f32.xlu1 %v22_v3 }
   0x7   :  { %9 = vsyncpa [#allocation3], 0  ;;  %v269_v20 = vld [vmem:[%s388_s3 + $0x38] sm:$0xff]   ;;  %v270_v21 = vld [vmem:[%s388_s3 + $0x30] sm:$0xff]   ;;  %vm205_vm0 = vcmask 523264  }
   0x8   :  { %246 = vmatprep.subr.bf16.mxu0 %v269_v20  ;;  %v271_v22 = vld [vmem:[%s388_s3 + $0x28] sm:$0xff]   ;;  %v272_v23 = vld [vmem:[%s388_s3 + $0x20] sm:$0xff]   ;;  %v273_v24 = vld [vmem:[%s388_s3 + $0x18] sm:$0xff]  }
   0x9   :  { %247 = vmatpush3.bf16.msra.mxu0 %v269_v20  ;;  %v274_v25 = vld [vmem:[%s388_s3 + $0x10] sm:$0xff]   ;;  %v275_v26 = vld [vmem:[%s388_s3 + $0x8] sm:$0xff]   ;;  %v276_v27 = vld [vmem:[%s388_s3] sm:$0xff]  }
   0xa   :  { %248 = vmatprep.subr.bf16.mxu0 %v270_v21  ;;  %v226_v42 = vld [vmem:[%s386_s1] ss:$0 sm:$0xff]  ;;  %s307_s1 = smov [#allocation2]  }
   0xb   :  { %v227_v47 = vld [vmem:[%s387_s2] ss:$0 sm:$0xff]  ;;  %s215_s2 = sshll.u32 %s307_s1, 4  ;;  %s216_s2 = int_to_ptr.vmem [resolvable:$true] %s215_s2 }
   0xc   :  { %s285_s15 = scalar_lea.vmem %s216_s2, 512  ;;  %p290_p1 = scmp.lt.s32.totalorder %s216_s2, %s216_s2 }
   0xd   :  { %249 = vmatpush3.bf16.msra.mxu0 %v270_v21  ;;  %p286_p0 = scmp.ne.s32.totalorder %s216_s2, %s285_s15  ;;  %p291_p2 = scmp.lt.s32.totalorder %s285_s15, %s285_s15 }
   0xe   :  { %250 = vmatprep.subr.bf16.mxu0 %v271_v22 }
   0xf   :  { %p292_p3 = por %p291_p2, %p290_p1 }
  0x11   :  { %251 = vmatpush3.bf16.msra.mxu0 %v271_v22  ;;  %p293_p4 = pnand %p292_p3, %p286_p0 }
  0x12   :  { %252 = vmatprep.subr.bf16.mxu0 %v272_v23 }
  0x15   :  { %253 = vmatpush3.bf16.msra.mxu0 %v272_v23 }
  0x16   :  { %254 = vmatprep.subr.bf16.mxu0 %v273_v24 }
  0x19   :  { %255 = vmatpush3.bf16.msra.mxu0 %v273_v24 }
  0x1a   :  { %256 = vmatprep.subr.bf16.mxu0 %v274_v25 }
  0x1d   :  { %257 = vmatpush3.bf16.msra.mxu0 %v274_v25 }
  0x1e   :  { %258 = vmatprep.subr.bf16.mxu0 %v275_v26 }
  0x21   :  { %259 = vmatpush3.bf16.msra.mxu0 %v275_v26 }
  0x22   :  { %260 = vmatprep.subr.bf16.mxu0 %v276_v27 }
  0x25   :  { %261 = vmatpush3.bf16.msra.mxu0 %v276_v27 }
  0x8b   :  { %v26_v4 = vpop.xlane.xlu0 %25  ;;  %v30_v5 = vpop.xlane.xlu1 %29 }
  0x8c   :  { %v34_v6 = vmul.f32 0.0078125, %v26_v4  ;;  %v36_v7 = vmul.f32 0.0078125, %v30_v5 }
  0x8e   :  { %v38_v8 = vsub.f32 %v19_v0, %v34_v6  ;;  %v347_v9 = vsub.f32 %v21_v1, %v36_v7 }
  0x8f   :  { %v28_v10 = vpop.xlane.xlu0 %27  ;;  %v32_v11 = vpop.xlane.xlu1 %31 }
  0x90   :  { %v35_v12 = vmul.f32 0.0078125, %v28_v10  ;;  %v42_v13 = vmul.f32 %v38_v8, %v38_v8  ;;  %v37_v14 = vmul.f32 0.0078125, %v32_v11  ;;  %v44_v17 = vmul.f32 %v347_v9, %v347_v9 }
  0x92   :  { %v39_v15 = vsub.f32 %v20_v2, %v35_v12  ;;  %46 = vadd.xlane.f32.xlu0 %v42_v13  ;;  %v41_v16 = vsub.f32 %v22_v3, %v37_v14 }
  0x94   :  { %v43_v18 = vmul.f32 %v39_v15, %v39_v15  ;;  %v45_v19 = vmul.f32 %v41_v16, %v41_v16 }
  0x96   :  { %50 = vadd.xlane.f32.xlu0 %v44_v17  ;;  %48 = vadd.xlane.f32.xlu1 %v43_v18 }
  0x9a   :  { %52 = vadd.xlane.f32.xlu1 %v45_v19 }
 0x11b   :  { %v47_v28 = vpop.xlane.xlu0 %46 }
 0x11c   :  { %v54_v29 = vmul.f32 0.0078125, %v47_v28 }
 0x11e   :  { %v58_v30 = vadd.f32 1e-05, %v54_v29 }
 0x11f   :  { %v49_v31 = vpop.xlane.xlu1 %48  ;;  %v51_v32 = vpop.xlane.xlu0 %50 }
 0x120   :  { %277 = vrsqrt.f32 %v58_v30  ;;  %v55_v33 = vmul.f32 0.0078125, %v49_v31  ;;  %v56_v34 = vmul.f32 0.0078125, %v51_v32 }
 0x122   :  { %v59_v35 = vadd.f32 1e-05, %v55_v33  ;;  %v60_v36 = vadd.f32 1e-05, %v56_v34 }
 0x123   :  { %v53_v37 = vpop.xlane.xlu1 %52 }
 0x124   :  { %279 = vrsqrt.f32 %v59_v35  ;;  %v57_v38 = vmul.f32 0.0078125, %v53_v37 }
 0x125   :  { %281 = vrsqrt.f32 %v60_v36 }
 0x126   :  { %v61_v39 = vadd.f32 1e-05, %v57_v38 }
 0x128   :  { %283 = vrsqrt.f32 %v61_v39 }
 0x12d   :  { %v278_v40 = vpop.eup %277 }
 0x12e   :  { %v66_v41 = vmul.f32 %v278_v40, %v38_v8 }
 0x130   :  { %v76_v46 = vmul.f32 %v226_v42, %v66_v41 }
 0x131   :  { %v280_v43 = vpop.eup %279 }
 0x132   :  { %v282_v44 = vpop.eup %281  ;;  %v67_v45 = vmul.f32 %v280_v43, %v39_v15  ;;  %v86_v51 = vadd.f32 %v227_v47, %v76_v46 }
 0x133   :  { %v68_v48 = vmul.f32 %v282_v44, %v347_v9 }
 0x134   :  { %v77_v49 = vmul.f32 %v226_v42, %v67_v45 }
 0x135   :  { %v284_v50 = vpop.eup %283  ;;  %v78_v54 = vmul.f32 %v226_v42, %v68_v48 }
 0x136   :  { %v87_v52 = vadd.f32 %v227_v47, %v77_v49  ;;  %v69_v53 = vmul.f32 %v284_v50, %v41_v16 }
 0x137   :  { %v88_v57 = vadd.f32 %v227_v47, %v78_v54 }
 0x138   :  { %v90_v55 = vpack.c.bf16 %v87_v52, %v86_v51  ;;  %v79_v56 = vmul.f32 %v226_v42, %v69_v53 }
 0x13a   :  { %262 = vmatprep.mubr.bf16.mxu0 %v90_v55  ;;  %v89_v58 = vadd.f32 %v227_v47, %v79_v56 }
 0x13c   :  { %v91_v59 = vpack.c.bf16 %v89_v58, %v88_v57 }
 0x13e   :  { %263 = vmatmul.mubr.bf16.vlgmr.msra.gmra.mxu0 %v91_v59 }
 0x1fe   :  { %v264_v60 = vpop.f32.mrf.mxu0 }
 0x1ff   :  { %208 = vst.msk [vmem:[#allocation2 + $0x10] sm:$0xff] %vm205_vm0, %v264_v60 }
 0x200   :  { %v190_v61 = vpop.f32.mrf.mxu0 }
 0x201   :  { %206 = vst.msk [vmem:[#allocation2] sm:$0xff] %vm205_vm0, %v190_v61 }
 0x202   :  { %v265_v62 = vpop.f32.mrf.mxu0 }
 0x203   :  { %209 = vst.msk [vmem:[#allocation2 + $0x18] sm:$0xff] %vm205_vm0, %v265_v62 }
 0x204   :  { %v193_v63 = vpop.f32.mrf.mxu0 }
 0x205   :  { %207 = vst.msk [vmem:[#allocation2 + $0x8] sm:$0xff] %vm205_vm0, %v193_v63 }
 0x206   :  { %296 = shalt.err (!%p293_p4)
}
 0x207   :  { %s308_s16 = smov 128   ;;  %s309_s17 = smov 8  }
 0x208   :  { %221 = dma.vmem_to_hbm [thread:$0]  %s216_s2, 512, %s389_s4, [#allocation3], %s308_s16, %s308_s16, %s309_s17  }
 0x209   :  { %305 = dma.done.wait [#allocation3], 512  }
 0x20a   :  { %306 = vsyncadd [#allocation3], 4294966784 }
 0x20b   :  { %225 = vsyncpa [#allocation3], 1 }

</bundles_post_ra>
